<compile_context>
chip_gen: v6e
topology: v6e:2x2x1
jax: 0.10.0
libtpu: 0.0.40
codegen_flags: <defaults>
</compile_context>

<pallas_src>
import functools

import jax
import jax.numpy as jnp
from jax.experimental import pallas as pl
from jax.experimental.pallas import tpu as pltpu

KSIZE = 7
PAD = (KSIZE - 1) // 2
_TARGET_TILE_BYTES = 1 << 20   # ~1 MiB x-tile per grid step


def _spatial_attention_kernel(w_ref, p_ref, x_ref, o_ref, pad_ref, att_ref,
                              *, h, w):
    # w_ref   : SMEM f32[2*7*7]            flattened conv weight (ci, kh, kw)
    # p_ref   : SMEM f32[3]                [conv bias, bn scale, bn shift]
    # x_ref   : VMEM [Bt, C, H*W]          lane-dense input block
    # o_ref   : VMEM [Bt, C, H*W]          lane-dense output block
    # pad_ref : VMEM f32[2, Bt, H+2P, W+2P]  zero-padded pooled maps
    # att_ref : VMEM f32[Bt, H*W]            flattened attention map
    bt, c, hw = x_ref.shape
    xf = x_ref[...].astype(jnp.float32)                # (Bt, C, HW)

    # Channel pooling in the lane-dense layout (reduce over the C axis).
    f_max = jnp.max(xf, axis=1)                        # (Bt, HW)
    f_avg = jnp.mean(xf, axis=1)                       # (Bt, HW)

    # Zero-padded pooled maps written row-by-row with static ref slices.
    pad_ref[...] = jnp.zeros_like(pad_ref)
    for r in range(h):
        row = slice(r * w, (r + 1) * w)
        pad_ref[0, :, PAD + r, PAD:PAD + w] = f_max[:, row]
        pad_ref[1, :, PAD + r, PAD:PAD + w] = f_avg[:, row]

    # 7x7 conv (2 -> 1 channels): hoist the lane-axis (kw) shift out of the
    # kh loop; rotate over 4 independent accumulators for VPU ILP.
    accs = [jnp.zeros((bt, h, w), jnp.float32) for _ in range(4)]
    t = 0
    for ci in range(2):
        pm = pad_ref[ci]                               # (Bt, H+2P, W+2P)
        for kw in range(KSIZE):
            sh = pm[:, :, kw:kw + w]                   # (Bt, H+2P, W)
            for kh in range(KSIZE):
                wt = w_ref[ci * KSIZE * KSIZE + kh * KSIZE + kw]
                accs[t % 4] = accs[t % 4] + wt * sh[:, kh:kh + h, :]
                t += 1
    conv = (accs[0] + accs[1]) + (accs[2] + accs[3])   # (Bt, H, W)

    bias = p_ref[0]
    scale = p_ref[1]
    shift = p_ref[2]
    att2d = jax.nn.sigmoid((conv + bias) * scale + shift)   # (Bt, H, W)

    # Flatten the small attention map back to the lane-dense layout via the
    # VMEM scratch, then do one full-width broadcast multiply + store.
    for r in range(h):
        att_ref[:, r * w:(r + 1) * w] = att2d[:, r, :]
    att_flat = att_ref[...]                            # (Bt, HW)
    o_ref[...] = (xf * att_flat[:, None, :]).astype(o_ref.dtype)


def _pick_block_b(batch, per_image_bytes):
    bb = max(1, min(batch, _TARGET_TILE_BYTES // max(per_image_bytes, 1)))
    if batch >= 2:
        bb = min(bb, max(1, batch // 2))   # keep >= 2 grid steps (v7x 2 TCs)
    while batch % bb:                      # largest divisor of batch <= bb
        bb -= 1
    return bb


def spatial_attention(x, conv_w, conv_b, bn_gamma, bn_beta, bn_mean, bn_var,
                      eps=1e-5):
    """x: [B, C, H, W]; conv_w: [1, 2, 7, 7]; conv_b: [1]."""
    B, C, H, W = x.shape
    HW = H * W
    block_b = _pick_block_b(B, C * HW * x.dtype.itemsize)

    # Fold eval-mode BatchNorm into scale/shift applied after conv + bias.
    scale = bn_gamma[0] / jnp.sqrt(bn_var[0] + eps)
    shift = bn_beta[0] - scale * bn_mean[0]
    w_flat = conv_w.reshape(-1).astype(jnp.float32)                 # (2*7*7,)
    params = jnp.stack([conv_b[0].astype(jnp.float32),
                        scale.astype(jnp.float32),
                        shift.astype(jnp.float32)])                 # (3,)

    x_flat = x.reshape(B, C, HW)   # lane-dense layout for the kernel

    kernel = functools.partial(_spatial_attention_kernel, h=H, w=W)
    out_flat = pl.pallas_call(
        kernel,
        out_shape=jax.ShapeDtypeStruct((B, C, HW), x.dtype),
        grid=(B // block_b,),
        in_specs=[
            pl.BlockSpec(memory_space=pltpu.MemorySpace.SMEM),  # conv weights
            pl.BlockSpec(memory_space=pltpu.MemorySpace.SMEM),  # scalar params
            pl.BlockSpec((block_b, C, HW), lambda b: (b, 0, 0)),
        ],
        out_specs=pl.BlockSpec((block_b, C, HW), lambda b: (b, 0, 0)),
        scratch_shapes=[
            pltpu.VMEM((2, block_b, H + 2 * PAD, W + 2 * PAD), jnp.float32),
            pltpu.VMEM((block_b, HW), jnp.float32),
        ],
        compiler_params=pltpu.CompilerParams(
            dimension_semantics=("parallel",)),
    )(w_flat, params, x_flat)
    # TODO(synk): for very large C*H*W (v7x has only 64 MiB VMEM) add a
    #             C-chunked multiply pass instead of one (block_b, C, H*W) tile.
    return out_flat.reshape(B, C, H, W)


def reference_forward(x, conv_w, conv_b, bn_gamma, bn_beta, bn_mean, bn_var,
                      eps=1e-5):
    f_max = jnp.max(x, axis=1, keepdims=True)
    f_avg = jnp.mean(x, axis=1, keepdims=True)
    pooled = jnp.concatenate([f_max, f_avg], axis=1)
    conv = jax.lax.conv_general_dilated(
        pooled, conv_w, window_strides=(1, 1),
        padding=[(PAD, PAD), (PAD, PAD)],
        dimension_numbers=("NCHW", "OIHW", "NCHW"),
    ) + conv_b.reshape(1, -1, 1, 1)
    bn = (bn_gamma.reshape(1, -1, 1, 1)
          * (conv - bn_mean.reshape(1, -1, 1, 1))
          / jnp.sqrt(bn_var.reshape(1, -1, 1, 1) + eps)
          + bn_beta.reshape(1, -1, 1, 1))
    return x * jax.nn.sigmoid(bn)


if __name__ == "__main__":
    key = jax.random.PRNGKey(0)
    kx, kw, kb = jax.random.split(key, 3)

    B, C, H, W = 2, 4, 16, 16
    x = jax.random.normal(kx, (B, C, H, W), dtype=jnp.float32)

    # Deterministic parameter init (Conv2d(2, 1, 7) + BatchNorm2d(1)).
    conv_w = jax.random.normal(kw, (1, 2, KSIZE, KSIZE), dtype=jnp.float32) * 0.1
    conv_b = jax.random.normal(kb, (1,), dtype=jnp.float32) * 0.1
    bn_gamma = jnp.array([1.2], dtype=jnp.float32)
    bn_beta = jnp.array([0.1], dtype=jnp.float32)
    bn_mean = jnp.array([0.05], dtype=jnp.float32)
    bn_var = jnp.array([0.9], dtype=jnp.float32)

    out = spatial_attention(x, conv_w, conv_b, bn_gamma, bn_beta,
                            bn_mean, bn_var)
    out = jax.block_until_ready(out)

    ref = reference_forward(x, conv_w, conv_b, bn_gamma, bn_beta,
                            bn_mean, bn_var)
    assert out.shape == (B, C, H, W)
    assert jnp.allclose(out, ref, atol=1e-5, rtol=1e-5), (
        float(jnp.max(jnp.abs(out - ref))))

    print("KERNEL_OK")
</pallas_src>

<mosaic_0001>
module attributes {stable_mosaic.version = 11 : i64} {
  func.func @_spatial_attention_kernel(%arg0: i32, %arg1: memref<98xf32, #tpu.memory_space<smem>>, %arg2: memref<3xf32, #tpu.memory_space<smem>>, %arg3: memref<1x4x256xf32, #tpu.memory_space<vmem>>, %arg4: memref<1x4x256xf32, #tpu.memory_space<vmem>>, %arg5: memref<2x1x22x22xf32, #tpu.memory_space<vmem>>, %arg6: memref<1x256xf32, #tpu.memory_space<vmem>>) attributes {dimension_semantics = [#tpu.dimension_semantics<parallel>], iteration_bounds = array<i64: 2>, scalar_prefetch = 0 : i64, scratch_operands = 2 : i64, tpu.core_type = #tpu.core_type<tc>, window_params = [{transform_indices = @transform_0, window_bounds = array<i64: 98>}, {transform_indices = @transform_1, window_bounds = array<i64: 3>}, {transform_indices = @transform_2, window_bounds = array<i64: 1, 4, 256>}, {transform_indices = @transform_3, window_bounds = array<i64: 1, 4, 256>}]} {
    %c0 = arith.constant 0 : index
    %c0_0 = arith.constant 0 : index
    %c0_1 = arith.constant 0 : index
    %0 = vector.load %arg3[%c0, %c0_0, %c0_1] : memref<1x4x256xf32, #tpu.memory_space<vmem>>, vector<1x4x256xf32>
    %cst = arith.constant dense<0xFF800000> : vector<1x256xf32>
    %1 = vector.multi_reduction <maximumf>, %0, %cst [1] : vector<1x4x256xf32> to vector<1x256xf32>
    %cst_2 = arith.constant dense<0.000000e+00> : vector<1x256xf32>
    %2 = vector.multi_reduction <add>, %0, %cst_2 [1] : vector<1x4x256xf32> to vector<1x256xf32>
    %cst_3 = arith.constant 4.000000e+00 : f32
    %3 = vector.broadcast %cst_3 : f32 to vector<1x256xf32>
    %4 = arith.divf %2, %3 : vector<1x256xf32>
    %cst_4 = arith.constant 0.000000e+00 : f32
    %5 = vector.broadcast %cst_4 : f32 to vector<2x1x22x22xf32>
    %c0_5 = arith.constant 0 : index
    %c0_6 = arith.constant 0 : index
    %c0_7 = arith.constant 0 : index
    %c0_8 = arith.constant 0 : index
    %6 = vector.load %arg5[%c0_5, %c0_6, %c0_7, %c0_8] : memref<2x1x22x22xf32, #tpu.memory_space<vmem>>, vector<2x1x22x22xf32>
    tpu.vector_store %arg5[%c0_5, %c0_6, %c0_7, %c0_8], %5 {strides = array<i32>} : memref<2x1x22x22xf32, #tpu.memory_space<vmem>>, vector<2x1x22x22xf32>,
    %7 = vector.extract_strided_slice %1 {offsets = [0, 0], sizes = [1, 16], strides = [1, 1]} : vector<1x256xf32> to vector<1x16xf32>
    %c0_9 = arith.constant 0 : index
    %c0_10 = arith.constant 0 : index
    %c3 = arith.constant 3 : index
    %c3_11 = arith.constant 3 : index
    %8 = vector.load %arg5[%c0_9, %c0_10, %c3, %c3_11] : memref<2x1x22x22xf32, #tpu.memory_space<vmem>>, vector<1x1x1x16xf32>
    %9 = vector.shape_cast %8 : vector<1x1x1x16xf32> to vector<1x16xf32>
    %10 = vector.shape_cast %7 : vector<1x16xf32> to vector<1x1x1x16xf32>
    tpu.vector_store %arg5[%c0_9, %c0_10, %c3, %c3_11], %10 {strides = array<i32>} : memref<2x1x22x22xf32, #tpu.memory_space<vmem>>, vector<1x1x1x16xf32>,
    %11 = vector.extract_strided_slice %4 {offsets = [0, 0], sizes = [1, 16], strides = [1, 1]} : vector<1x256xf32> to vector<1x16xf32>
    %c1 = arith.constant 1 : index
    %c0_12 = arith.constant 0 : index
    %c3_13 = arith.constant 3 : index
    %c3_14 = arith.constant 3 : index
    %12 = vector.load %arg5[%c1, %c0_12, %c3_13, %c3_14] : memref<2x1x22x22xf32, #tpu.memory_space<vmem>>, vector<1x1x1x16xf32>
    %13 = vector.shape_cast %12 : vector<1x1x1x16xf32> to vector<1x16xf32>
    %14 = vector.shape_cast %11 : vector<1x16xf32> to vector<1x1x1x16xf32>
    tpu.vector_store %arg5[%c1, %c0_12, %c3_13, %c3_14], %14 {strides = array<i32>} : memref<2x1x22x22xf32, #tpu.memory_space<vmem>>, vector<1x1x1x16xf32>,
    %15 = vector.extract_strided_slice %1 {offsets = [0, 16], sizes = [1, 16], strides = [1, 1]} : vector<1x256xf32> to vector<1x16xf32>
    %c0_15 = arith.constant 0 : index
    %c0_16 = arith.constant 0 : index
    %c4 = arith.constant 4 : index
    %c3_17 = arith.constant 3 : index
    %16 = vector.load %arg5[%c0_15, %c0_16, %c4, %c3_17] : memref<2x1x22x22xf32, #tpu.memory_space<vmem>>, vector<1x1x1x16xf32>
    %17 = vector.shape_cast %16 : vector<1x1x1x16xf32> to vector<1x16xf32>
    %18 = vector.shape_cast %15 : vector<1x16xf32> to vector<1x1x1x16xf32>
    tpu.vector_store %arg5[%c0_15, %c0_16, %c4, %c3_17], %18 {strides = array<i32>} : memref<2x1x22x22xf32, #tpu.memory_space<vmem>>, vector<1x1x1x16xf32>,
    %19 = vector.extract_strided_slice %4 {offsets = [0, 16], sizes = [1, 16], strides = [1, 1]} : vector<1x256xf32> to vector<1x16xf32>
    %c1_18 = arith.constant 1 : index
    %c0_19 = arith.constant 0 : index
    %c4_20 = arith.constant 4 : index
    %c3_21 = arith.constant 3 : index
    %20 = vector.load %arg5[%c1_18, %c0_19, %c4_20, %c3_21] : memref<2x1x22x22xf32, #tpu.memory_space<vmem>>, vector<1x1x1x16xf32>
    %21 = vector.shape_cast %20 : vector<1x1x1x16xf32> to vector<1x16xf32>
    %22 = vector.shape_cast %19 : vector<1x16xf32> to vector<1x1x1x16xf32>
    tpu.vector_store %arg5[%c1_18, %c0_19, %c4_20, %c3_21], %22 {strides = array<i32>} : memref<2x1x22x22xf32, #tpu.memory_space<vmem>>, vector<1x1x1x16xf32>,
    %23 = vector.extract_strided_slice %1 {offsets = [0, 32], sizes = [1, 16], strides = [1, 1]} : vector<1x256xf32> to vector<1x16xf32>
    %c0_22 = arith.constant 0 : index
    %c0_23 = arith.constant 0 : index
    %c5 = arith.constant 5 : index
    %c3_24 = arith.constant 3 : index
    %24 = vector.load %arg5[%c0_22, %c0_23, %c5, %c3_24] : memref<2x1x22x22xf32, #tpu.memory_space<vmem>>, vector<1x1x1x16xf32>
    %25 = vector.shape_cast %24 : vector<1x1x1x16xf32> to vector<1x16xf32>
    %26 = vector.shape_cast %23 : vector<1x16xf32> to vector<1x1x1x16xf32>
    tpu.vector_store %arg5[%c0_22, %c0_23, %c5, %c3_24], %26 {strides = array<i32>} : memref<2x1x22x22xf32, #tpu.memory_space<vmem>>, vector<1x1x1x16xf32>,
    %27 = vector.extract_strided_slice %4 {offsets = [0, 32], sizes = [1, 16], strides = [1, 1]} : vector<1x256xf32> to vector<1x16xf32>
    %c1_25 = arith.constant 1 : index
    %c0_26 = arith.constant 0 : index
    %c5_27 = arith.constant 5 : index
    %c3_28 = arith.constant 3 : index
    %28 = vector.load %arg5[%c1_25, %c0_26, %c5_27, %c3_28] : memref<2x1x22x22xf32, #tpu.memory_space<vmem>>, vector<1x1x1x16xf32>
    %29 = vector.shape_cast %28 : vector<1x1x1x16xf32> to vector<1x16xf32>
    %30 = vector.shape_cast %27 : vector<1x16xf32> to vector<1x1x1x16xf32>
    tpu.vector_store %arg5[%c1_25, %c0_26, %c5_27, %c3_28], %30 {strides = array<i32>} : memref<2x1x22x22xf32, #tpu.memory_space<vmem>>, vector<1x1x1x16xf32>,
    %31 = vector.extract_strided_slice %1 {offsets = [0, 48], sizes = [1, 16], strides = [1, 1]} : vector<1x256xf32> to vector<1x16xf32>
    %c0_29 = arith.constant 0 : index
    %c0_30 = arith.constant 0 : index
    %c6 = arith.constant 6 : index
    %c3_31 = arith.constant 3 : index
    %32 = vector.load %arg5[%c0_29, %c0_30, %c6, %c3_31] : memref<2x1x22x22xf32, #tpu.memory_space<vmem>>, vector<1x1x1x16xf32>
    %33 = vector.shape_cast %32 : vector<1x1x1x16xf32> to vector<1x16xf32>
    %34 = vector.shape_cast %31 : vector<1x16xf32> to vector<1x1x1x16xf32>
    tpu.vector_store %arg5[%c0_29, %c0_30, %c6, %c3_31], %34 {strides = array<i32>} : memref<2x1x22x22xf32, #tpu.memory_space<vmem>>, vector<1x1x1x16xf32>,
    %35 = vector.extract_strided_slice %4 {offsets = [0, 48], sizes = [1, 16], strides = [1, 1]} : vector<1x256xf32> to vector<1x16xf32>
    %c1_32 = arith.constant 1 : index
    %c0_33 = arith.constant 0 : index
    %c6_34 = arith.constant 6 : index
    %c3_35 = arith.constant 3 : index
    %36 = vector.load %arg5[%c1_32, %c0_33, %c6_34, %c3_35] : memref<2x1x22x22xf32, #tpu.memory_space<vmem>>, vector<1x1x1x16xf32>
    %37 = vector.shape_cast %36 : vector<1x1x1x16xf32> to vector<1x16xf32>
    %38 = vector.shape_cast %35 : vector<1x16xf32> to vector<1x1x1x16xf32>
    tpu.vector_store %arg5[%c1_32, %c0_33, %c6_34, %c3_35], %38 {strides = array<i32>} : memref<2x1x22x22xf32, #tpu.memory_space<vmem>>, vector<1x1x1x16xf32>,
    %39 = vector.extract_strided_slice %1 {offsets = [0, 64], sizes = [1, 16], strides = [1, 1]} : vector<1x256xf32> to vector<1x16xf32>
    %c0_36 = arith.constant 0 : index
    %c0_37 = arith.constant 0 : index
    %c7 = arith.constant 7 : index
    %c3_38 = arith.constant 3 : index
    %40 = vector.load %arg5[%c0_36, %c0_37, %c7, %c3_38] : memref<2x1x22x22xf32, #tpu.memory_space<vmem>>, vector<1x1x1x16xf32>
    %41 = vector.shape_cast %40 : vector<1x1x1x16xf32> to vector<1x16xf32>
    %42 = vector.shape_cast %39 : vector<1x16xf32> to vector<1x1x1x16xf32>
    tpu.vector_store %arg5[%c0_36, %c0_37, %c7, %c3_38], %42 {strides = array<i32>} : memref<2x1x22x22xf32, #tpu.memory_space<vmem>>, vector<1x1x1x16xf32>,
    %43 = vector.extract_strided_slice %4 {offsets = [0, 64], sizes = [1, 16], strides = [1, 1]} : vector<1x256xf32> to vector<1x16xf32>
    %c1_39 = arith.constant 1 : index
    %c0_40 = arith.constant 0 : index
    %c7_41 = arith.constant 7 : index
    %c3_42 = arith.constant 3 : index
    %44 = vector.load %arg5[%c1_39, %c0_40, %c7_41, %c3_42] : memref<2x1x22x22xf32, #tpu.memory_space<vmem>>, vector<1x1x1x16xf32>
    %45 = vector.shape_cast %44 : vector<1x1x1x16xf32> to vector<1x16xf32>
    %46 = vector.shape_cast %43 : vector<1x16xf32> to vector<1x1x1x16xf32>
    tpu.vector_store %arg5[%c1_39, %c0_40, %c7_41, %c3_42], %46 {strides = array<i32>} : memref<2x1x22x22xf32, #tpu.memory_space<vmem>>, vector<1x1x1x16xf32>,
    %47 = vector.extract_strided_slice %1 {offsets = [0, 80], sizes = [1, 16], strides = [1, 1]} : vector<1x256xf32> to vector<1x16xf32>
    %c0_43 = arith.constant 0 : index
    %c0_44 = arith.constant 0 : index
    %c8 = arith.constant 8 : index
    %c3_45 = arith.constant 3 : index
    %48 = vector.load %arg5[%c0_43, %c0_44, %c8, %c3_45] : memref<2x1x22x22xf32, #tpu.memory_space<vmem>>, vector<1x1x1x16xf32>
    %49 = vector.shape_cast %48 : vector<1x1x1x16xf32> to vector<1x16xf32>
    %50 = vector.shape_cast %47 : vector<1x16xf32> to vector<1x1x1x16xf32>
    tpu.vector_store %arg5[%c0_43, %c0_44, %c8, %c3_45], %50 {strides = array<i32>} : memref<2x1x22x22xf32, #tpu.memory_space<vmem>>, vector<1x1x1x16xf32>,
    %51 = vector.extract_strided_slice %4 {offsets = [0, 80], sizes = [1, 16], strides = [1, 1]} : vector<1x256xf32> to vector<1x16xf32>
    %c1_46 = arith.constant 1 : index
    %c0_47 = arith.constant 0 : index
    %c8_48 = arith.constant 8 : index
    %c3_49 = arith.constant 3 : index
    %52 = vector.load %arg5[%c1_46, %c0_47, %c8_48, %c3_49] : memref<2x1x22x22xf32, #tpu.memory_space<vmem>>, vector<1x1x1x16xf32>
    %53 = vector.shape_cast %52 : vector<1x1x1x16xf32> to vector<1x16xf32>
    %54 = vector.shape_cast %51 : vector<1x16xf32> to vector<1x1x1x16xf32>
    tpu.vector_store %arg5[%c1_46, %c0_47, %c8_48, %c3_49], %54 {strides = array<i32>} : memref<2x1x22x22xf32, #tpu.memory_space<vmem>>, vector<1x1x1x16xf32>,
    %55 = vector.extract_strided_slice %1 {offsets = [0, 96], sizes = [1, 16], strides = [1, 1]} : vector<1x256xf32> to vector<1x16xf32>
    %c0_50 = arith.constant 0 : index
    %c0_51 = arith.constant 0 : index
    %c9 = arith.constant 9 : index
    %c3_52 = arith.constant 3 : index
    %56 = vector.load %arg5[%c0_50, %c0_51, %c9, %c3_52] : memref<2x1x22x22xf32, #tpu.memory_space<vmem>>, vector<1x1x1x16xf32>
    %57 = vector.shape_cast %56 : vector<1x1x1x16xf32> to vector<1x16xf32>
    %58 = vector.shape_cast %55 : vector<1x16xf32> to vector<1x1x1x16xf32>
    tpu.vector_store %arg5[%c0_50, %c0_51, %c9, %c3_52], %58 {strides = array<i32>} : memref<2x1x22x22xf32, #tpu.memory_space<vmem>>, vector<1x1x1x16xf32>,
    %59 = vector.extract_strided_slice %4 {offsets = [0, 96], sizes = [1, 16], strides = [1, 1]} : vector<1x256xf32> to vector<1x16xf32>
    %c1_53 = arith.constant 1 : index
    %c0_54 = arith.constant 0 : index
    %c9_55 = arith.constant 9 : index
    %c3_56 = arith.constant 3 : index
    %60 = vector.load %arg5[%c1_53, %c0_54, %c9_55, %c3_56] : memref<2x1x22x22xf32, #tpu.memory_space<vmem>>, vector<1x1x1x16xf32>
    %61 = vector.shape_cast %60 : vector<1x1x1x16xf32> to vector<1x16xf32>
    %62 = vector.shape_cast %59 : vector<1x16xf32> to vector<1x1x1x16xf32>
    tpu.vector_store %arg5[%c1_53, %c0_54, %c9_55, %c3_56], %62 {strides = array<i32>} : memref<2x1x22x22xf32, #tpu.memory_space<vmem>>, vector<1x1x1x16xf32>,
    %63 = vector.extract_strided_slice %1 {offsets = [0, 112], sizes = [1, 16], strides = [1, 1]} : vector<1x256xf32> to vector<1x16xf32>
    %c0_57 = arith.constant 0 : index
    %c0_58 = arith.constant 0 : index
    %c10 = arith.constant 10 : index
    %c3_59 = arith.constant 3 : index
    %64 = vector.load %arg5[%c0_57, %c0_58, %c10, %c3_59] : memref<2x1x22x22xf32, #tpu.memory_space<vmem>>, vector<1x1x1x16xf32>
    %65 = vector.shape_cast %64 : vector<1x1x1x16xf32> to vector<1x16xf32>
    %66 = vector.shape_cast %63 : vector<1x16xf32> to vector<1x1x1x16xf32>
    tpu.vector_store %arg5[%c0_57, %c0_58, %c10, %c3_59], %66 {strides = array<i32>} : memref<2x1x22x22xf32, #tpu.memory_space<vmem>>, vector<1x1x1x16xf32>,
    %67 = vector.extract_strided_slice %4 {offsets = [0, 112], sizes = [1, 16], strides = [1, 1]} : vector<1x256xf32> to vector<1x16xf32>
    %c1_60 = arith.constant 1 : index
    %c0_61 = arith.constant 0 : index
    %c10_62 = arith.constant 10 : index
    %c3_63 = arith.constant 3 : index
    %68 = vector.load %arg5[%c1_60, %c0_61, %c10_62, %c3_63] : memref<2x1x22x22xf32, #tpu.memory_space<vmem>>, vector<1x1x1x16xf32>
    %69 = vector.shape_cast %68 : vector<1x1x1x16xf32> to vector<1x16xf32>
    %70 = vector.shape_cast %67 : vector<1x16xf32> to vector<1x1x1x16xf32>
    tpu.vector_store %arg5[%c1_60, %c0_61, %c10_62, %c3_63], %70 {strides = array<i32>} : memref<2x1x22x22xf32, #tpu.memory_space<vmem>>, vector<1x1x1x16xf32>,
    %71 = vector.extract_strided_slice %1 {offsets = [0, 128], sizes = [1, 16], strides = [1, 1]} : vector<1x256xf32> to vector<1x16xf32>
    %c0_64 = arith.constant 0 : index
    %c0_65 = arith.constant 0 : index
    %c11 = arith.constant 11 : index
    %c3_66 = arith.constant 3 : index
    %72 = vector.load %arg5[%c0_64, %c0_65, %c11, %c3_66] : memref<2x1x22x22xf32, #tpu.memory_space<vmem>>, vector<1x1x1x16xf32>
    %73 = vector.shape_cast %72 : vector<1x1x1x16xf32> to vector<1x16xf32>
    %74 = vector.shape_cast %71 : vector<1x16xf32> to vector<1x1x1x16xf32>
    tpu.vector_store %arg5[%c0_64, %c0_65, %c11, %c3_66], %74 {strides = array<i32>} : memref<2x1x22x22xf32, #tpu.memory_space<vmem>>, vector<1x1x1x16xf32>,
    %75 = vector.extract_strided_slice %4 {offsets = [0, 128], sizes = [1, 16], strides = [1, 1]} : vector<1x256xf32> to vector<1x16xf32>
    %c1_67 = arith.constant 1 : index
    %c0_68 = arith.constant 0 : index
    %c11_69 = arith.constant 11 : index
    %c3_70 = arith.constant 3 : index
    %76 = vector.load %arg5[%c1_67, %c0_68, %c11_69, %c3_70] : memref<2x1x22x22xf32, #tpu.memory_space<vmem>>, vector<1x1x1x16xf32>
    %77 = vector.shape_cast %76 : vector<1x1x1x16xf32> to vector<1x16xf32>
    %78 = vector.shape_cast %75 : vector<1x16xf32> to vector<1x1x1x16xf32>
    tpu.vector_store %arg5[%c1_67, %c0_68, %c11_69, %c3_70], %78 {strides = array<i32>} : memref<2x1x22x22xf32, #tpu.memory_space<vmem>>, vector<1x1x1x16xf32>,
    %79 = vector.extract_strided_slice %1 {offsets = [0, 144], sizes = [1, 16], strides = [1, 1]} : vector<1x256xf32> to vector<1x16xf32>
    %c0_71 = arith.constant 0 : index
    %c0_72 = arith.constant 0 : index
    %c12 = arith.constant 12 : index
    %c3_73 = arith.constant 3 : index
    %80 = vector.load %arg5[%c0_71, %c0_72, %c12, %c3_73] : memref<2x1x22x22xf32, #tpu.memory_space<vmem>>, vector<1x1x1x16xf32>
    %81 = vector.shape_cast %80 : vector<1x1x1x16xf32> to vector<1x16xf32>
    %82 = vector.shape_cast %79 : vector<1x16xf32> to vector<1x1x1x16xf32>
    tpu.vector_store %arg5[%c0_71, %c0_72, %c12, %c3_73], %82 {strides = array<i32>} : memref<2x1x22x22xf32, #tpu.memory_space<vmem>>, vector<1x1x1x16xf32>,
    %83 = vector.extract_strided_slice %4 {offsets = [0, 144], sizes = [1, 16], strides = [1, 1]} : vector<1x256xf32> to vector<1x16xf32>
    %c1_74 = arith.constant 1 : index
    %c0_75 = arith.constant 0 : index
    %c12_76 = arith.constant 12 : index
    %c3_77 = arith.constant 3 : index
    %84 = vector.load %arg5[%c1_74, %c0_75, %c12_76, %c3_77] : memref<2x1x22x22xf32, #tpu.memory_space<vmem>>, vector<1x1x1x16xf32>
    %85 = vector.shape_cast %84 : vector<1x1x1x16xf32> to vector<1x16xf32>
    %86 = vector.shape_cast %83 : vector<1x16xf32> to vector<1x1x1x16xf32>
    tpu.vector_store %arg5[%c1_74, %c0_75, %c12_76, %c3_77], %86 {strides = array<i32>} : memref<2x1x22x22xf32, #tpu.memory_space<vmem>>, vector<1x1x1x16xf32>,
    %87 = vector.extract_strided_slice %1 {offsets = [0, 160], sizes = [1, 16], strides = [1, 1]} : vector<1x256xf32> to vector<1x16xf32>
    %c0_78 = arith.constant 0 : index
    %c0_79 = arith.constant 0 : index
    %c13 = arith.constant 13 : index
    %c3_80 = arith.constant 3 : index
    %88 = vector.load %arg5[%c0_78, %c0_79, %c13, %c3_80] : memref<2x1x22x22xf32, #tpu.memory_space<vmem>>, vector<1x1x1x16xf32>
    %89 = vector.shape_cast %88 : vector<1x1x1x16xf32> to vector<1x16xf32>
    %90 = vector.shape_cast %87 : vector<1x16xf32> to vector<1x1x1x16xf32>
    tpu.vector_store %arg5[%c0_78, %c0_79, %c13, %c3_80], %90 {strides = array<i32>} : memref<2x1x22x22xf32, #tpu.memory_space<vmem>>, vector<1x1x1x16xf32>,
    %91 = vector.extract_strided_slice %4 {offsets = [0, 160], sizes = [1, 16], strides = [1, 1]} : vector<1x256xf32> to vector<1x16xf32>
    %c1_81 = arith.constant 1 : index
    %c0_82 = arith.constant 0 : index
    %c13_83 = arith.constant 13 : index
    %c3_84 = arith.constant 3 : index
    %92 = vector.load %arg5[%c1_81, %c0_82, %c13_83, %c3_84] : memref<2x1x22x22xf32, #tpu.memory_space<vmem>>, vector<1x1x1x16xf32>
    %93 = vector.shape_cast %92 : vector<1x1x1x16xf32> to vector<1x16xf32>
    %94 = vector.shape_cast %91 : vector<1x16xf32> to vector<1x1x1x16xf32>
    tpu.vector_store %arg5[%c1_81, %c0_82, %c13_83, %c3_84], %94 {strides = array<i32>} : memref<2x1x22x22xf32, #tpu.memory_space<vmem>>, vector<1x1x1x16xf32>,
    %95 = vector.extract_strided_slice %1 {offsets = [0, 176], sizes = [1, 16], strides = [1, 1]} : vector<1x256xf32> to vector<1x16xf32>
    %c0_85 = arith.constant 0 : index
    %c0_86 = arith.constant 0 : index
    %c14 = arith.constant 14 : index
    %c3_87 = arith.constant 3 : index
    %96 = vector.load %arg5[%c0_85, %c0_86, %c14, %c3_87] : memref<2x1x22x22xf32, #tpu.memory_space<vmem>>, vector<1x1x1x16xf32>
    %97 = vector.shape_cast %96 : vector<1x1x1x16xf32> to vector<1x16xf32>
    %98 = vector.shape_cast %95 : vector<1x16xf32> to vector<1x1x1x16xf32>
    tpu.vector_store %arg5[%c0_85, %c0_86, %c14, %c3_87], %98 {strides = array<i32>} : memref<2x1x22x22xf32, #tpu.memory_space<vmem>>, vector<1x1x1x16xf32>,
    %99 = vector.extract_strided_slice %4 {offsets = [0, 176], sizes = [1, 16], strides = [1, 1]} : vector<1x256xf32> to vector<1x16xf32>
    %c1_88 = arith.constant 1 : index
    %c0_89 = arith.constant 0 : index
    %c14_90 = arith.constant 14 : index
    %c3_91 = arith.constant 3 : index
    %100 = vector.load %arg5[%c1_88, %c0_89, %c14_90, %c3_91] : memref<2x1x22x22xf32, #tpu.memory_space<vmem>>, vector<1x1x1x16xf32>
    %101 = vector.shape_cast %100 : vector<1x1x1x16xf32> to vector<1x16xf32>
    %102 = vector.shape_cast %99 : vector<1x16xf32> to vector<1x1x1x16xf32>
    tpu.vector_store %arg5[%c1_88, %c0_89, %c14_90, %c3_91], %102 {strides = array<i32>} : memref<2x1x22x22xf32, #tpu.memory_space<vmem>>, vector<1x1x1x16xf32>,
    %103 = vector.extract_strided_slice %1 {offsets = [0, 192], sizes = [1, 16], strides = [1, 1]} : vector<1x256xf32> to vector<1x16xf32>
    %c0_92 = arith.constant 0 : index
    %c0_93 = arith.constant 0 : index
    %c15 = arith.constant 15 : index
    %c3_94 = arith.constant 3 : index
    %104 = vector.load %arg5[%c0_92, %c0_93, %c15, %c3_94] : memref<2x1x22x22xf32, #tpu.memory_space<vmem>>, vector<1x1x1x16xf32>
    %105 = vector.shape_cast %104 : vector<1x1x1x16xf32> to vector<1x16xf32>
    %106 = vector.shape_cast %103 : vector<1x16xf32> to vector<1x1x1x16xf32>
    tpu.vector_store %arg5[%c0_92, %c0_93, %c15, %c3_94], %106 {strides = array<i32>} : memref<2x1x22x22xf32, #tpu.memory_space<vmem>>, vector<1x1x1x16xf32>,
    %107 = vector.extract_strided_slice %4 {offsets = [0, 192], sizes = [1, 16], strides = [1, 1]} : vector<1x256xf32> to vector<1x16xf32>
    %c1_95 = arith.constant 1 : index
    %c0_96 = arith.constant 0 : index
    %c15_97 = arith.constant 15 : index
    %c3_98 = arith.constant 3 : index
    %108 = vector.load %arg5[%c1_95, %c0_96, %c15_97, %c3_98] : memref<2x1x22x22xf32, #tpu.memory_space<vmem>>, vector<1x1x1x16xf32>
    %109 = vector.shape_cast %108 : vector<1x1x1x16xf32> to vector<1x16xf32>
    %110 = vector.shape_cast %107 : vector<1x16xf32> to vector<1x1x1x16xf32>
    tpu.vector_store %arg5[%c1_95, %c0_96, %c15_97, %c3_98], %110 {strides = array<i32>} : memref<2x1x22x22xf32, #tpu.memory_space<vmem>>, vector<1x1x1x16xf32>,
    %111 = vector.extract_strided_slice %1 {offsets = [0, 208], sizes = [1, 16], strides = [1, 1]} : vector<1x256xf32> to vector<1x16xf32>
    %c0_99 = arith.constant 0 : index
    %c0_100 = arith.constant 0 : index
    %c16 = arith.constant 16 : index
    %c3_101 = arith.constant 3 : index
    %112 = vector.load %arg5[%c0_99, %c0_100, %c16, %c3_101] : memref<2x1x22x22xf32, #tpu.memory_space<vmem>>, vector<1x1x1x16xf32>
    %113 = vector.shape_cast %112 : vector<1x1x1x16xf32> to vector<1x16xf32>
    %114 = vector.shape_cast %111 : vector<1x16xf32> to vector<1x1x1x16xf32>
    tpu.vector_store %arg5[%c0_99, %c0_100, %c16, %c3_101], %114 {strides = array<i32>} : memref<2x1x22x22xf32, #tpu.memory_space<vmem>>, vector<1x1x1x16xf32>,
    %115 = vector.extract_strided_slice %4 {offsets = [0, 208], sizes = [1, 16], strides = [1, 1]} : vector<1x256xf32> to vector<1x16xf32>
    %c1_102 = arith.constant 1 : index
    %c0_103 = arith.constant 0 : index
    %c16_104 = arith.constant 16 : index
    %c3_105 = arith.constant 3 : index
    %116 = vector.load %arg5[%c1_102, %c0_103, %c16_104, %c3_105] : memref<2x1x22x22xf32, #tpu.memory_space<vmem>>, vector<1x1x1x16xf32>
    %117 = vector.shape_cast %116 : vector<1x1x1x16xf32> to vector<1x16xf32>
    %118 = vector.shape_cast %115 : vector<1x16xf32> to vector<1x1x1x16xf32>
    tpu.vector_store %arg5[%c1_102, %c0_103, %c16_104, %c3_105], %118 {strides = array<i32>} : memref<2x1x22x22xf32, #tpu.memory_space<vmem>>, vector<1x1x1x16xf32>,
    %119 = vector.extract_strided_slice %1 {offsets = [0, 224], sizes = [1, 16], strides = [1, 1]} : vector<1x256xf32> to vector<1x16xf32>
    %c0_106 = arith.constant 0 : index
    %c0_107 = arith.constant 0 : index
    %c17 = arith.constant 17 : index
    %c3_108 = arith.constant 3 : index
    %120 = vector.load %arg5[%c0_106, %c0_107, %c17, %c3_108] : memref<2x1x22x22xf32, #tpu.memory_space<vmem>>, vector<1x1x1x16xf32>
    %121 = vector.shape_cast %120 : vector<1x1x1x16xf32> to vector<1x16xf32>
    %122 = vector.shape_cast %119 : vector<1x16xf32> to vector<1x1x1x16xf32>
    tpu.vector_store %arg5[%c0_106, %c0_107, %c17, %c3_108], %122 {strides = array<i32>} : memref<2x1x22x22xf32, #tpu.memory_space<vmem>>, vector<1x1x1x16xf32>,
    %123 = vector.extract_strided_slice %4 {offsets = [0, 224], sizes = [1, 16], strides = [1, 1]} : vector<1x256xf32> to vector<1x16xf32>
    %c1_109 = arith.constant 1 : index
    %c0_110 = arith.constant 0 : index
    %c17_111 = arith.constant 17 : index
    %c3_112 = arith.constant 3 : index
    %124 = vector.load %arg5[%c1_109, %c0_110, %c17_111, %c3_112] : memref<2x1x22x22xf32, #tpu.memory_space<vmem>>, vector<1x1x1x16xf32>
    %125 = vector.shape_cast %124 : vector<1x1x1x16xf32> to vector<1x16xf32>
    %126 = vector.shape_cast %123 : vector<1x16xf32> to vector<1x1x1x16xf32>
    tpu.vector_store %arg5[%c1_109, %c0_110, %c17_111, %c3_112], %126 {strides = array<i32>} : memref<2x1x22x22xf32, #tpu.memory_space<vmem>>, vector<1x1x1x16xf32>,
    %127 = vector.extract_strided_slice %1 {offsets = [0, 240], sizes = [1, 16], strides = [1, 1]} : vector<1x256xf32> to vector<1x16xf32>
    %c0_113 = arith.constant 0 : index
    %c0_114 = arith.constant 0 : index
    %c18 = arith.constant 18 : index
    %c3_115 = arith.constant 3 : index
    %128 = vector.load %arg5[%c0_113, %c0_114, %c18, %c3_115] : memref<2x1x22x22xf32, #tpu.memory_space<vmem>>, vector<1x1x1x16xf32>
    %129 = vector.shape_cast %128 : vector<1x1x1x16xf32> to vector<1x16xf32>
    %130 = vector.shape_cast %127 : vector<1x16xf32> to vector<1x1x1x16xf32>
    tpu.vector_store %arg5[%c0_113, %c0_114, %c18, %c3_115], %130 {strides = array<i32>} : memref<2x1x22x22xf32, #tpu.memory_space<vmem>>, vector<1x1x1x16xf32>,
    %131 = vector.extract_strided_slice %4 {offsets = [0, 240], sizes = [1, 16], strides = [1, 1]} : vector<1x256xf32> to vector<1x16xf32>
    %c1_116 = arith.constant 1 : index
    %c0_117 = arith.constant 0 : index
    %c18_118 = arith.constant 18 : index
    %c3_119 = arith.constant 3 : index
    %132 = vector.load %arg5[%c1_116, %c0_117, %c18_118, %c3_119] : memref<2x1x22x22xf32, #tpu.memory_space<vmem>>, vector<1x1x1x16xf32>
    %133 = vector.shape_cast %132 : vector<1x1x1x16xf32> to vector<1x16xf32>
    %134 = vector.shape_cast %131 : vector<1x16xf32> to vector<1x1x1x16xf32>
    tpu.vector_store %arg5[%c1_116, %c0_117, %c18_118, %c3_119], %134 {strides = array<i32>} : memref<2x1x22x22xf32, #tpu.memory_space<vmem>>, vector<1x1x1x16xf32>,
    %cst_120 = arith.constant 0.000000e+00 : f32
    %135 = vector.broadcast %cst_120 : f32 to vector<1x16x16xf32>
    %cst_121 = arith.constant 0.000000e+00 : f32
    %136 = vector.broadcast %cst_121 : f32 to vector<1x16x16xf32>
    %cst_122 = arith.constant 0.000000e+00 : f32
    %137 = vector.broadcast %cst_122 : f32 to vector<1x16x16xf32>
    %cst_123 = arith.constant 0.000000e+00 : f32
    %138 = vector.broadcast %cst_123 : f32 to vector<1x16x16xf32>
    %c0_124 = arith.constant 0 : index
    %c0_125 = arith.constant 0 : index
    %c0_126 = arith.constant 0 : index
    %c0_127 = arith.constant 0 : index
    %139 = vector.load %arg5[%c0_124, %c0_125, %c0_126, %c0_127] : memref<2x1x22x22xf32, #tpu.memory_space<vmem>>, vector<1x1x22x22xf32>
    %140 = vector.shape_cast %139 : vector<1x1x22x22xf32> to vector<1x22x22xf32>
    %141 = vector.extract_strided_slice %140 {offsets = [0, 0, 0], sizes = [1, 22, 16], strides = [1, 1, 1]} : vector<1x22x22xf32> to vector<1x22x16xf32>
    %c0_128 = arith.constant 0 : index
    %142 = memref.load %arg1[%c0_128] : memref<98xf32, #tpu.memory_space<smem>>
    %143 = vector.extract_strided_slice %141 {offsets = [0, 0, 0], sizes = [1, 16, 16], strides = [1, 1, 1]} : vector<1x22x16xf32> to vector<1x16x16xf32>
    %144 = vector.broadcast %142 : f32 to vector<1x16x16xf32>
    %145 = arith.mulf %144, %143 : vector<1x16x16xf32>
    %146 = arith.addf %135, %145 : vector<1x16x16xf32>
    %c7_129 = arith.constant 7 : index
    %147 = memref.load %arg1[%c7_129] : memref<98xf32, #tpu.memory_space<smem>>
    %148 = vector.extract_strided_slice %141 {offsets = [0, 1, 0], sizes = [1, 16, 16], strides = [1, 1, 1]} : vector<1x22x16xf32> to vector<1x16x16xf32>
    %149 = vector.broadcast %147 : f32 to vector<1x16x16xf32>
    %150 = arith.mulf %149, %148 : vector<1x16x16xf32>
    %151 = arith.addf %136, %150 : vector<1x16x16xf32>
    %c14_130 = arith.constant 14 : index
    %152 = memref.load %arg1[%c14_130] : memref<98xf32, #tpu.memory_space<smem>>
    %153 = vector.extract_strided_slice %141 {offsets = [0, 2, 0], sizes = [1, 16, 16], strides = [1, 1, 1]} : vector<1x22x16xf32> to vector<1x16x16xf32>
    %154 = vector.broadcast %152 : f32 to vector<1x16x16xf32>
    %155 = arith.mulf %154, %153 : vector<1x16x16xf32>
    %156 = arith.addf %137, %155 : vector<1x16x16xf32>
    %c21 = arith.constant 21 : index
    %157 = memref.load %arg1[%c21] : memref<98xf32, #tpu.memory_space<smem>>
    %158 = vector.extract_strided_slice %141 {offsets = [0, 3, 0], sizes = [1, 16, 16], strides = [1, 1, 1]} : vector<1x22x16xf32> to vector<1x16x16xf32>
    %159 = vector.broadcast %157 : f32 to vector<1x16x16xf32>
    %160 = arith.mulf %159, %158 : vector<1x16x16xf32>
    %161 = arith.addf %138, %160 : vector<1x16x16xf32>
    %c28 = arith.constant 28 : index
    %162 = memref.load %arg1[%c28] : memref<98xf32, #tpu.memory_space<smem>>
    %163 = vector.extract_strided_slice %141 {offsets = [0, 4, 0], sizes = [1, 16, 16], strides = [1, 1, 1]} : vector<1x22x16xf32> to vector<1x16x16xf32>
    %164 = vector.broadcast %162 : f32 to vector<1x16x16xf32>
    %165 = arith.mulf %164, %163 : vector<1x16x16xf32>
    %166 = arith.addf %146, %165 : vector<1x16x16xf32>
    %c35 = arith.constant 35 : index
    %167 = memref.load %arg1[%c35] : memref<98xf32, #tpu.memory_space<smem>>
    %168 = vector.extract_strided_slice %141 {offsets = [0, 5, 0], sizes = [1, 16, 16], strides = [1, 1, 1]} : vector<1x22x16xf32> to vector<1x16x16xf32>
    %169 = vector.broadcast %167 : f32 to vector<1x16x16xf32>
    %170 = arith.mulf %169, %168 : vector<1x16x16xf32>
    %171 = arith.addf %151, %170 : vector<1x16x16xf32>
    %c42 = arith.constant 42 : index
    %172 = memref.load %arg1[%c42] : memref<98xf32, #tpu.memory_space<smem>>
    %173 = vector.extract_strided_slice %141 {offsets = [0, 6, 0], sizes = [1, 16, 16], strides = [1, 1, 1]} : vector<1x22x16xf32> to vector<1x16x16xf32>
    %174 = vector.broadcast %172 : f32 to vector<1x16x16xf32>
    %175 = arith.mulf %174, %173 : vector<1x16x16xf32>
    %176 = arith.addf %156, %175 : vector<1x16x16xf32>
    %177 = vector.extract_strided_slice %140 {offsets = [0, 0, 1], sizes = [1, 22, 16], strides = [1, 1, 1]} : vector<1x22x22xf32> to vector<1x22x16xf32>
    %c1_131 = arith.constant 1 : index
    %178 = memref.load %arg1[%c1_131] : memref<98xf32, #tpu.memory_space<smem>>
    %179 = vector.extract_strided_slice %177 {offsets = [0, 0, 0], sizes = [1, 16, 16], strides = [1, 1, 1]} : vector<1x22x16xf32> to vector<1x16x16xf32>
    %180 = vector.broadcast %178 : f32 to vector<1x16x16xf32>
    %181 = arith.mulf %180, %179 : vector<1x16x16xf32>
    %182 = arith.addf %161, %181 : vector<1x16x16xf32>
    %c8_132 = arith.constant 8 : index
    %183 = memref.load %arg1[%c8_132] : memref<98xf32, #tpu.memory_space<smem>>
    %184 = vector.extract_strided_slice %177 {offsets = [0, 1, 0], sizes = [1, 16, 16], strides = [1, 1, 1]} : vector<1x22x16xf32> to vector<1x16x16xf32>
    %185 = vector.broadcast %183 : f32 to vector<1x16x16xf32>
    %186 = arith.mulf %185, %184 : vector<1x16x16xf32>
    %187 = arith.addf %166, %186 : vector<1x16x16xf32>
    %c15_133 = arith.constant 15 : index
    %188 = memref.load %arg1[%c15_133] : memref<98xf32, #tpu.memory_space<smem>>
    %189 = vector.extract_strided_slice %177 {offsets = [0, 2, 0], sizes = [1, 16, 16], strides = [1, 1, 1]} : vector<1x22x16xf32> to vector<1x16x16xf32>
    %190 = vector.broadcast %188 : f32 to vector<1x16x16xf32>
    %191 = arith.mulf %190, %189 : vector<1x16x16xf32>
    %192 = arith.addf %171, %191 : vector<1x16x16xf32>
    %c22 = arith.constant 22 : index
    %193 = memref.load %arg1[%c22] : memref<98xf32, #tpu.memory_space<smem>>
    %194 = vector.extract_strided_slice %177 {offsets = [0, 3, 0], sizes = [1, 16, 16], strides = [1, 1, 1]} : vector<1x22x16xf32> to vector<1x16x16xf32>
    %195 = vector.broadcast %193 : f32 to vector<1x16x16xf32>
    %196 = arith.mulf %195, %194 : vector<1x16x16xf32>
    %197 = arith.addf %176, %196 : vector<1x16x16xf32>
    %c29 = arith.constant 29 : index
    %198 = memref.load %arg1[%c29] : memref<98xf32, #tpu.memory_space<smem>>
    %199 = vector.extract_strided_slice %177 {offsets = [0, 4, 0], sizes = [1, 16, 16], strides = [1, 1, 1]} : vector<1x22x16xf32> to vector<1x16x16xf32>
    %200 = vector.broadcast %198 : f32 to vector<1x16x16xf32>
    %201 = arith.mulf %200, %199 : vector<1x16x16xf32>
    %202 = arith.addf %182, %201 : vector<1x16x16xf32>
    %c36 = arith.constant 36 : index
    %203 = memref.load %arg1[%c36] : memref<98xf32, #tpu.memory_space<smem>>
    %204 = vector.extract_strided_slice %177 {offsets = [0, 5, 0], sizes = [1, 16, 16], strides = [1, 1, 1]} : vector<1x22x16xf32> to vector<1x16x16xf32>
    %205 = vector.broadcast %203 : f32 to vector<1x16x16xf32>
    %206 = arith.mulf %205, %204 : vector<1x16x16xf32>
    %207 = arith.addf %187, %206 : vector<1x16x16xf32>
    %c43 = arith.constant 43 : index
    %208 = memref.load %arg1[%c43] : memref<98xf32, #tpu.memory_space<smem>>
    %209 = vector.extract_strided_slice %177 {offsets = [0, 6, 0], sizes = [1, 16, 16], strides = [1, 1, 1]} : vector<1x22x16xf32> to vector<1x16x16xf32>
    %210 = vector.broadcast %208 : f32 to vector<1x16x16xf32>
    %211 = arith.mulf %210, %209 : vector<1x16x16xf32>
    %212 = arith.addf %192, %211 : vector<1x16x16xf32>
    %213 = vector.extract_strided_slice %140 {offsets = [0, 0, 2], sizes = [1, 22, 16], strides = [1, 1, 1]} : vector<1x22x22xf32> to vector<1x22x16xf32>
    %c2 = arith.constant 2 : index
    %214 = memref.load %arg1[%c2] : memref<98xf32, #tpu.memory_space<smem>>
    %215 = vector.extract_strided_slice %213 {offsets = [0, 0, 0], sizes = [1, 16, 16], strides = [1, 1, 1]} : vector<1x22x16xf32> to vector<1x16x16xf32>
    %216 = vector.broadcast %214 : f32 to vector<1x16x16xf32>
    %217 = arith.mulf %216, %215 : vector<1x16x16xf32>
    %218 = arith.addf %197, %217 : vector<1x16x16xf32>
    %c9_134 = arith.constant 9 : index
    %219 = memref.load %arg1[%c9_134] : memref<98xf32, #tpu.memory_space<smem>>
    %220 = vector.extract_strided_slice %213 {offsets = [0, 1, 0], sizes = [1, 16, 16], strides = [1, 1, 1]} : vector<1x22x16xf32> to vector<1x16x16xf32>
    %221 = vector.broadcast %219 : f32 to vector<1x16x16xf32>
    %222 = arith.mulf %221, %220 : vector<1x16x16xf32>
    %223 = arith.addf %202, %222 : vector<1x16x16xf32>
    %c16_135 = arith.constant 16 : index
    %224 = memref.load %arg1[%c16_135] : memref<98xf32, #tpu.memory_space<smem>>
    %225 = vector.extract_strided_slice %213 {offsets = [0, 2, 0], sizes = [1, 16, 16], strides = [1, 1, 1]} : vector<1x22x16xf32> to vector<1x16x16xf32>
    %226 = vector.broadcast %224 : f32 to vector<1x16x16xf32>
    %227 = arith.mulf %226, %225 : vector<1x16x16xf32>
    %228 = arith.addf %207, %227 : vector<1x16x16xf32>
    %c23 = arith.constant 23 : index
    %229 = memref.load %arg1[%c23] : memref<98xf32, #tpu.memory_space<smem>>
    %230 = vector.extract_strided_slice %213 {offsets = [0, 3, 0], sizes = [1, 16, 16], strides = [1, 1, 1]} : vector<1x22x16xf32> to vector<1x16x16xf32>
    %231 = vector.broadcast %229 : f32 to vector<1x16x16xf32>
    %232 = arith.mulf %231, %230 : vector<1x16x16xf32>
    %233 = arith.addf %212, %232 : vector<1x16x16xf32>
    %c30 = arith.constant 30 : index
    %234 = memref.load %arg1[%c30] : memref<98xf32, #tpu.memory_space<smem>>
    %235 = vector.extract_strided_slice %213 {offsets = [0, 4, 0], sizes = [1, 16, 16], strides = [1, 1, 1]} : vector<1x22x16xf32> to vector<1x16x16xf32>
    %236 = vector.broadcast %234 : f32 to vector<1x16x16xf32>
    %237 = arith.mulf %236, %235 : vector<1x16x16xf32>
    %238 = arith.addf %218, %237 : vector<1x16x16xf32>
    %c37 = arith.constant 37 : index
    %239 = memref.load %arg1[%c37] : memref<98xf32, #tpu.memory_space<smem>>
    %240 = vector.extract_strided_slice %213 {offsets = [0, 5, 0], sizes = [1, 16, 16], strides = [1, 1, 1]} : vector<1x22x16xf32> to vector<1x16x16xf32>
    %241 = vector.broadcast %239 : f32 to vector<1x16x16xf32>
    %242 = arith.mulf %241, %240 : vector<1x16x16xf32>
    %243 = arith.addf %223, %242 : vector<1x16x16xf32>
    %c44 = arith.constant 44 : index
    %244 = memref.load %arg1[%c44] : memref<98xf32, #tpu.memory_space<smem>>
    %245 = vector.extract_strided_slice %213 {offsets = [0, 6, 0], sizes = [1, 16, 16], strides = [1, 1, 1]} : vector<1x22x16xf32> to vector<1x16x16xf32>
    %246 = vector.broadcast %244 : f32 to vector<1x16x16xf32>
    %247 = arith.mulf %246, %245 : vector<1x16x16xf32>
    %248 = arith.addf %228, %247 : vector<1x16x16xf32>
    %249 = vector.extract_strided_slice %140 {offsets = [0, 0, 3], sizes = [1, 22, 16], strides = [1, 1, 1]} : vector<1x22x22xf32> to vector<1x22x16xf32>
    %c3_136 = arith.constant 3 : index
    %250 = memref.load %arg1[%c3_136] : memref<98xf32, #tpu.memory_space<smem>>
    %251 = vector.extract_strided_slice %249 {offsets = [0, 0, 0], sizes = [1, 16, 16], strides = [1, 1, 1]} : vector<1x22x16xf32> to vector<1x16x16xf32>
    %252 = vector.broadcast %250 : f32 to vector<1x16x16xf32>
    %253 = arith.mulf %252, %251 : vector<1x16x16xf32>
    %254 = arith.addf %233, %253 : vector<1x16x16xf32>
    %c10_137 = arith.constant 10 : index
    %255 = memref.load %arg1[%c10_137] : memref<98xf32, #tpu.memory_space<smem>>
    %256 = vector.extract_strided_slice %249 {offsets = [0, 1, 0], sizes = [1, 16, 16], strides = [1, 1, 1]} : vector<1x22x16xf32> to vector<1x16x16xf32>
    %257 = vector.broadcast %255 : f32 to vector<1x16x16xf32>
    %258 = arith.mulf %257, %256 : vector<1x16x16xf32>
    %259 = arith.addf %238, %258 : vector<1x16x16xf32>
    %c17_138 = arith.constant 17 : index
    %260 = memref.load %arg1[%c17_138] : memref<98xf32, #tpu.memory_space<smem>>
    %261 = vector.extract_strided_slice %249 {offsets = [0, 2, 0], sizes = [1, 16, 16], strides = [1, 1, 1]} : vector<1x22x16xf32> to vector<1x16x16xf32>
    %262 = vector.broadcast %260 : f32 to vector<1x16x16xf32>
    %263 = arith.mulf %262, %261 : vector<1x16x16xf32>
    %264 = arith.addf %243, %263 : vector<1x16x16xf32>
    %c24 = arith.constant 24 : index
    %265 = memref.load %arg1[%c24] : memref<98xf32, #tpu.memory_space<smem>>
    %266 = vector.extract_strided_slice %249 {offsets = [0, 3, 0], sizes = [1, 16, 16], strides = [1, 1, 1]} : vector<1x22x16xf32> to vector<1x16x16xf32>
    %267 = vector.broadcast %265 : f32 to vector<1x16x16xf32>
    %268 = arith.mulf %267, %266 : vector<1x16x16xf32>
    %269 = arith.addf %248, %268 : vector<1x16x16xf32>
    %c31 = arith.constant 31 : index
    %270 = memref.load %arg1[%c31] : memref<98xf32, #tpu.memory_space<smem>>
    %271 = vector.extract_strided_slice %249 {offsets = [0, 4, 0], sizes = [1, 16, 16], strides = [1, 1, 1]} : vector<1x22x16xf32> to vector<1x16x16xf32>
    %272 = vector.broadcast %270 : f32 to vector<1x16x16xf32>
    %273 = arith.mulf %272, %271 : vector<1x16x16xf32>
    %274 = arith.addf %254, %273 : vector<1x16x16xf32>
    %c38 = arith.constant 38 : index
    %275 = memref.load %arg1[%c38] : memref<98xf32, #tpu.memory_space<smem>>
    %276 = vector.extract_strided_slice %249 {offsets = [0, 5, 0], sizes = [1, 16, 16], strides = [1, 1, 1]} : vector<1x22x16xf32> to vector<1x16x16xf32>
    %277 = vector.broadcast %275 : f32 to vector<1x16x16xf32>
    %278 = arith.mulf %277, %276 : vector<1x16x16xf32>
    %279 = arith.addf %259, %278 : vector<1x16x16xf32>
    %c45 = arith.constant 45 : index
    %280 = memref.load %arg1[%c45] : memref<98xf32, #tpu.memory_space<smem>>
    %281 = vector.extract_strided_slice %249 {offsets = [0, 6, 0], sizes = [1, 16, 16], strides = [1, 1, 1]} : vector<1x22x16xf32> to vector<1x16x16xf32>
    %282 = vector.broadcast %280 : f32 to vector<1x16x16xf32>
    %283 = arith.mulf %282, %281 : vector<1x16x16xf32>
    %284 = arith.addf %264, %283 : vector<1x16x16xf32>
    %285 = vector.extract_strided_slice %140 {offsets = [0, 0, 4], sizes = [1, 22, 16], strides = [1, 1, 1]} : vector<1x22x22xf32> to vector<1x22x16xf32>
    %c4_139 = arith.constant 4 : index
    %286 = memref.load %arg1[%c4_139] : memref<98xf32, #tpu.memory_space<smem>>
    %287 = vector.extract_strided_slice %285 {offsets = [0, 0, 0], sizes = [1, 16, 16], strides = [1, 1, 1]} : vector<1x22x16xf32> to vector<1x16x16xf32>
    %288 = vector.broadcast %286 : f32 to vector<1x16x16xf32>
    %289 = arith.mulf %288, %287 : vector<1x16x16xf32>
    %290 = arith.addf %269, %289 : vector<1x16x16xf32>
    %c11_140 = arith.constant 11 : index
    %291 = memref.load %arg1[%c11_140] : memref<98xf32, #tpu.memory_space<smem>>
    %292 = vector.extract_strided_slice %285 {offsets = [0, 1, 0], sizes = [1, 16, 16], strides = [1, 1, 1]} : vector<1x22x16xf32> to vector<1x16x16xf32>
    %293 = vector.broadcast %291 : f32 to vector<1x16x16xf32>
    %294 = arith.mulf %293, %292 : vector<1x16x16xf32>
    %295 = arith.addf %274, %294 : vector<1x16x16xf32>
    %c18_141 = arith.constant 18 : index
    %296 = memref.load %arg1[%c18_141] : memref<98xf32, #tpu.memory_space<smem>>
    %297 = vector.extract_strided_slice %285 {offsets = [0, 2, 0], sizes = [1, 16, 16], strides = [1, 1, 1]} : vector<1x22x16xf32> to vector<1x16x16xf32>
    %298 = vector.broadcast %296 : f32 to vector<1x16x16xf32>
    %299 = arith.mulf %298, %297 : vector<1x16x16xf32>
    %300 = arith.addf %279, %299 : vector<1x16x16xf32>
    %c25 = arith.constant 25 : index
    %301 = memref.load %arg1[%c25] : memref<98xf32, #tpu.memory_space<smem>>
    %302 = vector.extract_strided_slice %285 {offsets = [0, 3, 0], sizes = [1, 16, 16], strides = [1, 1, 1]} : vector<1x22x16xf32> to vector<1x16x16xf32>
    %303 = vector.broadcast %301 : f32 to vector<1x16x16xf32>
    %304 = arith.mulf %303, %302 : vector<1x16x16xf32>
    %305 = arith.addf %284, %304 : vector<1x16x16xf32>
    %c32 = arith.constant 32 : index
    %306 = memref.load %arg1[%c32] : memref<98xf32, #tpu.memory_space<smem>>
    %307 = vector.extract_strided_slice %285 {offsets = [0, 4, 0], sizes = [1, 16, 16], strides = [1, 1, 1]} : vector<1x22x16xf32> to vector<1x16x16xf32>
    %308 = vector.broadcast %306 : f32 to vector<1x16x16xf32>
    %309 = arith.mulf %308, %307 : vector<1x16x16xf32>
    %310 = arith.addf %290, %309 : vector<1x16x16xf32>
    %c39 = arith.constant 39 : index
    %311 = memref.load %arg1[%c39] : memref<98xf32, #tpu.memory_space<smem>>
    %312 = vector.extract_strided_slice %285 {offsets = [0, 5, 0], sizes = [1, 16, 16], strides = [1, 1, 1]} : vector<1x22x16xf32> to vector<1x16x16xf32>
    %313 = vector.broadcast %311 : f32 to vector<1x16x16xf32>
    %314 = arith.mulf %313, %312 : vector<1x16x16xf32>
    %315 = arith.addf %295, %314 : vector<1x16x16xf32>
    %c46 = arith.constant 46 : index
    %316 = memref.load %arg1[%c46] : memref<98xf32, #tpu.memory_space<smem>>
    %317 = vector.extract_strided_slice %285 {offsets = [0, 6, 0], sizes = [1, 16, 16], strides = [1, 1, 1]} : vector<1x22x16xf32> to vector<1x16x16xf32>
    %318 = vector.broadcast %316 : f32 to vector<1x16x16xf32>
    %319 = arith.mulf %318, %317 : vector<1x16x16xf32>
    %320 = arith.addf %300, %319 : vector<1x16x16xf32>
    %321 = vector.extract_strided_slice %140 {offsets = [0, 0, 5], sizes = [1, 22, 16], strides = [1, 1, 1]} : vector<1x22x22xf32> to vector<1x22x16xf32>
    %c5_142 = arith.constant 5 : index
    %322 = memref.load %arg1[%c5_142] : memref<98xf32, #tpu.memory_space<smem>>
    %323 = vector.extract_strided_slice %321 {offsets = [0, 0, 0], sizes = [1, 16, 16], strides = [1, 1, 1]} : vector<1x22x16xf32> to vector<1x16x16xf32>
    %324 = vector.broadcast %322 : f32 to vector<1x16x16xf32>
    %325 = arith.mulf %324, %323 : vector<1x16x16xf32>
    %326 = arith.addf %305, %325 : vector<1x16x16xf32>
    %c12_143 = arith.constant 12 : index
    %327 = memref.load %arg1[%c12_143] : memref<98xf32, #tpu.memory_space<smem>>
    %328 = vector.extract_strided_slice %321 {offsets = [0, 1, 0], sizes = [1, 16, 16], strides = [1, 1, 1]} : vector<1x22x16xf32> to vector<1x16x16xf32>
    %329 = vector.broadcast %327 : f32 to vector<1x16x16xf32>
    %330 = arith.mulf %329, %328 : vector<1x16x16xf32>
    %331 = arith.addf %310, %330 : vector<1x16x16xf32>
    %c19 = arith.constant 19 : index
    %332 = memref.load %arg1[%c19] : memref<98xf32, #tpu.memory_space<smem>>
    %333 = vector.extract_strided_slice %321 {offsets = [0, 2, 0], sizes = [1, 16, 16], strides = [1, 1, 1]} : vector<1x22x16xf32> to vector<1x16x16xf32>
    %334 = vector.broadcast %332 : f32 to vector<1x16x16xf32>
    %335 = arith.mulf %334, %333 : vector<1x16x16xf32>
    %336 = arith.addf %315, %335 : vector<1x16x16xf32>
    %c26 = arith.constant 26 : index
    %337 = memref.load %arg1[%c26] : memref<98xf32, #tpu.memory_space<smem>>
    %338 = vector.extract_strided_slice %321 {offsets = [0, 3, 0], sizes = [1, 16, 16], strides = [1, 1, 1]} : vector<1x22x16xf32> to vector<1x16x16xf32>
    %339 = vector.broadcast %337 : f32 to vector<1x16x16xf32>
    %340 = arith.mulf %339, %338 : vector<1x16x16xf32>
    %341 = arith.addf %320, %340 : vector<1x16x16xf32>
    %c33 = arith.constant 33 : index
    %342 = memref.load %arg1[%c33] : memref<98xf32, #tpu.memory_space<smem>>
    %343 = vector.extract_strided_slice %321 {offsets = [0, 4, 0], sizes = [1, 16, 16], strides = [1, 1, 1]} : vector<1x22x16xf32> to vector<1x16x16xf32>
    %344 = vector.broadcast %342 : f32 to vector<1x16x16xf32>
    %345 = arith.mulf %344, %343 : vector<1x16x16xf32>
    %346 = arith.addf %326, %345 : vector<1x16x16xf32>
    %c40 = arith.constant 40 : index
    %347 = memref.load %arg1[%c40] : memref<98xf32, #tpu.memory_space<smem>>
    %348 = vector.extract_strided_slice %321 {offsets = [0, 5, 0], sizes = [1, 16, 16], strides = [1, 1, 1]} : vector<1x22x16xf32> to vector<1x16x16xf32>
    %349 = vector.broadcast %347 : f32 to vector<1x16x16xf32>
    %350 = arith.mulf %349, %348 : vector<1x16x16xf32>
    %351 = arith.addf %331, %350 : vector<1x16x16xf32>
    %c47 = arith.constant 47 : index
    %352 = memref.load %arg1[%c47] : memref<98xf32, #tpu.memory_space<smem>>
    %353 = vector.extract_strided_slice %321 {offsets = [0, 6, 0], sizes = [1, 16, 16], strides = [1, 1, 1]} : vector<1x22x16xf32> to vector<1x16x16xf32>
    %354 = vector.broadcast %352 : f32 to vector<1x16x16xf32>
    %355 = arith.mulf %354, %353 : vector<1x16x16xf32>
    %356 = arith.addf %336, %355 : vector<1x16x16xf32>
    %357 = vector.extract_strided_slice %140 {offsets = [0, 0, 6], sizes = [1, 22, 16], strides = [1, 1, 1]} : vector<1x22x22xf32> to vector<1x22x16xf32>
    %c6_144 = arith.constant 6 : index
    %358 = memref.load %arg1[%c6_144] : memref<98xf32, #tpu.memory_space<smem>>
    %359 = vector.extract_strided_slice %357 {offsets = [0, 0, 0], sizes = [1, 16, 16], strides = [1, 1, 1]} : vector<1x22x16xf32> to vector<1x16x16xf32>
    %360 = vector.broadcast %358 : f32 to vector<1x16x16xf32>
    %361 = arith.mulf %360, %359 : vector<1x16x16xf32>
    %362 = arith.addf %341, %361 : vector<1x16x16xf32>
    %c13_145 = arith.constant 13 : index
    %363 = memref.load %arg1[%c13_145] : memref<98xf32, #tpu.memory_space<smem>>
    %364 = vector.extract_strided_slice %357 {offsets = [0, 1, 0], sizes = [1, 16, 16], strides = [1, 1, 1]} : vector<1x22x16xf32> to vector<1x16x16xf32>
    %365 = vector.broadcast %363 : f32 to vector<1x16x16xf32>
    %366 = arith.mulf %365, %364 : vector<1x16x16xf32>
    %367 = arith.addf %346, %366 : vector<1x16x16xf32>
    %c20 = arith.constant 20 : index
    %368 = memref.load %arg1[%c20] : memref<98xf32, #tpu.memory_space<smem>>
    %369 = vector.extract_strided_slice %357 {offsets = [0, 2, 0], sizes = [1, 16, 16], strides = [1, 1, 1]} : vector<1x22x16xf32> to vector<1x16x16xf32>
    %370 = vector.broadcast %368 : f32 to vector<1x16x16xf32>
    %371 = arith.mulf %370, %369 : vector<1x16x16xf32>
    %372 = arith.addf %351, %371 : vector<1x16x16xf32>
    %c27 = arith.constant 27 : index
    %373 = memref.load %arg1[%c27] : memref<98xf32, #tpu.memory_space<smem>>
    %374 = vector.extract_strided_slice %357 {offsets = [0, 3, 0], sizes = [1, 16, 16], strides = [1, 1, 1]} : vector<1x22x16xf32> to vector<1x16x16xf32>
    %375 = vector.broadcast %373 : f32 to vector<1x16x16xf32>
    %376 = arith.mulf %375, %374 : vector<1x16x16xf32>
    %377 = arith.addf %356, %376 : vector<1x16x16xf32>
    %c34 = arith.constant 34 : index
    %378 = memref.load %arg1[%c34] : memref<98xf32, #tpu.memory_space<smem>>
    %379 = vector.extract_strided_slice %357 {offsets = [0, 4, 0], sizes = [1, 16, 16], strides = [1, 1, 1]} : vector<1x22x16xf32> to vector<1x16x16xf32>
    %380 = vector.broadcast %378 : f32 to vector<1x16x16xf32>
    %381 = arith.mulf %380, %379 : vector<1x16x16xf32>
    %382 = arith.addf %362, %381 : vector<1x16x16xf32>
    %c41 = arith.constant 41 : index
    %383 = memref.load %arg1[%c41] : memref<98xf32, #tpu.memory_space<smem>>
    %384 = vector.extract_strided_slice %357 {offsets = [0, 5, 0], sizes = [1, 16, 16], strides = [1, 1, 1]} : vector<1x22x16xf32> to vector<1x16x16xf32>
    %385 = vector.broadcast %383 : f32 to vector<1x16x16xf32>
    %386 = arith.mulf %385, %384 : vector<1x16x16xf32>
    %387 = arith.addf %367, %386 : vector<1x16x16xf32>
    %c48 = arith.constant 48 : index
    %388 = memref.load %arg1[%c48] : memref<98xf32, #tpu.memory_space<smem>>
    %389 = vector.extract_strided_slice %357 {offsets = [0, 6, 0], sizes = [1, 16, 16], strides = [1, 1, 1]} : vector<1x22x16xf32> to vector<1x16x16xf32>
    %390 = vector.broadcast %388 : f32 to vector<1x16x16xf32>
    %391 = arith.mulf %390, %389 : vector<1x16x16xf32>
    %392 = arith.addf %372, %391 : vector<1x16x16xf32>
    %c1_146 = arith.constant 1 : index
    %c0_147 = arith.constant 0 : index
    %c0_148 = arith.constant 0 : index
    %c0_149 = arith.constant 0 : index
    %393 = vector.load %arg5[%c1_146, %c0_147, %c0_148, %c0_149] : memref<2x1x22x22xf32, #tpu.memory_space<vmem>>, vector<1x1x22x22xf32>
    %394 = vector.shape_cast %393 : vector<1x1x22x22xf32> to vector<1x22x22xf32>
    %395 = vector.extract_strided_slice %394 {offsets = [0, 0, 0], sizes = [1, 22, 16], strides = [1, 1, 1]} : vector<1x22x22xf32> to vector<1x22x16xf32>
    %c49 = arith.constant 49 : index
    %396 = memref.load %arg1[%c49] : memref<98xf32, #tpu.memory_space<smem>>
    %397 = vector.extract_strided_slice %395 {offsets = [0, 0, 0], sizes = [1, 16, 16], strides = [1, 1, 1]} : vector<1x22x16xf32> to vector<1x16x16xf32>
    %398 = vector.broadcast %396 : f32 to vector<1x16x16xf32>
    %399 = arith.mulf %398, %397 : vector<1x16x16xf32>
    %400 = arith.addf %377, %399 : vector<1x16x16xf32>
    %c56 = arith.constant 56 : index
    %401 = memref.load %arg1[%c56] : memref<98xf32, #tpu.memory_space<smem>>
    %402 = vector.extract_strided_slice %395 {offsets = [0, 1, 0], sizes = [1, 16, 16], strides = [1, 1, 1]} : vector<1x22x16xf32> to vector<1x16x16xf32>
    %403 = vector.broadcast %401 : f32 to vector<1x16x16xf32>
    %404 = arith.mulf %403, %402 : vector<1x16x16xf32>
    %405 = arith.addf %382, %404 : vector<1x16x16xf32>
    %c63 = arith.constant 63 : index
    %406 = memref.load %arg1[%c63] : memref<98xf32, #tpu.memory_space<smem>>
    %407 = vector.extract_strided_slice %395 {offsets = [0, 2, 0], sizes = [1, 16, 16], strides = [1, 1, 1]} : vector<1x22x16xf32> to vector<1x16x16xf32>
    %408 = vector.broadcast %406 : f32 to vector<1x16x16xf32>
    %409 = arith.mulf %408, %407 : vector<1x16x16xf32>
    %410 = arith.addf %387, %409 : vector<1x16x16xf32>
    %c70 = arith.constant 70 : index
    %411 = memref.load %arg1[%c70] : memref<98xf32, #tpu.memory_space<smem>>
    %412 = vector.extract_strided_slice %395 {offsets = [0, 3, 0], sizes = [1, 16, 16], strides = [1, 1, 1]} : vector<1x22x16xf32> to vector<1x16x16xf32>
    %413 = vector.broadcast %411 : f32 to vector<1x16x16xf32>
    %414 = arith.mulf %413, %412 : vector<1x16x16xf32>
    %415 = arith.addf %392, %414 : vector<1x16x16xf32>
    %c77 = arith.constant 77 : index
    %416 = memref.load %arg1[%c77] : memref<98xf32, #tpu.memory_space<smem>>
    %417 = vector.extract_strided_slice %395 {offsets = [0, 4, 0], sizes = [1, 16, 16], strides = [1, 1, 1]} : vector<1x22x16xf32> to vector<1x16x16xf32>
    %418 = vector.broadcast %416 : f32 to vector<1x16x16xf32>
    %419 = arith.mulf %418, %417 : vector<1x16x16xf32>
    %420 = arith.addf %400, %419 : vector<1x16x16xf32>
    %c84 = arith.constant 84 : index
    %421 = memref.load %arg1[%c84] : memref<98xf32, #tpu.memory_space<smem>>
    %422 = vector.extract_strided_slice %395 {offsets = [0, 5, 0], sizes = [1, 16, 16], strides = [1, 1, 1]} : vector<1x22x16xf32> to vector<1x16x16xf32>
    %423 = vector.broadcast %421 : f32 to vector<1x16x16xf32>
    %424 = arith.mulf %423, %422 : vector<1x16x16xf32>
    %425 = arith.addf %405, %424 : vector<1x16x16xf32>
    %c91 = arith.constant 91 : index
    %426 = memref.load %arg1[%c91] : memref<98xf32, #tpu.memory_space<smem>>
    %427 = vector.extract_strided_slice %395 {offsets = [0, 6, 0], sizes = [1, 16, 16], strides = [1, 1, 1]} : vector<1x22x16xf32> to vector<1x16x16xf32>
    %428 = vector.broadcast %426 : f32 to vector<1x16x16xf32>
    %429 = arith.mulf %428, %427 : vector<1x16x16xf32>
    %430 = arith.addf %410, %429 : vector<1x16x16xf32>
    %431 = vector.extract_strided_slice %394 {offsets = [0, 0, 1], sizes = [1, 22, 16], strides = [1, 1, 1]} : vector<1x22x22xf32> to vector<1x22x16xf32>
    %c50 = arith.constant 50 : index
    %432 = memref.load %arg1[%c50] : memref<98xf32, #tpu.memory_space<smem>>
    %433 = vector.extract_strided_slice %431 {offsets = [0, 0, 0], sizes = [1, 16, 16], strides = [1, 1, 1]} : vector<1x22x16xf32> to vector<1x16x16xf32>
    %434 = vector.broadcast %432 : f32 to vector<1x16x16xf32>
    %435 = arith.mulf %434, %433 : vector<1x16x16xf32>
    %436 = arith.addf %415, %435 : vector<1x16x16xf32>
    %c57 = arith.constant 57 : index
    %437 = memref.load %arg1[%c57] : memref<98xf32, #tpu.memory_space<smem>>
    %438 = vector.extract_strided_slice %431 {offsets = [0, 1, 0], sizes = [1, 16, 16], strides = [1, 1, 1]} : vector<1x22x16xf32> to vector<1x16x16xf32>
    %439 = vector.broadcast %437 : f32 to vector<1x16x16xf32>
    %440 = arith.mulf %439, %438 : vector<1x16x16xf32>
    %441 = arith.addf %420, %440 : vector<1x16x16xf32>
    %c64 = arith.constant 64 : index
    %442 = memref.load %arg1[%c64] : memref<98xf32, #tpu.memory_space<smem>>
    %443 = vector.extract_strided_slice %431 {offsets = [0, 2, 0], sizes = [1, 16, 16], strides = [1, 1, 1]} : vector<1x22x16xf32> to vector<1x16x16xf32>
    %444 = vector.broadcast %442 : f32 to vector<1x16x16xf32>
    %445 = arith.mulf %444, %443 : vector<1x16x16xf32>
    %446 = arith.addf %425, %445 : vector<1x16x16xf32>
    %c71 = arith.constant 71 : index
    %447 = memref.load %arg1[%c71] : memref<98xf32, #tpu.memory_space<smem>>
    %448 = vector.extract_strided_slice %431 {offsets = [0, 3, 0], sizes = [1, 16, 16], strides = [1, 1, 1]} : vector<1x22x16xf32> to vector<1x16x16xf32>
    %449 = vector.broadcast %447 : f32 to vector<1x16x16xf32>
    %450 = arith.mulf %449, %448 : vector<1x16x16xf32>
    %451 = arith.addf %430, %450 : vector<1x16x16xf32>
    %c78 = arith.constant 78 : index
    %452 = memref.load %arg1[%c78] : memref<98xf32, #tpu.memory_space<smem>>
    %453 = vector.extract_strided_slice %431 {offsets = [0, 4, 0], sizes = [1, 16, 16], strides = [1, 1, 1]} : vector<1x22x16xf32> to vector<1x16x16xf32>
    %454 = vector.broadcast %452 : f32 to vector<1x16x16xf32>
    %455 = arith.mulf %454, %453 : vector<1x16x16xf32>
    %456 = arith.addf %436, %455 : vector<1x16x16xf32>
    %c85 = arith.constant 85 : index
    %457 = memref.load %arg1[%c85] : memref<98xf32, #tpu.memory_space<smem>>
    %458 = vector.extract_strided_slice %431 {offsets = [0, 5, 0], sizes = [1, 16, 16], strides = [1, 1, 1]} : vector<1x22x16xf32> to vector<1x16x16xf32>
    %459 = vector.broadcast %457 : f32 to vector<1x16x16xf32>
    %460 = arith.mulf %459, %458 : vector<1x16x16xf32>
    %461 = arith.addf %441, %460 : vector<1x16x16xf32>
    %c92 = arith.constant 92 : index
    %462 = memref.load %arg1[%c92] : memref<98xf32, #tpu.memory_space<smem>>
    %463 = vector.extract_strided_slice %431 {offsets = [0, 6, 0], sizes = [1, 16, 16], strides = [1, 1, 1]} : vector<1x22x16xf32> to vector<1x16x16xf32>
    %464 = vector.broadcast %462 : f32 to vector<1x16x16xf32>
    %465 = arith.mulf %464, %463 : vector<1x16x16xf32>
    %466 = arith.addf %446, %465 : vector<1x16x16xf32>
    %467 = vector.extract_strided_slice %394 {offsets = [0, 0, 2], sizes = [1, 22, 16], strides = [1, 1, 1]} : vector<1x22x22xf32> to vector<1x22x16xf32>
    %c51 = arith.constant 51 : index
    %468 = memref.load %arg1[%c51] : memref<98xf32, #tpu.memory_space<smem>>
    %469 = vector.extract_strided_slice %467 {offsets = [0, 0, 0], sizes = [1, 16, 16], strides = [1, 1, 1]} : vector<1x22x16xf32> to vector<1x16x16xf32>
    %470 = vector.broadcast %468 : f32 to vector<1x16x16xf32>
    %471 = arith.mulf %470, %469 : vector<1x16x16xf32>
    %472 = arith.addf %451, %471 : vector<1x16x16xf32>
    %c58 = arith.constant 58 : index
    %473 = memref.load %arg1[%c58] : memref<98xf32, #tpu.memory_space<smem>>
    %474 = vector.extract_strided_slice %467 {offsets = [0, 1, 0], sizes = [1, 16, 16], strides = [1, 1, 1]} : vector<1x22x16xf32> to vector<1x16x16xf32>
    %475 = vector.broadcast %473 : f32 to vector<1x16x16xf32>
    %476 = arith.mulf %475, %474 : vector<1x16x16xf32>
    %477 = arith.addf %456, %476 : vector<1x16x16xf32>
    %c65 = arith.constant 65 : index
    %478 = memref.load %arg1[%c65] : memref<98xf32, #tpu.memory_space<smem>>
    %479 = vector.extract_strided_slice %467 {offsets = [0, 2, 0], sizes = [1, 16, 16], strides = [1, 1, 1]} : vector<1x22x16xf32> to vector<1x16x16xf32>
    %480 = vector.broadcast %478 : f32 to vector<1x16x16xf32>
    %481 = arith.mulf %480, %479 : vector<1x16x16xf32>
    %482 = arith.addf %461, %481 : vector<1x16x16xf32>
    %c72 = arith.constant 72 : index
    %483 = memref.load %arg1[%c72] : memref<98xf32, #tpu.memory_space<smem>>
    %484 = vector.extract_strided_slice %467 {offsets = [0, 3, 0], sizes = [1, 16, 16], strides = [1, 1, 1]} : vector<1x22x16xf32> to vector<1x16x16xf32>
    %485 = vector.broadcast %483 : f32 to vector<1x16x16xf32>
    %486 = arith.mulf %485, %484 : vector<1x16x16xf32>
    %487 = arith.addf %466, %486 : vector<1x16x16xf32>
    %c79 = arith.constant 79 : index
    %488 = memref.load %arg1[%c79] : memref<98xf32, #tpu.memory_space<smem>>
    %489 = vector.extract_strided_slice %467 {offsets = [0, 4, 0], sizes = [1, 16, 16], strides = [1, 1, 1]} : vector<1x22x16xf32> to vector<1x16x16xf32>
    %490 = vector.broadcast %488 : f32 to vector<1x16x16xf32>
    %491 = arith.mulf %490, %489 : vector<1x16x16xf32>
    %492 = arith.addf %472, %491 : vector<1x16x16xf32>
    %c86 = arith.constant 86 : index
    %493 = memref.load %arg1[%c86] : memref<98xf32, #tpu.memory_space<smem>>
    %494 = vector.extract_strided_slice %467 {offsets = [0, 5, 0], sizes = [1, 16, 16], strides = [1, 1, 1]} : vector<1x22x16xf32> to vector<1x16x16xf32>
    %495 = vector.broadcast %493 : f32 to vector<1x16x16xf32>
    %496 = arith.mulf %495, %494 : vector<1x16x16xf32>
    %497 = arith.addf %477, %496 : vector<1x16x16xf32>
    %c93 = arith.constant 93 : index
    %498 = memref.load %arg1[%c93] : memref<98xf32, #tpu.memory_space<smem>>
    %499 = vector.extract_strided_slice %467 {offsets = [0, 6, 0], sizes = [1, 16, 16], strides = [1, 1, 1]} : vector<1x22x16xf32> to vector<1x16x16xf32>
    %500 = vector.broadcast %498 : f32 to vector<1x16x16xf32>
    %501 = arith.mulf %500, %499 : vector<1x16x16xf32>
    %502 = arith.addf %482, %501 : vector<1x16x16xf32>
    %503 = vector.extract_strided_slice %394 {offsets = [0, 0, 3], sizes = [1, 22, 16], strides = [1, 1, 1]} : vector<1x22x22xf32> to vector<1x22x16xf32>
    %c52 = arith.constant 52 : index
    %504 = memref.load %arg1[%c52] : memref<98xf32, #tpu.memory_space<smem>>
    %505 = vector.extract_strided_slice %503 {offsets = [0, 0, 0], sizes = [1, 16, 16], strides = [1, 1, 1]} : vector<1x22x16xf32> to vector<1x16x16xf32>
    %506 = vector.broadcast %504 : f32 to vector<1x16x16xf32>
    %507 = arith.mulf %506, %505 : vector<1x16x16xf32>
    %508 = arith.addf %487, %507 : vector<1x16x16xf32>
    %c59 = arith.constant 59 : index
    %509 = memref.load %arg1[%c59] : memref<98xf32, #tpu.memory_space<smem>>
    %510 = vector.extract_strided_slice %503 {offsets = [0, 1, 0], sizes = [1, 16, 16], strides = [1, 1, 1]} : vector<1x22x16xf32> to vector<1x16x16xf32>
    %511 = vector.broadcast %509 : f32 to vector<1x16x16xf32>
    %512 = arith.mulf %511, %510 : vector<1x16x16xf32>
    %513 = arith.addf %492, %512 : vector<1x16x16xf32>
    %c66 = arith.constant 66 : index
    %514 = memref.load %arg1[%c66] : memref<98xf32, #tpu.memory_space<smem>>
    %515 = vector.extract_strided_slice %503 {offsets = [0, 2, 0], sizes = [1, 16, 16], strides = [1, 1, 1]} : vector<1x22x16xf32> to vector<1x16x16xf32>
    %516 = vector.broadcast %514 : f32 to vector<1x16x16xf32>
    %517 = arith.mulf %516, %515 : vector<1x16x16xf32>
    %518 = arith.addf %497, %517 : vector<1x16x16xf32>
    %c73 = arith.constant 73 : index
    %519 = memref.load %arg1[%c73] : memref<98xf32, #tpu.memory_space<smem>>
    %520 = vector.extract_strided_slice %503 {offsets = [0, 3, 0], sizes = [1, 16, 16], strides = [1, 1, 1]} : vector<1x22x16xf32> to vector<1x16x16xf32>
    %521 = vector.broadcast %519 : f32 to vector<1x16x16xf32>
    %522 = arith.mulf %521, %520 : vector<1x16x16xf32>
    %523 = arith.addf %502, %522 : vector<1x16x16xf32>
    %c80 = arith.constant 80 : index
    %524 = memref.load %arg1[%c80] : memref<98xf32, #tpu.memory_space<smem>>
    %525 = vector.extract_strided_slice %503 {offsets = [0, 4, 0], sizes = [1, 16, 16], strides = [1, 1, 1]} : vector<1x22x16xf32> to vector<1x16x16xf32>
    %526 = vector.broadcast %524 : f32 to vector<1x16x16xf32>
    %527 = arith.mulf %526, %525 : vector<1x16x16xf32>
    %528 = arith.addf %508, %527 : vector<1x16x16xf32>
    %c87 = arith.constant 87 : index
    %529 = memref.load %arg1[%c87] : memref<98xf32, #tpu.memory_space<smem>>
    %530 = vector.extract_strided_slice %503 {offsets = [0, 5, 0], sizes = [1, 16, 16], strides = [1, 1, 1]} : vector<1x22x16xf32> to vector<1x16x16xf32>
    %531 = vector.broadcast %529 : f32 to vector<1x16x16xf32>
    %532 = arith.mulf %531, %530 : vector<1x16x16xf32>
    %533 = arith.addf %513, %532 : vector<1x16x16xf32>
    %c94 = arith.constant 94 : index
    %534 = memref.load %arg1[%c94] : memref<98xf32, #tpu.memory_space<smem>>
    %535 = vector.extract_strided_slice %503 {offsets = [0, 6, 0], sizes = [1, 16, 16], strides = [1, 1, 1]} : vector<1x22x16xf32> to vector<1x16x16xf32>
    %536 = vector.broadcast %534 : f32 to vector<1x16x16xf32>
    %537 = arith.mulf %536, %535 : vector<1x16x16xf32>
    %538 = arith.addf %518, %537 : vector<1x16x16xf32>
    %539 = vector.extract_strided_slice %394 {offsets = [0, 0, 4], sizes = [1, 22, 16], strides = [1, 1, 1]} : vector<1x22x22xf32> to vector<1x22x16xf32>
    %c53 = arith.constant 53 : index
    %540 = memref.load %arg1[%c53] : memref<98xf32, #tpu.memory_space<smem>>
    %541 = vector.extract_strided_slice %539 {offsets = [0, 0, 0], sizes = [1, 16, 16], strides = [1, 1, 1]} : vector<1x22x16xf32> to vector<1x16x16xf32>
    %542 = vector.broadcast %540 : f32 to vector<1x16x16xf32>
    %543 = arith.mulf %542, %541 : vector<1x16x16xf32>
    %544 = arith.addf %523, %543 : vector<1x16x16xf32>
    %c60 = arith.constant 60 : index
    %545 = memref.load %arg1[%c60] : memref<98xf32, #tpu.memory_space<smem>>
    %546 = vector.extract_strided_slice %539 {offsets = [0, 1, 0], sizes = [1, 16, 16], strides = [1, 1, 1]} : vector<1x22x16xf32> to vector<1x16x16xf32>
    %547 = vector.broadcast %545 : f32 to vector<1x16x16xf32>
    %548 = arith.mulf %547, %546 : vector<1x16x16xf32>
    %549 = arith.addf %528, %548 : vector<1x16x16xf32>
    %c67 = arith.constant 67 : index
    %550 = memref.load %arg1[%c67] : memref<98xf32, #tpu.memory_space<smem>>
    %551 = vector.extract_strided_slice %539 {offsets = [0, 2, 0], sizes = [1, 16, 16], strides = [1, 1, 1]} : vector<1x22x16xf32> to vector<1x16x16xf32>
    %552 = vector.broadcast %550 : f32 to vector<1x16x16xf32>
    %553 = arith.mulf %552, %551 : vector<1x16x16xf32>
    %554 = arith.addf %533, %553 : vector<1x16x16xf32>
    %c74 = arith.constant 74 : index
    %555 = memref.load %arg1[%c74] : memref<98xf32, #tpu.memory_space<smem>>
    %556 = vector.extract_strided_slice %539 {offsets = [0, 3, 0], sizes = [1, 16, 16], strides = [1, 1, 1]} : vector<1x22x16xf32> to vector<1x16x16xf32>
    %557 = vector.broadcast %555 : f32 to vector<1x16x16xf32>
    %558 = arith.mulf %557, %556 : vector<1x16x16xf32>
    %559 = arith.addf %538, %558 : vector<1x16x16xf32>
    %c81 = arith.constant 81 : index
    %560 = memref.load %arg1[%c81] : memref<98xf32, #tpu.memory_space<smem>>
    %561 = vector.extract_strided_slice %539 {offsets = [0, 4, 0], sizes = [1, 16, 16], strides = [1, 1, 1]} : vector<1x22x16xf32> to vector<1x16x16xf32>
    %562 = vector.broadcast %560 : f32 to vector<1x16x16xf32>
    %563 = arith.mulf %562, %561 : vector<1x16x16xf32>
    %564 = arith.addf %544, %563 : vector<1x16x16xf32>
    %c88 = arith.constant 88 : index
    %565 = memref.load %arg1[%c88] : memref<98xf32, #tpu.memory_space<smem>>
    %566 = vector.extract_strided_slice %539 {offsets = [0, 5, 0], sizes = [1, 16, 16], strides = [1, 1, 1]} : vector<1x22x16xf32> to vector<1x16x16xf32>
    %567 = vector.broadcast %565 : f32 to vector<1x16x16xf32>
    %568 = arith.mulf %567, %566 : vector<1x16x16xf32>
    %569 = arith.addf %549, %568 : vector<1x16x16xf32>
    %c95 = arith.constant 95 : index
    %570 = memref.load %arg1[%c95] : memref<98xf32, #tpu.memory_space<smem>>
    %571 = vector.extract_strided_slice %539 {offsets = [0, 6, 0], sizes = [1, 16, 16], strides = [1, 1, 1]} : vector<1x22x16xf32> to vector<1x16x16xf32>
    %572 = vector.broadcast %570 : f32 to vector<1x16x16xf32>
    %573 = arith.mulf %572, %571 : vector<1x16x16xf32>
    %574 = arith.addf %554, %573 : vector<1x16x16xf32>
    %575 = vector.extract_strided_slice %394 {offsets = [0, 0, 5], sizes = [1, 22, 16], strides = [1, 1, 1]} : vector<1x22x22xf32> to vector<1x22x16xf32>
    %c54 = arith.constant 54 : index
    %576 = memref.load %arg1[%c54] : memref<98xf32, #tpu.memory_space<smem>>
    %577 = vector.extract_strided_slice %575 {offsets = [0, 0, 0], sizes = [1, 16, 16], strides = [1, 1, 1]} : vector<1x22x16xf32> to vector<1x16x16xf32>
    %578 = vector.broadcast %576 : f32 to vector<1x16x16xf32>
    %579 = arith.mulf %578, %577 : vector<1x16x16xf32>
    %580 = arith.addf %559, %579 : vector<1x16x16xf32>
    %c61 = arith.constant 61 : index
    %581 = memref.load %arg1[%c61] : memref<98xf32, #tpu.memory_space<smem>>
    %582 = vector.extract_strided_slice %575 {offsets = [0, 1, 0], sizes = [1, 16, 16], strides = [1, 1, 1]} : vector<1x22x16xf32> to vector<1x16x16xf32>
    %583 = vector.broadcast %581 : f32 to vector<1x16x16xf32>
    %584 = arith.mulf %583, %582 : vector<1x16x16xf32>
    %585 = arith.addf %564, %584 : vector<1x16x16xf32>
    %c68 = arith.constant 68 : index
    %586 = memref.load %arg1[%c68] : memref<98xf32, #tpu.memory_space<smem>>
    %587 = vector.extract_strided_slice %575 {offsets = [0, 2, 0], sizes = [1, 16, 16], strides = [1, 1, 1]} : vector<1x22x16xf32> to vector<1x16x16xf32>
    %588 = vector.broadcast %586 : f32 to vector<1x16x16xf32>
    %589 = arith.mulf %588, %587 : vector<1x16x16xf32>
    %590 = arith.addf %569, %589 : vector<1x16x16xf32>
    %c75 = arith.constant 75 : index
    %591 = memref.load %arg1[%c75] : memref<98xf32, #tpu.memory_space<smem>>
    %592 = vector.extract_strided_slice %575 {offsets = [0, 3, 0], sizes = [1, 16, 16], strides = [1, 1, 1]} : vector<1x22x16xf32> to vector<1x16x16xf32>
    %593 = vector.broadcast %591 : f32 to vector<1x16x16xf32>
    %594 = arith.mulf %593, %592 : vector<1x16x16xf32>
    %595 = arith.addf %574, %594 : vector<1x16x16xf32>
    %c82 = arith.constant 82 : index
    %596 = memref.load %arg1[%c82] : memref<98xf32, #tpu.memory_space<smem>>
    %597 = vector.extract_strided_slice %575 {offsets = [0, 4, 0], sizes = [1, 16, 16], strides = [1, 1, 1]} : vector<1x22x16xf32> to vector<1x16x16xf32>
    %598 = vector.broadcast %596 : f32 to vector<1x16x16xf32>
    %599 = arith.mulf %598, %597 : vector<1x16x16xf32>
    %600 = arith.addf %580, %599 : vector<1x16x16xf32>
    %c89 = arith.constant 89 : index
    %601 = memref.load %arg1[%c89] : memref<98xf32, #tpu.memory_space<smem>>
    %602 = vector.extract_strided_slice %575 {offsets = [0, 5, 0], sizes = [1, 16, 16], strides = [1, 1, 1]} : vector<1x22x16xf32> to vector<1x16x16xf32>
    %603 = vector.broadcast %601 : f32 to vector<1x16x16xf32>
    %604 = arith.mulf %603, %602 : vector<1x16x16xf32>
    %605 = arith.addf %585, %604 : vector<1x16x16xf32>
    %c96 = arith.constant 96 : index
    %606 = memref.load %arg1[%c96] : memref<98xf32, #tpu.memory_space<smem>>
    %607 = vector.extract_strided_slice %575 {offsets = [0, 6, 0], sizes = [1, 16, 16], strides = [1, 1, 1]} : vector<1x22x16xf32> to vector<1x16x16xf32>
    %608 = vector.broadcast %606 : f32 to vector<1x16x16xf32>
    %609 = arith.mulf %608, %607 : vector<1x16x16xf32>
    %610 = arith.addf %590, %609 : vector<1x16x16xf32>
    %611 = vector.extract_strided_slice %394 {offsets = [0, 0, 6], sizes = [1, 22, 16], strides = [1, 1, 1]} : vector<1x22x22xf32> to vector<1x22x16xf32>
    %c55 = arith.constant 55 : index
    %612 = memref.load %arg1[%c55] : memref<98xf32, #tpu.memory_space<smem>>
    %613 = vector.extract_strided_slice %611 {offsets = [0, 0, 0], sizes = [1, 16, 16], strides = [1, 1, 1]} : vector<1x22x16xf32> to vector<1x16x16xf32>
    %614 = vector.broadcast %612 : f32 to vector<1x16x16xf32>
    %615 = arith.mulf %614, %613 : vector<1x16x16xf32>
    %616 = arith.addf %595, %615 : vector<1x16x16xf32>
    %c62 = arith.constant 62 : index
    %617 = memref.load %arg1[%c62] : memref<98xf32, #tpu.memory_space<smem>>
    %618 = vector.extract_strided_slice %611 {offsets = [0, 1, 0], sizes = [1, 16, 16], strides = [1, 1, 1]} : vector<1x22x16xf32> to vector<1x16x16xf32>
    %619 = vector.broadcast %617 : f32 to vector<1x16x16xf32>
    %620 = arith.mulf %619, %618 : vector<1x16x16xf32>
    %621 = arith.addf %600, %620 : vector<1x16x16xf32>
    %c69 = arith.constant 69 : index
    %622 = memref.load %arg1[%c69] : memref<98xf32, #tpu.memory_space<smem>>
    %623 = vector.extract_strided_slice %611 {offsets = [0, 2, 0], sizes = [1, 16, 16], strides = [1, 1, 1]} : vector<1x22x16xf32> to vector<1x16x16xf32>
    %624 = vector.broadcast %622 : f32 to vector<1x16x16xf32>
    %625 = arith.mulf %624, %623 : vector<1x16x16xf32>
    %626 = arith.addf %605, %625 : vector<1x16x16xf32>
    %c76 = arith.constant 76 : index
    %627 = memref.load %arg1[%c76] : memref<98xf32, #tpu.memory_space<smem>>
    %628 = vector.extract_strided_slice %611 {offsets = [0, 3, 0], sizes = [1, 16, 16], strides = [1, 1, 1]} : vector<1x22x16xf32> to vector<1x16x16xf32>
    %629 = vector.broadcast %627 : f32 to vector<1x16x16xf32>
    %630 = arith.mulf %629, %628 : vector<1x16x16xf32>
    %631 = arith.addf %610, %630 : vector<1x16x16xf32>
    %c83 = arith.constant 83 : index
    %632 = memref.load %arg1[%c83] : memref<98xf32, #tpu.memory_space<smem>>
    %633 = vector.extract_strided_slice %611 {offsets = [0, 4, 0], sizes = [1, 16, 16], strides = [1, 1, 1]} : vector<1x22x16xf32> to vector<1x16x16xf32>
    %634 = vector.broadcast %632 : f32 to vector<1x16x16xf32>
    %635 = arith.mulf %634, %633 : vector<1x16x16xf32>
    %636 = arith.addf %616, %635 : vector<1x16x16xf32>
    %c90 = arith.constant 90 : index
    %637 = memref.load %arg1[%c90] : memref<98xf32, #tpu.memory_space<smem>>
    %638 = vector.extract_strided_slice %611 {offsets = [0, 5, 0], sizes = [1, 16, 16], strides = [1, 1, 1]} : vector<1x22x16xf32> to vector<1x16x16xf32>
    %639 = vector.broadcast %637 : f32 to vector<1x16x16xf32>
    %640 = arith.mulf %639, %638 : vector<1x16x16xf32>
    %641 = arith.addf %621, %640 : vector<1x16x16xf32>
    %c97 = arith.constant 97 : index
    %642 = memref.load %arg1[%c97] : memref<98xf32, #tpu.memory_space<smem>>
    %643 = vector.extract_strided_slice %611 {offsets = [0, 6, 0], sizes = [1, 16, 16], strides = [1, 1, 1]} : vector<1x22x16xf32> to vector<1x16x16xf32>
    %644 = vector.broadcast %642 : f32 to vector<1x16x16xf32>
    %645 = arith.mulf %644, %643 : vector<1x16x16xf32>
    %646 = arith.addf %626, %645 : vector<1x16x16xf32>
    %647 = arith.addf %641, %646 : vector<1x16x16xf32>
    %648 = arith.addf %631, %636 : vector<1x16x16xf32>
    %649 = arith.addf %647, %648 : vector<1x16x16xf32>
    %c0_150 = arith.constant 0 : index
    %650 = memref.load %arg2[%c0_150] : memref<3xf32, #tpu.memory_space<smem>>
    %c1_151 = arith.constant 1 : index
    %651 = memref.load %arg2[%c1_151] : memref<3xf32, #tpu.memory_space<smem>>
    %c2_152 = arith.constant 2 : index
    %652 = memref.load %arg2[%c2_152] : memref<3xf32, #tpu.memory_space<smem>>
    %653 = vector.broadcast %650 : f32 to vector<1x16x16xf32>
    %654 = arith.addf %649, %653 : vector<1x16x16xf32>
    %655 = vector.broadcast %651 : f32 to vector<1x16x16xf32>
    %656 = arith.mulf %654, %655 : vector<1x16x16xf32>
    %657 = vector.broadcast %652 : f32 to vector<1x16x16xf32>
    %658 = arith.addf %656, %657 : vector<1x16x16xf32>
    %659 = arith.negf %658 : vector<1x16x16xf32>
    %660 = math.exp %659 : vector<1x16x16xf32>
    %cst_153 = arith.constant 1.000000e+00 : f32
    %661 = vector.broadcast %cst_153 : f32 to vector<1x16x16xf32>
    %662 = arith.addf %661, %660 : vector<1x16x16xf32>
    %663 = arith.divf %661, %662 : vector<1x16x16xf32>
    %664 = vector.extract_strided_slice %663 {offsets = [0, 0, 0], sizes = [1, 1, 16], strides = [1, 1, 1]} : vector<1x16x16xf32> to vector<1x1x16xf32>
    %665 = vector.shape_cast %664 : vector<1x1x16xf32> to vector<1x16xf32>
    %c0_154 = arith.constant 0 : index
    %c0_155 = arith.constant 0 : index
    %666 = vector.load %arg6[%c0_154, %c0_155] : memref<1x256xf32, #tpu.memory_space<vmem>>, vector<1x16xf32>
    tpu.vector_store %arg6[%c0_154, %c0_155], %665 {strides = array<i32>} : memref<1x256xf32, #tpu.memory_space<vmem>>, vector<1x16xf32>,
    %667 = vector.extract_strided_slice %663 {offsets = [0, 1, 0], sizes = [1, 1, 16], strides = [1, 1, 1]} : vector<1x16x16xf32> to vector<1x1x16xf32>
    %668 = vector.shape_cast %667 : vector<1x1x16xf32> to vector<1x16xf32>
    %c0_156 = arith.constant 0 : index
    %c16_157 = arith.constant 16 : index
    %669 = vector.load %arg6[%c0_156, %c16_157] : memref<1x256xf32, #tpu.memory_space<vmem>>, vector<1x16xf32>
    tpu.vector_store %arg6[%c0_156, %c16_157], %668 {strides = array<i32>} : memref<1x256xf32, #tpu.memory_space<vmem>>, vector<1x16xf32>,
    %670 = vector.extract_strided_slice %663 {offsets = [0, 2, 0], sizes = [1, 1, 16], strides = [1, 1, 1]} : vector<1x16x16xf32> to vector<1x1x16xf32>
    %671 = vector.shape_cast %670 : vector<1x1x16xf32> to vector<1x16xf32>
    %c0_158 = arith.constant 0 : index
    %c32_159 = arith.constant 32 : index
    %672 = vector.load %arg6[%c0_158, %c32_159] : memref<1x256xf32, #tpu.memory_space<vmem>>, vector<1x16xf32>
    tpu.vector_store %arg6[%c0_158, %c32_159], %671 {strides = array<i32>} : memref<1x256xf32, #tpu.memory_space<vmem>>, vector<1x16xf32>,
    %673 = vector.extract_strided_slice %663 {offsets = [0, 3, 0], sizes = [1, 1, 16], strides = [1, 1, 1]} : vector<1x16x16xf32> to vector<1x1x16xf32>
    %674 = vector.shape_cast %673 : vector<1x1x16xf32> to vector<1x16xf32>
    %c0_160 = arith.constant 0 : index
    %c48_161 = arith.constant 48 : index
    %675 = vector.load %arg6[%c0_160, %c48_161] : memref<1x256xf32, #tpu.memory_space<vmem>>, vector<1x16xf32>
    tpu.vector_store %arg6[%c0_160, %c48_161], %674 {strides = array<i32>} : memref<1x256xf32, #tpu.memory_space<vmem>>, vector<1x16xf32>,
    %676 = vector.extract_strided_slice %663 {offsets = [0, 4, 0], sizes = [1, 1, 16], strides = [1, 1, 1]} : vector<1x16x16xf32> to vector<1x1x16xf32>
    %677 = vector.shape_cast %676 : vector<1x1x16xf32> to vector<1x16xf32>
    %c0_162 = arith.constant 0 : index
    %c64_163 = arith.constant 64 : index
    %678 = vector.load %arg6[%c0_162, %c64_163] : memref<1x256xf32, #tpu.memory_space<vmem>>, vector<1x16xf32>
    tpu.vector_store %arg6[%c0_162, %c64_163], %677 {strides = array<i32>} : memref<1x256xf32, #tpu.memory_space<vmem>>, vector<1x16xf32>,
    %679 = vector.extract_strided_slice %663 {offsets = [0, 5, 0], sizes = [1, 1, 16], strides = [1, 1, 1]} : vector<1x16x16xf32> to vector<1x1x16xf32>
    %680 = vector.shape_cast %679 : vector<1x1x16xf32> to vector<1x16xf32>
    %c0_164 = arith.constant 0 : index
    %c80_165 = arith.constant 80 : index
    %681 = vector.load %arg6[%c0_164, %c80_165] : memref<1x256xf32, #tpu.memory_space<vmem>>, vector<1x16xf32>
    tpu.vector_store %arg6[%c0_164, %c80_165], %680 {strides = array<i32>} : memref<1x256xf32, #tpu.memory_space<vmem>>, vector<1x16xf32>,
    %682 = vector.extract_strided_slice %663 {offsets = [0, 6, 0], sizes = [1, 1, 16], strides = [1, 1, 1]} : vector<1x16x16xf32> to vector<1x1x16xf32>
    %683 = vector.shape_cast %682 : vector<1x1x16xf32> to vector<1x16xf32>
    %c0_166 = arith.constant 0 : index
    %c96_167 = arith.constant 96 : index
    %684 = vector.load %arg6[%c0_166, %c96_167] : memref<1x256xf32, #tpu.memory_space<vmem>>, vector<1x16xf32>
    tpu.vector_store %arg6[%c0_166, %c96_167], %683 {strides = array<i32>} : memref<1x256xf32, #tpu.memory_space<vmem>>, vector<1x16xf32>,
    %685 = vector.extract_strided_slice %663 {offsets = [0, 7, 0], sizes = [1, 1, 16], strides = [1, 1, 1]} : vector<1x16x16xf32> to vector<1x1x16xf32>
    %686 = vector.shape_cast %685 : vector<1x1x16xf32> to vector<1x16xf32>
    %c0_168 = arith.constant 0 : index
    %c112 = arith.constant 112 : index
    %687 = vector.load %arg6[%c0_168, %c112] : memref<1x256xf32, #tpu.memory_space<vmem>>, vector<1x16xf32>
    tpu.vector_store %arg6[%c0_168, %c112], %686 {strides = array<i32>} : memref<1x256xf32, #tpu.memory_space<vmem>>, vector<1x16xf32>,
    %688 = vector.extract_strided_slice %663 {offsets = [0, 8, 0], sizes = [1, 1, 16], strides = [1, 1, 1]} : vector<1x16x16xf32> to vector<1x1x16xf32>
    %689 = vector.shape_cast %688 : vector<1x1x16xf32> to vector<1x16xf32>
    %c0_169 = arith.constant 0 : index
    %c128 = arith.constant 128 : index
    %690 = vector.load %arg6[%c0_169, %c128] : memref<1x256xf32, #tpu.memory_space<vmem>>, vector<1x16xf32>
    tpu.vector_store %arg6[%c0_169, %c128], %689 {strides = array<i32>} : memref<1x256xf32, #tpu.memory_space<vmem>>, vector<1x16xf32>,
    %691 = vector.extract_strided_slice %663 {offsets = [0, 9, 0], sizes = [1, 1, 16], strides = [1, 1, 1]} : vector<1x16x16xf32> to vector<1x1x16xf32>
    %692 = vector.shape_cast %691 : vector<1x1x16xf32> to vector<1x16xf32>
    %c0_170 = arith.constant 0 : index
    %c144 = arith.constant 144 : index
    %693 = vector.load %arg6[%c0_170, %c144] : memref<1x256xf32, #tpu.memory_space<vmem>>, vector<1x16xf32>
    tpu.vector_store %arg6[%c0_170, %c144], %692 {strides = array<i32>} : memref<1x256xf32, #tpu.memory_space<vmem>>, vector<1x16xf32>,
    %694 = vector.extract_strided_slice %663 {offsets = [0, 10, 0], sizes = [1, 1, 16], strides = [1, 1, 1]} : vector<1x16x16xf32> to vector<1x1x16xf32>
    %695 = vector.shape_cast %694 : vector<1x1x16xf32> to vector<1x16xf32>
    %c0_171 = arith.constant 0 : index
    %c160 = arith.constant 160 : index
    %696 = vector.load %arg6[%c0_171, %c160] : memref<1x256xf32, #tpu.memory_space<vmem>>, vector<1x16xf32>
    tpu.vector_store %arg6[%c0_171, %c160], %695 {strides = array<i32>} : memref<1x256xf32, #tpu.memory_space<vmem>>, vector<1x16xf32>,
    %697 = vector.extract_strided_slice %663 {offsets = [0, 11, 0], sizes = [1, 1, 16], strides = [1, 1, 1]} : vector<1x16x16xf32> to vector<1x1x16xf32>
    %698 = vector.shape_cast %697 : vector<1x1x16xf32> to vector<1x16xf32>
    %c0_172 = arith.constant 0 : index
    %c176 = arith.constant 176 : index
    %699 = vector.load %arg6[%c0_172, %c176] : memref<1x256xf32, #tpu.memory_space<vmem>>, vector<1x16xf32>
    tpu.vector_store %arg6[%c0_172, %c176], %698 {strides = array<i32>} : memref<1x256xf32, #tpu.memory_space<vmem>>, vector<1x16xf32>,
    %700 = vector.extract_strided_slice %663 {offsets = [0, 12, 0], sizes = [1, 1, 16], strides = [1, 1, 1]} : vector<1x16x16xf32> to vector<1x1x16xf32>
    %701 = vector.shape_cast %700 : vector<1x1x16xf32> to vector<1x16xf32>
    %c0_173 = arith.constant 0 : index
    %c192 = arith.constant 192 : index
    %702 = vector.load %arg6[%c0_173, %c192] : memref<1x256xf32, #tpu.memory_space<vmem>>, vector<1x16xf32>
    tpu.vector_store %arg6[%c0_173, %c192], %701 {strides = array<i32>} : memref<1x256xf32, #tpu.memory_space<vmem>>, vector<1x16xf32>,
    %703 = vector.extract_strided_slice %663 {offsets = [0, 13, 0], sizes = [1, 1, 16], strides = [1, 1, 1]} : vector<1x16x16xf32> to vector<1x1x16xf32>
    %704 = vector.shape_cast %703 : vector<1x1x16xf32> to vector<1x16xf32>
    %c0_174 = arith.constant 0 : index
    %c208 = arith.constant 208 : index
    %705 = vector.load %arg6[%c0_174, %c208] : memref<1x256xf32, #tpu.memory_space<vmem>>, vector<1x16xf32>
    tpu.vector_store %arg6[%c0_174, %c208], %704 {strides = array<i32>} : memref<1x256xf32, #tpu.memory_space<vmem>>, vector<1x16xf32>,
    %706 = vector.extract_strided_slice %663 {offsets = [0, 14, 0], sizes = [1, 1, 16], strides = [1, 1, 1]} : vector<1x16x16xf32> to vector<1x1x16xf32>
    %707 = vector.shape_cast %706 : vector<1x1x16xf32> to vector<1x16xf32>
    %c0_175 = arith.constant 0 : index
    %c224 = arith.constant 224 : index
    %708 = vector.load %arg6[%c0_175, %c224] : memref<1x256xf32, #tpu.memory_space<vmem>>, vector<1x16xf32>
    tpu.vector_store %arg6[%c0_175, %c224], %707 {strides = array<i32>} : memref<1x256xf32, #tpu.memory_space<vmem>>, vector<1x16xf32>,
    %709 = vector.extract_strided_slice %663 {offsets = [0, 15, 0], sizes = [1, 1, 16], strides = [1, 1, 1]} : vector<1x16x16xf32> to vector<1x1x16xf32>
    %710 = vector.shape_cast %709 : vector<1x1x16xf32> to vector<1x16xf32>
    %c0_176 = arith.constant 0 : index
    %c240 = arith.constant 240 : index
    %711 = vector.load %arg6[%c0_176, %c240] : memref<1x256xf32, #tpu.memory_space<vmem>>, vector<1x16xf32>
    tpu.vector_store %arg6[%c0_176, %c240], %710 {strides = array<i32>} : memref<1x256xf32, #tpu.memory_space<vmem>>, vector<1x16xf32>,
    %c0_177 = arith.constant 0 : index
    %c0_178 = arith.constant 0 : index
    %712 = vector.load %arg6[%c0_177, %c0_178] : memref<1x256xf32, #tpu.memory_space<vmem>>, vector<1x256xf32>
    %713 = vector.shape_cast %712 : vector<1x256xf32> to vector<1x1x256xf32>
    %714 = vector.broadcast %713 : vector<1x1x256xf32> to vector<1x4x256xf32>
    %715 = arith.mulf %0, %714 : vector<1x4x256xf32>
    %c0_179 = arith.constant 0 : index
    %c0_180 = arith.constant 0 : index
    %c0_181 = arith.constant 0 : index
    %716 = vector.load %arg4[%c0_179, %c0_180, %c0_181] : memref<1x4x256xf32, #tpu.memory_space<vmem>>, vector<1x4x256xf32>
    tpu.vector_store %arg4[%c0_179, %c0_180, %c0_181], %715 {strides = array<i32>} : memref<1x4x256xf32, #tpu.memory_space<vmem>>, vector<1x4x256xf32>,
    return
  }
  func.func @transform_0(%arg0: i32) -> i32 {
    %c0_i32 = arith.constant 0 : i32
    %c0_i32_0 = arith.constant 0 : i32
    return %c0_i32 : i32
  }
  func.func @transform_1(%arg0: i32) -> i32 {
    %c0_i32 = arith.constant 0 : i32
    %c0_i32_0 = arith.constant 0 : i32
    return %c0_i32 : i32
  }
  func.func @transform_2(%arg0: i32) -> (i32, i32, i32) {
    %c0_i32 = arith.constant 0 : i32
    %c0_i32_0 = arith.constant 0 : i32
    %c0_i32_1 = arith.constant 0 : i32
    return %arg0, %c0_i32, %c0_i32_0 : i32, i32, i32
  }
  func.func @transform_3(%arg0: i32) -> (i32, i32, i32) {
    %c0_i32 = arith.constant 0 : i32
    %c0_i32_0 = arith.constant 0 : i32
    %c0_i32_1 = arith.constant 0 : i32
    return %arg0, %c0_i32, %c0_i32_0 : i32, i32, i32
  }
}

</mosaic_0001>

<bundles_post_ra>
// kernel: tpu_custom_call.1
= control target key start
LH: loop header
LB: loop body
LE: loop exit
PB: predicated region body
PF: predicated region fallthrough
CT: control target
= control target key end

     0   :  { %s6216_s0 = inlined_call_operand.hbm [shape: f32[98], index: 0, kind: input, shape index: {}]   ;;  %s6217_s1 = inlined_call_operand.vmem [shape: f32[3], index: 1, kind: input, shape index: {}]   ;;  %s6218_s2 = inlined_call_operand.hbm [shape: f32[2,4,256], index: 2, kind: input, shape index: {}]   ;;  %s6219_s3 = inlined_call_operand.hbm [shape: f32[2,4,256], index: 3, kind: output, shape index: {}]  }
   0x1   :  { %6347 = sst [smem:[#allocation159_spill]] %s6216_s0 }
   0x2   :  { %6348 = sst [smem:[#allocation160_spill]] %s6217_s1 }
   0x3   :  { %6349 = sst [smem:[#allocation161_spill]] %s6218_s2 }
   0x4   :  { %6350 = sst [smem:[#allocation162_spill]] %s6219_s3 }
   0x5   :  { %8 = vsyncpa [#allocation7], 0 }
   0x6   :  { %9 = vsyncpa [#allocation8], 0 }
   0x7   :  { %10 = vsyncpa [#allocation5], 0 }
   0x8   :  { %12 = vsyncpa [#allocation5 + $0x1], 0 }
   0x9   :  { %13 = vsyncpa [#allocation6], 0 }
   0xa   :  { %15 = vsyncpa [#allocation6 + $0x1], 0  ;;  %s3294_s12 = smov 0   ;;  %s3296_s13 = smov 0  }
   0xb   :  { %s3298_s14 = smov 0   ;;  %s3300_s15 = smov 0  }
   0xc LB: > { %6351 = sst [smem:[#allocation16_spill]] %s3233_s12  ;;  %s3315_s16 = sadd.s32 4294967295, %s3245_s15   ;;  %s3245_s15 = sphi %s3300_s15, %s6956_s15   ;;  %s3241_s14 = sphi %s3298_s14, %s6959_s14   ;;  %s3237_s13 = sphi %s3296_s13, %s6958_s13   ;;  %s3233_s12 = sphi %s3294_s12, %s6957_s12  }
   0xd   : > { %6352 = sst [smem:[#allocation17_spill]] %s3237_s13  ;;  %s2892_s17 = sadd.s32 4294967294, %s3245_s15  }
   0xe   : > { %6353 = sst [smem:[#allocation18_spill]] %s3241_s14  ;;  %p83_p0 = scmp.ne.s32.totalorder %s3237_s13, %s3233_s12 }
   0xf   : > { %6354 = sst [smem:[#allocation19_spill]] %s3245_s15  ;;  %p6220_p1 = scmp.eq.s32.totalorder %s3315_s16, 0 }
  0x10   : > { %6355 = sst [smem:[#allocation20_spill]] %s3315_s16  ;;  %p107_p2 = scmp.eq.s32.totalorder %s3315_s16, 1 }
  0x11   : > { %p113_p3 = scmp.eq.s32.totalorder %s2892_s17, 1  ;;  %p3324_p4 = por %p6220_p1, %p83_p0 }
  0x12   : > { %p2893_p5 = scmp.ge.s32.totalorder %s3245_s15, 1  ;;  %p120_p7 = scmp.lt.s32.totalorder %s3245_s15, 3 }
  0x13   : > { %s6356_s18 = scalar_select %p3324_p4, 1, 0 }
  0x14   : > { %p3329_p6 = por %p113_p3, %p83_p0  ;;  %p3334_p8 = pnand %p2893_p5, %p120_p7 }
  0x15   : > { %s6360_s1 = sld [smem:[#allocation160_spill]]  ;;  %s3345_s24 = sadd.s32 1, %s3245_s15  }
  0x16   : > { %s6357_s19 = scalar_select %p3329_p6, 1, 0 }
  0x17   : > { %s6359_s20 = scalar_select %p3334_p8, 1, 0 }
  0x18   : > { %6358 = sst [smem:[#allocation21_spill]] %s6357_s19  ;;  %p3025_p10 = pneg %p3334_p8 }
  0x19   : > { %6361 = sst [smem:[#allocation22_spill]] %s3345_s24  ;;  %s67_s26 = ssub.s32 %s3245_s15, %s3345_s24 }
  0x1a   : > { %p3349_p11 = pnand %p3025_p10, %p6220_p1  ;;  %s70_s27 = sadd.s32 1, %s3241_s14 }
  0x1b   : > { %s142_s23 = sshll.u32 %s6360_s1, 4  ;;  %p3356_p12 = scmp.eq.s32.totalorder %s67_s26, 0  ;;  %s143_s23 = int_to_ptr.vmem [resolvable:$true] %s142_s23 }
  0x1c   : > { %s3247_s29 = smov [#allocation4]   ;;  %s6364_s0 = sld [smem:[#allocation159_spill]] }
  0x1d   : > { %s3130_s5 = scalar_lea.vmem %s143_s23, 16  ;;  %p3132_p0 = pneg %p3349_p11 }
  0x1e   : > { %p3131_p13 = scmp.ne.s32.totalorder %s143_s23, %s3130_s5  ;;  %p3138_p7 = scmp.lt.s32.totalorder %s143_s23, %s143_s23 }
  0x1f   : > { %p3139_p10 = scmp.lt.s32.totalorder %s3130_s5, %s3130_s5 }
  0x20   : > { %p3133_p3 = pnand %p3132_p0, %p3131_p13 }
  0x21   : > { %p3140_p9 = por %p3139_p10, %p3138_p7 }
  0x22   : > { %3028 = dma.hbm_to_smem (!%p3349_p11), %s6364_s0, 16, %s3247_s29, [#allocation7]  }
  0x23   : > { %p3134_p5 = pneg %p3133_p3 }
  0x25   : > { %p3141_p1 = pnand %p3140_p9, %p3134_p5 }
  0x27   : > { %3144 = shalt.err (!%p3141_p1)
}
  0x28   : > { %s3248_s6 = smov [#allocation9]   ;;  %p77_p13 = scmp.ne.s32.totalorder %s3241_s14, %s3237_s13 }
  0x29   : > { %3031 = dma.vmem_to_smem (!%p3349_p11), %s143_s23, 16, %s3248_s6, [#allocation8]  }
  0x2a   : > { %s3372_s7 = scalar_select %p3356_p12, %s3241_s14, %s70_s27  }
  0x2b   : > { %p78_p0 = scmp.eq.s32.totalorder %s3245_s15, 0  ;;  %p3042_p9 = scmp.lt.s32.totalorder %s3245_s15, 2 }
  0x2c   : > { %6365 = sst [smem:[#allocation23_spill]] %s3372_s7  ;;  %s153_s8 = sand.u32 1, %s3241_s14  }
  0x2d   : > { %p79_p1 = por %p78_p0, %p77_p13  ;;  %p3381_p3 = por %p107_p2, %p77_p13 }
  0x2e   : > { %s2897_s10 = sshll.u32 %s153_s8, 3  ;;  %s3011_s11 = sshll.u32 %s3245_s15, 7 }
  0x2f   : > { %s6366_s9 = scalar_select %p3381_p3, 1, 0 }
  0x30   : > { %s6368_s2 = sld [smem:[#allocation161_spill]]  ;;  %s157_s23 = scalar_lea.vmem [#allocation10], %s2897_s10 }
  0x31   : > { %6367 = sst [smem:[#allocation24_spill]] %s6366_s9  ;;  %s165_s25 = sshll.u32 %s157_s23, 4  ;;  %s166_s25 = int_to_ptr.vmem [resolvable:$true] %s165_s25 }
  0x32   : > { %p3391_p11 = pnand %p3042_p9, %p79_p1  ;;  %s154_s27 = scalar_lea.sflag [#allocation5], %s153_s8 }
  0x34   : > { %p3147_p12 = pneg %p3391_p11 }
  0x36   : > { %s3389_s22 = scalar_lea.hbm %s6368_s2, %s3011_s11  ;;  %s3150_s4 = scalar_lea.hbm %s6368_s2, 256 }
  0x37   : > { %s3145_s28 = scalar_lea.hbm %s3389_s22, 128  ;;  %p3151_p10 = scmp.lt.s32.totalorder %s3389_s22, %s6368_s2 }
  0x38   : > { %p3146_p2 = scmp.ne.s32.totalorder %s3389_s22, %s3145_s28  ;;  %p3152_p13 = scmp.lt.s32.totalorder %s3150_s4, %s3145_s28 }
  0x3a   : > { %p3148_p5 = pnand %p3147_p12, %p3146_p2  ;;  %p3153_p0 = por %p3152_p13, %p3151_p10 }
  0x3c   : > { %p3149_p7 = pneg %p3148_p5 }
  0x3e   : > { %p3154_p9 = pnand %p3153_p0, %p3149_p7 }
  0x40   : > { %3157 = shalt.err (!%p3154_p9)
}
  0x41   : > { %s3158_s10 = scalar_lea.vmem %s166_s25, 128  ;;  %s3249_s8 = smov [#allocation10]  }
  0x42   : > { %p3159_p1 = scmp.ne.s32.totalorder %s166_s25, %s3158_s10  ;;  %s3163_s11 = sshll.u32 %s3249_s8, 4  ;;  %s3164_s11 = int_to_ptr.vmem [resolvable:$false] %s3163_s11 }
  0x43   : > { %s3165_s17 = scalar_lea.vmem %s3164_s11, 256  ;;  %p3166_p2 = scmp.lt.s32.totalorder %s166_s25, %s3164_s11 }
  0x44   : > { %p3161_p6 = pnand %p3159_p1, %p3147_p12  ;;  %p3167_p5 = scmp.lt.s32.totalorder %s3165_s17, %s3158_s10 }
  0x46   : > { %p3162_p3 = pneg %p3161_p6  ;;  %p3168_p4 = por %p3167_p5, %p3166_p2 }
  0x48   : > { %p3169_p8 = pnand %p3168_p4, %p3162_p3 }
  0x4a   : > { %3172 = shalt.err (!%p3169_p8)
}
  0x4b   : > { %3035 = dma.hbm_to_vmem [thread:$0]  (!%p3391_p11), %s3389_s22, 128, %s166_s25, %s154_s27  }
  0x4c   : > { %p6370_p7 = scmp.ne.s32.totalorder %s6359_s20, 0 }
  0x4e   : > { %174 = sbr.rel (%p6370_p7) target bundleno = 1090 (0x442), region = 32 }
  0x53   : > { %p6371_p10 = scmp.eq.s32.totalorder %s3315_s16, 0 }
  0x55   : > { %3216 = dma.done.wait (%p6371_p10), [#allocation7], 16   ;;  %p6372_p6 = pmov %p6371_p10 }
  0x57   : > { %3218 = vsyncadd (%p6372_p6), [#allocation7], 4294967280  ;;  %p6373_p12 = pmov %p6372_p6 }
  0x58   : > { %p6374_p13 = pmov %p6372_p6 }
  0x59   : > { %3220 = dma.done.wait (%p6373_p12), [#allocation8], 16  }
  0x5a   : > { %3222 = vsyncadd (%p6374_p13), [#allocation8], 4294967280  ;;  %s3420_s21 = sand.u32 1, %s3237_s13   ;;  %p6377_p4 = scmp.ne.s32.totalorder %s6356_s18, 0 }
  0x5b   : > { %6375 = sst [smem:[#allocation25_spill]] %s3420_s21  ;;  %s6224_s20 = sshll.u32 %s3420_s21, 3 }
  0x5c   : > { %s185_s22 = scalar_lea.sflag [#allocation5], %s3420_s21  ;;  %s3426_s23 = scalar_lea.vmem [#allocation10], %s6224_s20 }
  0x5d   : > { %6376 = sst [smem:[#allocation26_spill]] %s3426_s23 }
  0x5e   : > { %3224 = dma.done.wait (%p6377_p4), %s185_s22, 128  }
  0x5f   : > { %3226 = vsyncadd (%p6377_p4), %s185_s22, 4294967168 }
  0x60   : > { %193 = sfence }
  0x61   : > { %v212_v0 = vld [vmem:[%s3426_s23] sm:$0xff]  ;;  %vm216_vm0 = vcmask 1043456   ;;  %vm248_vm1 = vcmask 179200   ;;  %v3250_v3 = vmov 0.0   ;;  %s3251_s18 = smov 115   ;;  %s3252_s25 = smov 3  }
  0x62   : > { %v217_v1 = vsel %vm216_vm0, %v212_v0, -inf  ;;  %v231_v2 = vsel %vm216_vm0, %v212_v0, 0.0  ;;  %249 = vst.msk [vmem:[#allocation2] sm:$0xff] %vm248_vm1, %v3250_v3  ;;  %250 = vst.msk [vmem:[#allocation2 + $0x8] sm:$0xff] %vm248_vm1, %v3250_v3  ;;  %v214_v14 = vcombine.high %v212_v0, %v212_v0  ;;  %s3253_s26 = smov 99   ;;  %s3254_s27 = smov 83  }
  0x63   : > { %253 = vst.msk [vmem:[#allocation2 + $0x18] sm:$0xff] %vm248_vm1, %v3250_v3  ;;  %254 = vst.msk [vmem:[#allocation2 + $0x20] sm:$0xff] %vm248_vm1, %v3250_v3  ;;  %v218_v4 = vrot.slane %v217_v1, 4  ;;  %v232_v5 = vrot.slane %v231_v2, 4  ;;  %s3255_s28 = smov 67   ;;  %s3256_s29 = smov 51  }
  0x64   : > { %v238_v18 = vsel %vm216_vm0, %v214_v14, 0.0  ;;  %v224_v20 = vsel %vm216_vm0, %v214_v14, -inf  ;;  %s3257_s30 = smov 35   ;;  %s3258_s4 = smov 19   ;;  %vm251_vm2 = vcmask 177152   ;;  %vm260_vm3 = vcmask 147480  }
  0x65   : > { %v219_v6 = vmax.f32 %v217_v1, %v218_v4  ;;  %v233_v7 = vadd.f32 %v232_v5, %v231_v2  ;;  %v239_v19 = vrot.slane %v238_v18, 4  ;;  %v225_v22 = vrot.slane %v224_v20, 4  ;;  %252 = vst.msk [vmem:[#allocation2 + $0x10] sm:$0x3f] %vm251_vm2, %v3250_v3  ;;  %255 = vst.msk [vmem:[#allocation2 + $0x28] sm:$0x3f] %vm251_vm2, %v3250_v3 }
  0x66   : > { %s3463_s5 = sld [smem:[#allocation4 + $0x2]]  ;;  %s6241_s23 = smov 126   ;;  %vm649_vm4 = vcmask 1041408   ;;  %vm698_vm5 = vcmask 1045504   ;;  %vm814_vm6 = vcmask 1040384   ;;  %vm508_vm7 = vcmask 1046528  }
  0x67   : > { %v220_v8 = vrot.slane %v219_v6, 2  ;;  %v234_v9 = vrot.slane %v233_v7, 2  ;;  %v240_v21 = vadd.f32 %v239_v19, %v238_v18  ;;  %v226_v24 = vmax.f32 %v224_v20, %v225_v22  ;;  %s3465_s6 = sld [smem:[#allocation4 + $0x1]]  ;;  %s6243_s21 = smov 127  }
  0x68   : > { %s3467_s10 = sld [smem:[#allocation4 + $0xa]]  ;;  %vm484_vm8 = vcmask 1042432   ;;  %vm888_vm9 = vcmask 1044480  }
  0x69   : > { %v221_v10 = vmax.f32 %v219_v6, %v220_v8  ;;  %v235_v11 = vadd.f32 %v234_v9, %v233_v7  ;;  %v241_v23 = vrot.slane %v240_v21, 2  ;;  %v227_v26 = vrot.slane %v226_v24, 2  ;;  %s3469_s8 = sld [smem:[#allocation4 + $0x9]] }
  0x6a   : > { %s3471_s11 = sld [smem:[#allocation4 + $0x3]] }
  0x6b   : > { %v222_v12 = vrot.slane %v221_v10, 1  ;;  %v236_v13 = vrot.slane %v235_v11, 1  ;;  %v242_v25 = vadd.f32 %v241_v23, %v240_v21  ;;  %v228_v28 = vmax.f32 %v226_v24, %v227_v26  ;;  %s3473_s17 = sld [smem:[#allocation4 + $0x16]] }
  0x6c   : > { %6378 = sst [smem:[#allocation27_spill]] %s3463_s5  ;;  %v6255_v43 = vstv %s3463_s5 }
  0x6d   : > { %v223_v15 = vmax.f32 %v221_v10, %v222_v12  ;;  %v237_v16 = vadd.f32 %v236_v13, %v235_v11  ;;  %v243_v27 = vrot.slane %v242_v25, 1  ;;  %v229_v30 = vrot.slane %v228_v28, 1  ;;  %6379 = sst [smem:[#allocation28_spill]] %s3465_s6 }
  0x6e   : > { %s3477_s22 = sld [smem:[#allocation4 + $0xf]]  ;;  %v6256_v44 = vstv %s3465_s6  ;;  %v3528_v48 = vstv %s3467_s10 }
  0x6f   : > { %268 = vrot.lane.b32.xlu1 %v223_v15, %s3251_s18  ;;  %257 = vrot.lane.b32.xlu0 %v223_v15, %s3252_s25  ;;  %v246_v17 = vmul.f32 0.25, %v237_v16  ;;  %v244_v29 = vadd.f32 %v243_v27, %v242_v25  ;;  %v230_v32 = vmax.f32 %v228_v28, %v229_v30  ;;  %s3499_s20 = sld [smem:[#allocation4 + $0x2c]]  ;;  %v3531_v49 = vstv %s3469_s8 }
  0x70   : > { %6380 = sst [smem:[#allocation29_spill]] %s3471_s11  ;;  %v6254_v58 = vstv %s3471_s11  ;;  %s6386_s11 = smov 126  }
  0x71   : > { %v247_v31 = vmul.f32 0.25, %v244_v29  ;;  %s3501_s0 = sld [smem:[#allocation4 + $0x11]]  ;;  %v3616_v3 = vstv %s3473_s17 }
  0x72   : > { %s3503_s1 = sld [smem:[#allocation4 + $0x18]] }
  0x73   : > { %272 = vrot.lane.b32.xlu1 %v246_v17, %s3251_s18  ;;  %276 = vrot.lane.b32.xlu0 %v223_v15, %s3253_s26  ;;  %s3507_s2 = sld [smem:[#allocation4 + $0x1f]] }
  0x74   : > { %s3509_s7 = sld [smem:[#allocation4 + $0x26]]  ;;  %v3619_v4 = vstv %s3477_s22 }
  0x75   : > { %s3511_s14 = sld [smem:[#allocation4 + $0x2d]] }
  0x76   : > { %s3513_s13 = sld [smem:[#allocation4 + $0x7]] }
  0x77   : > { %280 = vrot.lane.b32.xlu1 %v246_v17, %s3253_s26  ;;  %284 = vrot.lane.b32.xlu0 %v223_v15, %s3254_s27  ;;  %s3517_s24 = sld [smem:[#allocation4 + $0x23]]  ;;  %v3657_v16 = vstv %s3501_s0 }
  0x78   : > { %s3521_s15 = sld [smem:[#allocation4 + $0xe]] }
  0x79   : > { %s3523_s19 = sld [smem:[#allocation4 + $0x2a]]  ;;  %v3663_v18 = vstv %s3507_s2 }
  0x7a   : > { %s3533_s12 = sld [smem:[#allocation4 + $0x20]]  ;;  %6391 = vst [vmem:[#allocation38_spill] sm:$0xff] %v3663_v18  ;;  %v3666_v19 = vstv %s3509_s7 }
  0x7b   : > { %288 = vrot.lane.b32.xlu1 %v246_v17, %s3254_s27  ;;  %292 = vrot.lane.b32.xlu0 %v223_v15, %s3255_s28  ;;  %s3547_s3 = sld [smem:[#allocation4 + $0x27]]  ;;  %6392 = vst [vmem:[#allocation39_spill] sm:$0xff] %v3666_v19  ;;  %v3671_v20 = vstv %s3511_s14 }
  0x7c   : > { %s3549_s10 = sld [smem:[#allocation4]]  ;;  %6394 = vst [vmem:[#allocation40_spill] sm:$0xff] %v3671_v20  ;;  %v3674_v21 = vstv %s3513_s13  ;;  %s6443_s13 = smov 127  }
  0x7d   : > { %s3561_s8 = sld [smem:[#allocation4 + $0x1c]]  ;;  %6395 = vst [vmem:[#allocation41_spill] sm:$0xff] %v3674_v21  ;;  %v3677_v22 = vstv %s3517_s24  ;;  %s3262_s24 = smov 124  }
  0x7e   : > { %s3564_s9 = sld [smem:[#allocation4 + $0x2e]]  ;;  %v3680_v23 = vstv %s3521_s15  ;;  %s6476_s15 = smov 126  }
  0x7f   : > { %296 = vrot.lane.b32.xlu1 %v246_v17, %s3255_s28  ;;  %263 = vrot.lane.b32.xlu0 %v246_v17, %s3252_s25  ;;  %s3574_s16 = sld [smem:[#allocation4 + $0x5]]  ;;  %6397 = vst [vmem:[#allocation42_spill] sm:$0xff] %v3680_v23  ;;  %v3683_v26 = vstv %s3523_s19 }
  0x80   : > { %s3576_s5 = sld [smem:[#allocation4 + $0xc]]  ;;  %v3686_v27 = vstv %s3533_s12 }
  0x81   : > { %s3585_s6 = sld [smem:[#allocation4 + $0x13]]  ;;  %6401 = vst [vmem:[#allocation43_spill] sm:$0xff] %v3686_v27  ;;  %v3689_v28 = vstv %s3547_s3 }
  0x82   : > { %s3638_s17 = sld [smem:[#allocation4 + $0x22]]  ;;  %6403 = vst [vmem:[#allocation44_spill] sm:$0xff] %v3689_v28 }
  0x83   : > { %304 = vrot.lane.b32.xlu1 %v246_v17, %s3256_s29  ;;  %300 = vrot.lane.b32.xlu0 %v223_v15, %s3256_s29  ;;  %s3654_s22 = sld [smem:[#allocation4 + $0x29]]  ;;  %v3695_v30 = vstv %s3561_s8 }
  0x84   : > { %s6425_s3 = sld [smem:[#allocation28_spill]] }
  0x85   : > { %s6442_s12 = sld [smem:[#allocation27_spill]] }
  0x86   : > { %6382 = sst [smem:[#allocation31_spill]] %s3576_s5 }
  0x87   : > { %312 = vrot.lane.b32.xlu1 %v246_v17, %s3257_s30  ;;  %308 = vrot.lane.b32.xlu0 %v223_v15, %s3257_s30  ;;  %6384 = sst [smem:[#allocation33_spill]] %s3585_s6 }
  0x88   : > { %s3597_s6 = sld [smem:[#allocation4 + $0x21]] }
  0x89   : > { %s3599_s5 = sld [smem:[#allocation4 + $0x28]] }
  0x8a   : > { %s6396_s0 = sld [smem:[#allocation33_spill]] }
  0x8b   : > { %320 = vrot.lane.b32.xlu1 %v246_v17, %s3258_s4  ;;  %316 = vrot.lane.b32.xlu0 %v223_v15, %s3258_s4  ;;  %v3652_v15 = vstv %s3499_s20  ;;  %v3660_v17 = vstv %s3503_s1  ;;  %s6446_s14 = sld [smem:[#allocation29_spill]] }
  0x8c   : > { %s2933_s19 = sld [smem:[#allocation4 + $0xb]] }
  0x8d   : > { %s2968_s8 = sld [smem:[#allocation4 + $0x3a]] }
  0x8f   : > { %330 = vrot.lane.b32.xlu1 %v247_v31, %s3252_s25  ;;  %325 = vrot.lane.b32.xlu0 %v230_v32, %s3252_s25  ;;  %s3481_s25 = sld [smem:[#allocation4 + $0x1d]] }
  0x90   : > { %6387 = sst [smem:[#allocation35_spill]] %s3599_s5 }
  0x91   : > { %s3611_s5 = sld [smem:[#allocation4 + $0xd]] }
  0x92   : > { %s6399_s2 = sld [smem:[#allocation35_spill]] }
  0x93   : > { %338 = vrot.lane.b32.xlu1 %v247_v31, %s3251_s18  ;;  %334 = vrot.lane.b32.xlu0 %v230_v32, %s3251_s18  ;;  %s3479_s18 = sld [smem:[#allocation4 + $0x2b]] }
  0x95   : > { %v3627_v8 = vstv %s3481_s25  ;;  %s6393_s25 = sld [smem:[#allocation31_spill]] }
  0x97   : > { %346 = vrot.lane.b32.xlu1 %v247_v31, %s3253_s26  ;;  %342 = vrot.lane.b32.xlu0 %v230_v32, %s3253_s26  ;;  %s3483_s26 = sld [smem:[#allocation4 + $0x1e]] }
  0x99   : > { %v3622_v5 = vstv %s3479_s18  ;;  %s3668_s18 = sld [smem:[#allocation4 + $0x30]] }
  0x9b   : > { %354 = vrot.lane.b32.xlu1 %v247_v31, %s3254_s27  ;;  %350 = vrot.lane.b32.xlu0 %v230_v32, %s3254_s27  ;;  %s3487_s27 = sld [smem:[#allocation4 + $0x17]] }
  0x9d   : > { %v3630_v9 = vstv %s3483_s26  ;;  %s2961_s26 = sld [smem:[#allocation4 + $0x39]] }
  0x9f   : > { %362 = vrot.lane.b32.xlu1 %v247_v31, %s3255_s28  ;;  %358 = vrot.lane.b32.xlu0 %v230_v32, %s3255_s28  ;;  %s3489_s28 = sld [smem:[#allocation4 + $0x25]] }
  0xa1   : > { %v3633_v10 = vstv %s3487_s27  ;;  %s2962_s27 = sld [smem:[#allocation4 + $0x40]] }
  0xa3   : > { %366 = vrot.lane.b32.xlu0 %v230_v32, %s3256_s29  ;;  %370 = vrot.lane.b32.xlu1 %v247_v31, %s3256_s29  ;;  %s3491_s29 = sld [smem:[#allocation4 + $0x8]] }
  0xa5   : > { %v3636_v11 = vstv %s3489_s28  ;;  %s2964_s28 = sld [smem:[#allocation4 + $0x4e]] }
  0xa7   : > { %374 = vrot.lane.b32.xlu0 %v230_v32, %s3257_s30  ;;  %378 = vrot.lane.b32.xlu1 %v247_v31, %s3257_s30  ;;  %s3493_s30 = sld [smem:[#allocation4 + $0x24]] }
  0xa9   : > { %v3643_v12 = vstv %s3491_s29  ;;  %s2963_s29 = sld [smem:[#allocation4 + $0x47]] }
  0xab   : > { %382 = vrot.lane.b32.xlu0 %v230_v32, %s3258_s4  ;;  %386 = vrot.lane.b32.xlu1 %v247_v31, %s3258_s4  ;;  %s3497_s4 = sld [smem:[#allocation4 + $0x10]]  ;;  %v3698_v31 = vstv %s3564_s9 }
  0xac   : > { %6404 = vst [vmem:[#allocation45_spill] sm:$0xff] %v3698_v31  ;;  %s2934_s9 = sld [smem:[#allocation4 + $0x12]] }
  0xad   : > { %v3646_v13 = vstv %s3493_s30  ;;  %s2965_s30 = sld [smem:[#allocation4 + $0x55]] }
  0xb1   : > { %v3649_v14 = vstv %s3497_s4  ;;  %s2966_s4 = sld [smem:[#allocation4 + $0x5c]] }
  0xe1   : > { %v269_v33 = vpop.permute.xlu1 %268  ;;  %v258_v34 = vpop.permute.xlu0 %257 }
  0xe2   : > { %271 = vst.msk [vmem:[#allocation2 + $0x4] sm:$0x1] %vm260_vm3, %v269_v33  ;;  %261 = vst.msk [vmem:[#allocation2 + $0x3] sm:$0x1] %vm260_vm3, %v258_v34  ;;  %v3702_v33 = vstv %s6393_s25  ;;  %s2970_s25 = sld [smem:[#allocation4 + $0x48]] }
  0xe3   : > { %6405 = vst [vmem:[#allocation46_spill] sm:$0xff] %v3702_v33 }
  0xe5   : > { %v273_v35 = vpop.permute.xlu1 %272  ;;  %v277_v36 = vpop.permute.xlu0 %276 }
  0xe6   : > { %275 = vst.msk [vmem:[#allocation2 + $0x1c] sm:$0x1] %vm260_vm3, %v273_v35  ;;  %279 = vst.msk [vmem:[#allocation2 + $0x5] sm:$0x1] %vm260_vm3, %v277_v36  ;;  %v3713_v36 = vstv %s6396_s0  ;;  %s2973_s0 = sld [smem:[#allocation4 + $0x5d]] }
  0xe7   : > { %6406 = vst [vmem:[#allocation47_spill] sm:$0xff] %v3713_v36 }
  0xe9   : > { %v281_v37 = vpop.permute.xlu1 %280  ;;  %v285_v38 = vpop.permute.xlu0 %284 }
  0xea   : > { %283 = vst.msk [vmem:[#allocation2 + $0x1d] sm:$0x1] %vm260_vm3, %v281_v37  ;;  %287 = vst.msk [vmem:[#allocation2 + $0x6] sm:$0x1] %vm260_vm3, %v285_v38  ;;  %v3719_v38 = vstv %s3597_s6  ;;  %s2960_s6 = sld [smem:[#allocation4 + $0x32]] }
  0xeb   : > { %6408 = vst [vmem:[#allocation49_spill] sm:$0xff] %v3719_v38 }
  0xed   : > { %v289_v39 = vpop.permute.xlu1 %288  ;;  %v293_v40 = vpop.permute.xlu0 %292 }
  0xee   : > { %291 = vst.msk [vmem:[#allocation2 + $0x1e] sm:$0x1] %vm260_vm3, %v289_v39  ;;  %295 = vst.msk [vmem:[#allocation2 + $0x7] sm:$0x1] %vm260_vm3, %v293_v40  ;;  %v3722_v39 = vstv %s6399_s2  ;;  %s2974_s2 = sld [smem:[#allocation4 + $0x34]] }
  0xef   : > { %6409 = vst [vmem:[#allocation50_spill] sm:$0xff] %v3722_v39 }
  0xf1   : > { %v297_v41 = vpop.permute.xlu1 %296  ;;  %v264_v42 = vpop.permute.xlu0 %263 }
  0xf2   : > { %299 = vst.msk [vmem:[#allocation2 + $0x1f] sm:$0x1] %vm260_vm3, %v297_v41  ;;  %267 = vst.msk [vmem:[#allocation2 + $0x1b] sm:$0x1] %vm260_vm3, %v264_v42 }
  0xf5   : > { %v3525_v45 = vld [vmem:[#allocation2] sm:$0xff]  ;;  %v305_v46 = vpop.permute.xlu1 %304  ;;  %v301_v47 = vpop.permute.xlu0 %300 }
  0xf6   : > { %6381 = vst [vmem:[#allocation30_spill] sm:$0xff] %v3525_v45  ;;  %307 = vst.msk [vmem:[#allocation2 + $0x20] sm:$0x1] %vm260_vm3, %v305_v46  ;;  %v3540_v50 = vmul.f32 %v6255_v43, %v3525_v45  ;;  %v3545_v51 = vmul.f32 %v6256_v44, %v3525_v45  ;;  %v3555_v54 = vmul.f32 %v3528_v48, %v3525_v45  ;;  %v6420_v44 = vstv %s3549_s10 }
  0xf7   : > { %303 = vst.msk [vmem:[#allocation2 + $0x8] sm:$0x1] %vm260_vm3, %v301_v47  ;;  %v3559_v55 = vmul.f32 %v3531_v49, %v3525_v45  ;;  %v3583_v61 = vmul.f32 %v6254_v58, %v3525_v45  ;;  %v3706_v34 = vmul.f32 %v3643_v12, %v3525_v45  ;;  %v3710_v35 = vmul.f32 %v3616_v3, %v3525_v45 }
  0xf8   : > { %v6250_v52 = vrot.slane %v3540_v50, 6  ;;  %v6251_v53 = vrot.slane %v3545_v51, 5  ;;  %v6252_v59 = vrot.slane %v3555_v54, 7  ;;  %v3729_v47 = vstv %s3611_s5  ;;  %s3264_s5 = smov 122  }
  0xf9   : > { %v313_v56 = vpop.permute.xlu1 %312  ;;  %v309_v57 = vpop.permute.xlu0 %308  ;;  %v6253_v60 = vrot.slane %v3559_v55, 6  ;;  %6383 = vst [vmem:[#allocation32_spill] sm:$0xff] %v3583_v61  ;;  %v6249_v0 = vrot.slane %v3583_v61, 7  ;;  %6411 = vst [vmem:[#allocation52_spill] sm:$0xff] %v3729_v47  ;;  %v3792_v58 = vmul.f32 %v3666_v19, %v3525_v45  ;;  %v3796_v43 = vmul.f32 %v3671_v20, %v3525_v45 }
  0xfa   : > { %315 = vst.msk [vmem:[#allocation2 + $0x21] sm:$0x1] %vm260_vm3, %v313_v56  ;;  %311 = vst.msk [vmem:[#allocation2 + $0x9] sm:$0x1] %vm260_vm3, %v309_v57  ;;  %653 = vrot.lane.b32.xlu1 %v6250_v52, %s6241_s23  ;;  %488 = vrot.lane.b32.xlu0 %v6251_v53, %s6243_s21  ;;  %s3587_s23 = sld [smem:[#allocation4 + $0x1a]]  ;;  %s6246_s21 = smov 125   ;;  %v3776_v52 = vmul.f32 %v3652_v15, %v3525_v45  ;;  %v3805_v29 = vmul.f32 %v3649_v14, %v3525_v45 }
  0xfb   : > { %v3810_v20 = vmul.f32 %v3686_v27, %v3525_v45  ;;  %v3833_v41 = vmul.f32 %v6420_v44, %v3525_v45  ;;  %v3837_v61 = vmul.f32 %v3695_v30, %v3525_v45  ;;  %v3841_v19 = vmul.f32 %v3680_v23, %v3525_v45 }
  0xfc   : > { %6417 = vst [vmem:[#allocation58_spill] sm:$0xff] %v3805_v29  ;;  %v3857_v32 = vmul.f32 %v3674_v21, %v3525_v45  ;;  %v3861_v23 = vmul.f32 %v3677_v22, %v3525_v45  ;;  %v3869_v44 = vmul.f32 %v3713_v36, %v3525_v45 }
  0xfd   : > { %v321_v62 = vpop.permute.xlu1 %320  ;;  %v317_v63 = vpop.permute.xlu0 %316  ;;  %6421 = vst [vmem:[#allocation61_spill] sm:$0xff] %v3833_v41  ;;  %6422 = vst [vmem:[#allocation62_spill] sm:$0xff] %v3837_v61  ;;  %v6436_v41 = vstv %s6425_s3  ;;  %s2983_s3 = sld [smem:[#allocation4 + $0x43]] }
  0xfe   : > { %323 = vst.msk [vmem:[#allocation2 + $0x22] sm:$0x1] %vm260_vm3, %v321_v62  ;;  %319 = vst.msk [vmem:[#allocation2 + $0xa] sm:$0x1] %vm260_vm3, %v317_v63  ;;  %843 = vrot.lane.b32.xlu1 %v6252_v59, %s6246_s21  ;;  %678 = vrot.lane.b32.xlu0 %v6253_v60, %s6386_s11  ;;  %s3604_s21 = sld [smem:[#allocation4 + $0x6]]  ;;  %s6390_s11 = smov 125   ;;  %v3738_v62 = vstv %s3638_s17  ;;  %v3744_v63 = vmul.f32 %v3619_v4, %v3525_v45  ;;  %v3784_v59 = vmul.f32 %v3660_v17, %v3525_v45 }
  0xff   : > { %6414 = vst [vmem:[#allocation55_spill] sm:$0xff] %v3738_v62  ;;  %v3788_v60 = vmul.f32 %v3663_v18, %v3525_v45  ;;  %6423 = vst [vmem:[#allocation63_spill] sm:$0xff] %v3841_v19  ;;  %v3845_v18 = vmul.f32 %v3683_v26, %v3525_v45  ;;  %s2969_s17 = sld [smem:[#allocation4 + $0x41]] }
 0x100   : > { %6385 = sst [smem:[#allocation34_spill]] %s3587_s23  ;;  %6428 = vst [vmem:[#allocation66_spill] sm:$0xff] %v3857_v32  ;;  %6429 = vst [vmem:[#allocation67_spill] sm:$0xff] %v3861_v23 }
 0x101   : > { %s3602_s23 = sld [smem:[#allocation4 + $0x2f]]  ;;  %v331_v1 = vpop.permute.xlu1 %330  ;;  %v326_v2 = vpop.permute.xlu0 %325  ;;  %6424 = vst [vmem:[#allocation64_spill] sm:$0xff] %v3845_v18  ;;  %6431 = vst [vmem:[#allocation69_spill] sm:$0xff] %v3869_v44 }
 0x102   : > { %333 = vst.msk [vmem:[#allocation2 + $0x23] sm:$0x1] %vm260_vm3, %v331_v1  ;;  %328 = vst.msk [vmem:[#allocation2 + $0xb] sm:$0x1] %vm260_vm3, %v326_v2  ;;  %818 = vrot.lane.b32.xlu0 %v6249_v0, %s6390_s11  ;;  %s6398_s1 = sld [smem:[#allocation34_spill]]  ;;  %v3748_v1 = vmul.f32 %v3646_v13, %v3525_v45  ;;  %v3752_v2 = vmul.f32 %v3627_v8, %v3525_v45  ;;  %v3772_v0 = vmul.f32 %v3636_v11, %v3525_v45 }
 0x104   : > { %6389 = sst [smem:[#allocation37_spill]] %s3604_s21  ;;  %v6455_v44 = vrot.slane %v3772_v0, 2 }
 0x105   : > { %s3624_s21 = sld [smem:[#allocation4 + $0x1b]]  ;;  %v339_v6 = vpop.permute.xlu1 %338  ;;  %v335_v7 = vpop.permute.xlu0 %334 }
 0x106   : > { %341 = vst.msk [vmem:[#allocation2 + $0x24] sm:$0x1] %vm260_vm3, %v339_v6  ;;  %337 = vst.msk [vmem:[#allocation2 + $0xc] sm:$0x1] %vm260_vm3, %v335_v7  ;;  %s6402_s20 = sld [smem:[#allocation37_spill]]  ;;  %v3755_v6 = vstv %s3654_s22 }
 0x107   : > { %6388 = sst [smem:[#allocation36_spill]] %s3602_s23  ;;  %6415 = vst [vmem:[#allocation56_spill] sm:$0xff] %v3755_v6 }
 0x108   : > { %s3613_s23 = sld [smem:[#allocation4 + $0x14]]  ;;  %v3716_v37 = vstv %s6398_s1 }
 0x109   : > { %v347_v24 = vpop.permute.xlu1 %346  ;;  %v343_v25 = vpop.permute.xlu0 %342  ;;  %s6400_s7 = sld [smem:[#allocation36_spill]]  ;;  %6407 = vst [vmem:[#allocation48_spill] sm:$0xff] %v3716_v37  ;;  %v3875_v32 = vmul.f32 %v3716_v37, %v3525_v45 }
 0x10a   : > { %349 = vst.msk [vmem:[#allocation2 + $0x25] sm:$0x1] %vm260_vm3, %v347_v24  ;;  %345 = vst.msk [vmem:[#allocation2 + $0xd] sm:$0x1] %vm260_vm3, %v343_v25  ;;  %v3761_v25 = vmul.f32 %v3622_v5, %v3525_v45  ;;  %v3780_v24 = vmul.f32 %v3657_v16, %v3525_v45  ;;  %s2971_s22 = sld [smem:[#allocation4 + $0x4f]] }
 0x10b   : > { %v3735_v57 = vstv %s3624_s21  ;;  %6432 = vst [vmem:[#allocation70_spill] sm:$0xff] %v3875_v32  ;;  %s2935_s21 = sld [smem:[#allocation4 + $0x19]] }
 0x10c   : > { %6413 = vst [vmem:[#allocation54_spill] sm:$0xff] %v3735_v57  ;;  %v6437_v37 = vstv %s6402_s20  ;;  %s2979_s1 = sld [smem:[#allocation4 + $0x57]] }
 0x10d   : > { %v355_v42 = vpop.permute.xlu1 %354  ;;  %v351_v46 = vpop.permute.xlu0 %350 }
 0x10e   : > { %v3732_v56 = vstv %s3613_s23  ;;  %357 = vst.msk [vmem:[#allocation2 + $0x26] sm:$0x1] %vm260_vm3, %v355_v42  ;;  %353 = vst.msk [vmem:[#allocation2 + $0xe] sm:$0x1] %vm260_vm3, %v351_v46  ;;  %v3764_v42 = vstv %s3668_s18  ;;  %v3768_v46 = vmul.f32 %v3630_v9, %v3525_v45  ;;  %s3263_s23 = smov 123   ;;  %s2975_s18 = sld [smem:[#allocation4 + $0x3b]] }
 0x10f   : > { %v3725_v40 = vstv %s6400_s7  ;;  %6412 = vst [vmem:[#allocation53_spill] sm:$0xff] %v3732_v56  ;;  %6416 = vst [vmem:[#allocation57_spill] sm:$0xff] %v3764_v42  ;;  %s2977_s7 = sld [smem:[#allocation4 + $0x49]] }
 0x110   : > { %6410 = vst [vmem:[#allocation51_spill] sm:$0xff] %v3725_v40  ;;  %v3887_v36 = vmul.f32 %v3725_v40, %v3525_v45  ;;  %v3904_v40 = vmul.f32 %v3729_v47, %v3525_v45 }
 0x111   : > { %v363_v7 = vpop.permute.xlu1 %362  ;;  %v359_v53 = vpop.permute.xlu0 %358 }
 0x112   : > { %365 = vst.msk [vmem:[#allocation2 + $0x27] sm:$0x1] %vm260_vm3, %v363_v7  ;;  %361 = vst.msk [vmem:[#allocation2 + $0xf] sm:$0x1] %vm260_vm3, %v359_v53  ;;  %v3814_v53 = vmul.f32 %v3689_v28, %v3525_v45  ;;  %v3818_v7 = vmul.f32 %v3698_v31, %v3525_v45  ;;  %v6426_v31 = vstv %s3574_s16 }
 0x113   : > { %v3853_v28 = vmul.f32 %v6426_v31, %v3525_v45  ;;  %6435 = vst [vmem:[#allocation73_spill] sm:$0xff] %v3887_v36  ;;  %6439 = vst [vmem:[#allocation75_spill] sm:$0xff] %v3904_v40 }
 0x114   : > { %6418 = vst [vmem:[#allocation59_spill] sm:$0xff] %v3814_v53  ;;  %6419 = vst [vmem:[#allocation60_spill] sm:$0xff] %v3818_v7  ;;  %v3879_v7 = vmul.f32 %v3719_v38, %v3525_v45  ;;  %v3931_v53 = vmul.f32 %v3738_v62, %v3525_v45 }
 0x115   : > { %v367_v29 = vpop.permute.xlu0 %366  ;;  %v371_v27 = vpop.permute.xlu1 %370  ;;  %6427 = vst [vmem:[#allocation65_spill] sm:$0xff] %v3853_v28  ;;  %v3935_v28 = vmul.f32 %v3755_v6, %v3525_v45 }
 0x116   : > { %369 = vst.msk [vmem:[#allocation2 + $0x10] sm:$0x1] %vm260_vm3, %v367_v29  ;;  %373 = vst.msk [vmem:[#allocation2 + $0x28] sm:$0x1] %vm260_vm3, %v371_v27  ;;  %v3865_v29 = vmul.f32 %v3702_v33, %v3525_v45  ;;  %v3883_v33 = vmul.f32 %v3722_v39, %v3525_v45  ;;  %v3900_v39 = vmul.f32 %v6437_v37, %v3525_v45 }
 0x117   : > { %6433 = vst [vmem:[#allocation71_spill] sm:$0xff] %v3879_v7  ;;  %v6449_v7 = vstv %s6446_s14  ;;  %s5191_s14 = sld [smem:[#allocation4 + $0x31]] }
 0x118   : > { %6430 = vst [vmem:[#allocation68_spill] sm:$0xff] %v3865_v29  ;;  %6434 = vst [vmem:[#allocation72_spill] sm:$0xff] %v3883_v33  ;;  %v6450_v29 = vrot.slane %v3559_v55, 6  ;;  %v6457_v55 = vrot.slane %v3776_v52, 6 }
 0x119   : > { %v3871_v27 = vld [vmem:[#allocation2 + $0x8] sm:$0xff]  ;;  %v375_v31 = vpop.permute.xlu0 %374  ;;  %v379_v19 = vpop.permute.xlu1 %378  ;;  %6438 = vst [vmem:[#allocation74_spill] sm:$0xff] %v3900_v39 }
 0x11a   : > { %377 = vst.msk [vmem:[#allocation2 + $0x11] sm:$0x1] %vm260_vm3, %v375_v31  ;;  %v3893_v21 = vmul.f32 %v6436_v41, %v3871_v27  ;;  %381 = vst.msk [vmem:[#allocation2 + $0x29] sm:$0x1] %vm260_vm3, %v379_v19  ;;  %v3910_v41 = vmul.f32 %v3732_v56, %v3525_v45  ;;  %v3914_v19 = vmul.f32 %v3735_v57, %v3525_v45 }
 0x11b   : > { %v3950_v47 = vmul.f32 %v3643_v12, %v3871_v27  ;;  %v3954_v61 = vmul.f32 %v3619_v4, %v3871_v27  ;;  %v3966_v56 = vmul.f32 %v3630_v9, %v3871_v27  ;;  %v3970_v37 = vmul.f32 %v3636_v11, %v3871_v27 }
 0x11c   : > { %6440 = vst [vmem:[#allocation76_spill] sm:$0xff] %v3910_v41  ;;  %6441 = vst [vmem:[#allocation77_spill] sm:$0xff] %v3914_v19  ;;  %v486_v38 = vrot.slane %v3893_v21, 5  ;;  %v3946_v21 = vmul.f32 %v3764_v42, %v3525_v45  ;;  %v3974_v45 = vmul.f32 %v3652_v15, %v3871_v27  ;;  %v3982_v42 = vmul.f32 %v3627_v8, %v3871_v27 }
 0x11d   : > { %v383_v31 = vpop.permute.xlu0 %382  ;;  %v387_v18 = vpop.permute.xlu1 %386  ;;  %6447 = vst [vmem:[#allocation79_spill] sm:$0xff] %v3966_v56  ;;  %6448 = vst [vmem:[#allocation80_spill] sm:$0xff] %v3970_v37  ;;  %v3986_v19 = vmul.f32 %v3646_v13, %v3871_v27  ;;  %v3990_v6 = vmul.f32 %v3622_v5, %v3871_v27  ;;  %v4001_v32 = vmul.f32 %v6449_v7, %v3871_v27  ;;  %v6454_v7 = vrot.slane %v3970_v37, 2 }
 0x11e   : > { %385 = vst.msk [vmem:[#allocation2 + $0x12] sm:$0x1] %vm260_vm3, %v383_v31  ;;  %492 = vrot.lane.b32.xlu0 %v486_v38, %s6443_s13  ;;  %389 = vst.msk [vmem:[#allocation2 + $0x2a] sm:$0x1] %vm260_vm3, %v387_v18  ;;  %v6444_v31 = vstv %s6442_s12  ;;  %v3962_v18 = vmul.f32 %v3531_v49, %v3871_v27  ;;  %v796_v39 = vrot.slane %v3974_v45, 6  ;;  %v6451_v45 = vrot.slane %v3966_v56, 2 }
 0x11f   : > { %v3940_v57 = vmul.f32 %v6444_v31, %v3871_v27  ;;  %6445 = vst [vmem:[#allocation78_spill] sm:$0xff] %v3946_v21  ;;  %v3958_v31 = vmul.f32 %v3616_v3, %v3871_v27  ;;  %v3978_v21 = vmul.f32 %v3528_v48, %v3871_v27  ;;  %v4025_v23 = vsel %vm698_vm5, %v6455_v44, %v6454_v7  ;;  %s2978_s12 = sld [smem:[#allocation4 + $0x50]] }
 0x120   : > { %v6319_v62 = vrot.slane %v3962_v18, 6  ;;  %6456 = vst [vmem:[#allocation82_spill] sm:$0xff] %v4025_v23 }
 0x121   : > { %v839_v36 = vrot.slane %v3978_v21, 7  ;;  %v651_v33 = vrot.slane %v3940_v57, 6  ;;  %v6452_v21 = vrot.slane %v3768_v46, 2 }
 0x122   : > { %v4009_v41 = vsel %vm649_vm4, %v6450_v29, %v6319_v62  ;;  %v4030_v29 = vsel %vm649_vm4, %v6457_v55, %v796_v39  ;;  %v6459_v62 = vrot.slane %v3555_v54, 7  ;;  %v6463_v54 = vrot.slane %v3706_v34, 1 }
 0x123   : > { %v4018_v57 = vsel %vm698_vm5, %v6452_v21, %v6451_v45  ;;  %6458 = vst [vmem:[#allocation83_spill] sm:$0xff] %v4030_v29  ;;  %v6461_v45 = vrot.slane %v3545_v51, 5 }
 0x124   : > { %6453 = vst [vmem:[#allocation81_spill] sm:$0xff] %v4018_v57  ;;  %v4035_v56 = vsel %vm814_vm6, %v6459_v62, %v839_v36  ;;  %v6462_v62 = vrot.slane %v3950_v47, 1  ;;  %v6475_v57 = vld [vmem:[#allocation38_spill] sm:$0xff] }
 0x125   : > { %v4011_v40 = vld [vmem:[#allocation2 + $0x10] sm:$0x3f]  ;;  %6460 = vst [vmem:[#allocation84_spill] sm:$0xff] %v4035_v56  ;;  %v4064_v21 = vsel %vm484_vm8, %v6461_v45, %v486_v38  ;;  %v6466_v38 = vrot.slane %v3710_v35, 1 }
 0x126   : > { %v4039_v46 = vmul.f32 %v3616_v3, %v4011_v40  ;;  %v4043_v0 = vmul.f32 %v3619_v4, %v4011_v40  ;;  %v4055_v4 = vmul.f32 %v3622_v5, %v4011_v40  ;;  %v4059_v55 = vmul.f32 %v3627_v8, %v4011_v40 }
 0x127   : > { %v4071_v44 = vsel %vm508_vm7, %v6463_v54, %v6462_v62  ;;  %v6464_v5 = vrot.slane %v3540_v50, 6  ;;  %v4087_v51 = vmul.f32 %v3630_v9, %v4011_v40  ;;  %v6465_v50 = vrot.slane %v3958_v31, 1 }
 0x128   : > { %v6321_v7 = vrot.slane %v4039_v46, 1  ;;  %v6322_v3 = vrot.slane %v4043_v0, 1  ;;  %v6467_v54 = vrot.slane %v3954_v61, 1  ;;  %v6468_v62 = vrot.slane %v3744_v63, 1 }
 0x129   : > { %v4076_v52 = vsel %vm649_vm4, %v6464_v5, %v651_v33  ;;  %v4095_v45 = vsel %vm508_vm7, %v6466_v38, %v6465_v50  ;;  %v4106_v9 = vmul.f32 %v3633_v10, %v4011_v40  ;;  %v6469_v8 = vrot.slane %v3986_v19, 5 }
 0x12a   : > { %564 = vrot.lane.b32.xlu0 %v6321_v7, %s6443_s13  ;;  %539 = vrot.lane.b32.xlu1 %v6322_v3, %s6443_s13  ;;  %v4102_v5 = vsel %vm508_vm7, %v6468_v62, %v6467_v54  ;;  %v6470_v7 = vrot.slane %v3748_v1, 5  ;;  %v6471_v50 = vrot.slane %v3982_v42, 1  ;;  %v6472_v38 = vrot.slane %v3752_v2, 1 }
 0x12b   : > { %v4124_v54 = vmul.f32 %v3649_v14, %v3871_v27  ;;  %v6323_v62 = vrot.slane %v4055_v4, 5  ;;  %v583_v3 = vrot.slane %v4059_v55, 1  ;;  %v6473_v1 = vrot.slane %v3990_v6, 5 }
 0x12c   : > { %v4113_v35 = vsel %vm484_vm8, %v6470_v7, %v6469_v8  ;;  %v4120_v63 = vsel %vm508_vm7, %v6472_v38, %v6471_v50  ;;  %v6474_v7 = vrot.slane %v3761_v25, 5  ;;  %v4137_v2 = vmul.f32 %v3633_v10, %v3871_v27 }
 0x12d   : > { %v4141_v50 = vmul.f32 %v3636_v11, %v4011_v40  ;;  %v504_v38 = vmul.f32 %v3643_v12, %v4011_v40  ;;  %v791_v55 = vmul.f32 %v3652_v15, %v4011_v40  ;;  %v834_v25 = vmul.f32 %v3528_v48, %v4011_v40 }
 0x12e   : > { %v4133_v8 = vsel %vm484_vm8, %v6474_v7, %v6473_v1  ;;  %635 = vrot.lane.b32.xlu0 %v6323_v62, %s6443_s13  ;;  %589 = vrot.lane.b32.xlu1 %v583_v3, %s6443_s13  ;;  %v858_v11 = vmul.f32 %v3657_v16, %v3871_v27  ;;  %v859_v12 = vmul.f32 %v3657_v16, %v4011_v40 }
 0x12f   : > { %v883_v15 = vmul.f32 %v3660_v17, %v3871_v27  ;;  %v601_v48 = vmul.f32 %v3646_v13, %v4011_v40  ;;  %v798_v34 = vrot.slane %v791_v55, 6  ;;  %v841_v62 = vrot.slane %v834_v25, 7 }
 0x130   : > { %v669_v56 = vmul.f32 %v3531_v49, %v4011_v40  ;;  %v864_v1 = vrot.slane %v858_v11, 7  ;;  %v866_v29 = vrot.slane %v859_v12, 7  ;;  %v884_v23 = vmul.f32 %v3660_v17, %v4011_v40 }
 0x131   : > { %v4168_v16 = vsel %vm649_vm4, %v796_v39, %v798_v34  ;;  %v4171_v37 = vsel %vm814_vm6, %v839_v36, %v841_v62  ;;  %v890_v7 = vrot.slane %v883_v15, 3  ;;  %v905_v13 = vmul.f32 %v6475_v57, %v3871_v27 }
 0x132   : > { %v6477_v55 = vrot.slane %v4087_v51, 2  ;;  %657 = vrot.lane.b32.xlu1 %v651_v33, %s6476_s15  ;;  %v4180_v49 = vsel %vm814_vm6, %v864_v1, %v866_v29  ;;  %v6478_v17 = vrot.slane %v3780_v24, 7  ;;  %v892_v36 = vrot.slane %v884_v23, 3  ;;  %v6480_v33 = vld [vmem:[#allocation39_spill] sm:$0xff] }
 0x133   : > { %v4189_v34 = vmul.f32 %v6475_v57, %v4011_v40  ;;  %v6479_v62 = vrot.slane %v3784_v59, 3  ;;  %v911_v11 = vrot.slane %v905_v13, 3  ;;  %v930_v29 = vmul.f32 %v6480_v33, %v3871_v27  ;;  %v6481_v57 = vld [vmem:[#allocation40_spill] sm:$0xff] }
 0x134   : > { %754 = vrot.lane.b32.xlu0 %v6477_v55, %s6476_s15  ;;  %v4185_v39 = vsel %vm814_vm6, %v6478_v17, %v864_v1  ;;  %v4200_v12 = vmul.f32 %v6480_v33, %v4011_v40  ;;  %v4203_v1 = vsel %vm888_vm9, %v890_v7, %v892_v36  ;;  %v955_v15 = vmul.f32 %v6481_v57, %v3871_v27 }
 0x135   : > { %v4194_v25 = vsel %vm888_vm9, %v6479_v62, %v890_v7  ;;  %v6325_v23 = vrot.slane %v4189_v34, 3  ;;  %v4210_v59 = vmul.f32 %v6481_v57, %v4011_v40  ;;  %v512_v13 = vrot.slane %v504_v38, 1 }
 0x136   : > { %v6482_v55 = vrot.slane %v3788_v60, 3  ;;  %v936_v62 = vrot.slane %v930_v29, 3  ;;  %v6484_v7 = vrot.slane %v4001_v32, 7  ;;  %v6485_v36 = vrot.slane %v4106_v9, 2 }
 0x137   : > { %v4228_v60 = vsel %vm888_vm9, %v911_v11, %v6325_v23  ;;  %v961_v38 = vrot.slane %v955_v15, 3  ;;  %v6326_v29 = vrot.slane %v4210_v59, 3  ;;  %v4233_v33 = vmul.f32 %v3649_v14, %v4011_v40 }
 0x138   : > { %v4215_v17 = vsel %vm888_vm9, %v6482_v55, %v911_v11  ;;  %822 = vrot.lane.b32.xlu0 %v6484_v7, %s6390_s11  ;;  %729 = vrot.lane.b32.xlu1 %v6485_v36, %s6476_s15  ;;  %v608_v55 = vrot.slane %v601_v48, 5  ;;  %v6486_v7 = vrot.slane %v3792_v58, 3  ;;  %v6487_v36 = vrot.slane %v4200_v12, 3 }
 0x139   : > { %6483 = vst [vmem:[#allocation38_spill] sm:$0xff] %v4215_v17  ;;  %v6488_v11 = vrot.slane %v4043_v0, 1  ;;  %v6489_v15 = vrot.slane %v3954_v61, 1  ;;  %v676_v23 = vrot.slane %v669_v56, 6  ;;  %v4253_v14 = vsel %vm888_vm9, %v961_v38, %v6326_v29 }
 0x13a   : > { %v4238_v17 = vsel %vm888_vm9, %v6486_v7, %v936_v62  ;;  %v4243_v57 = vsel %vm888_vm9, %v936_v62, %v6487_v36  ;;  %v6490_v58 = vrot.slane %v3796_v43, 3  ;;  %v6491_v62 = vrot.slane %v3950_v47, 1 }
 0x13b   : > { %v534_v48 = vsel %vm508_vm7, %v6489_v15, %v6488_v11  ;;  %v6492_v0 = vrot.slane %v3982_v42, 1  ;;  %v4268_v56 = vmul.f32 %v3677_v22, %v4011_v40  ;;  %v4272_v11 = vmul.f32 %v3683_v26, %v4011_v40 }
 0x13c   : > { %v4258_v7 = vsel %vm888_vm9, %v6490_v58, %v961_v38  ;;  %v513_v36 = vsel %vm508_vm7, %v6491_v62, %v512_v13  ;;  %v6495_v43 = vrot.slane %v4141_v50, 2  ;;  %v6496_v47 = vrot.slane %v4039_v46, 1  ;;  %v6500_v62 = vld [vmem:[#allocation43_spill] sm:$0xff] }
 0x13d   : > { %v584_v61 = vsel %vm508_vm7, %v6492_v0, %v583_v3  ;;  %6493 = vst [vmem:[#allocation39_spill] sm:$0xff] %v4268_v56  ;;  %6494 = vst [vmem:[#allocation40_spill] sm:$0xff] %v4272_v11  ;;  %516 = vrot.lane.b32.xlu0 %v513_v36, %s6443_s13  ;;  %v6497_v42 = vrot.slane %v3958_v31, 1  ;;  %v6498_v13 = vrot.slane %v4055_v4, 5  ;;  %v6499_v38 = vrot.slane %v3990_v6, 5  ;;  %v6502_v6 = vld [vmem:[#allocation44_spill] sm:$0xff] }
 0x13e   : > { %779 = vrot.lane.b32.xlu1 %v6495_v43, %s6476_s15  ;;  %v1054_v0 = vmul.f32 %v6500_v62, %v3871_v27  ;;  %v6501_v36 = vrot.slane %v3986_v19, 5  ;;  %v1055_v4 = vmul.f32 %v6500_v62, %v4011_v40  ;;  %v1075_v43 = vmul.f32 %v6502_v6, %v3871_v27  ;;  %v6512_v62 = vld [vmem:[#allocation62_spill] sm:$0xff] }
 0x13f   : > { %v4283_v3 = vsel %vm508_vm7, %v6497_v42, %v6496_v47  ;;  %v4290_v15 = vsel %vm484_vm8, %v6499_v38, %v6498_v13  ;;  %v6503_v47 = vrot.slane %v3962_v18, 6  ;;  %v4312_v19 = vmul.f32 %v6502_v6, %v4011_v40 }
 0x140   : > { %v4298_v46 = vsel %vm484_vm8, %v6501_v36, %v608_v55  ;;  %v1060_v13 = vrot.slane %v1054_v0, 4  ;;  %v426_v55 = vmul.f32 %v3695_v30, %v3871_v27  ;;  %v1062_v36 = vrot.slane %v1055_v4, 4 }
 0x141   : > { %v4308_v42 = vsel %vm649_vm4, %v6503_v47, %v676_v23  ;;  %6504 = vst [vmem:[#allocation43_spill] sm:$0xff] %v4312_v19  ;;  %v1081_v29 = vrot.slane %v1075_v43, 4  ;;  %537 = vrot.lane.b32.xlu0 %v534_v48, %s6443_s13  ;;  %v6505_v18 = vrot.slane %v3810_v20, 4  ;;  %v6327_v0 = vrot.slane %v4312_v19, 4  ;;  %v6510_v48 = vld [vmem:[#allocation45_spill] sm:$0xff] }
 0x142   : > { %490 = vrot.lane.b32.xlu1 %v4064_v21, %s6443_s13  ;;  %v427_v6 = vmul.f32 %v3695_v30, %v4011_v40  ;;  %v432_v47 = vrot.slane %v426_v55, 4  ;;  %v4330_v58 = vsel %vm216_vm0, %v1060_v13, %v1062_v36  ;;  %v6506_v4 = vstv %s3549_s10  ;;  %v6507_v21 = vld [vmem:[#allocation59_spill] sm:$0xff]  ;;  %s5009_s10 = sld [smem:[#allocation4 + $0x33]] }
 0x143   : > { %v4324_v23 = vsel %vm216_vm0, %v6505_v18, %v1060_v13  ;;  %v396_v43 = vmul.f32 %v6506_v4, %v3871_v27  ;;  %v6508_v31 = vrot.slane %v6507_v21, 4  ;;  %v1100_v18 = vmul.f32 %v6510_v48, %v3871_v27  ;;  %v6511_v13 = vld [vmem:[#allocation41_spill] sm:$0xff] }
 0x144   : > { %v4345_v30 = vsel %vm216_vm0, %v1081_v29, %v6327_v0  ;;  %v434_v55 = vrot.slane %v427_v6, 4  ;;  %v402_v36 = vmul.f32 %v6511_v13, %v3871_v27  ;;  %v443_v4 = vmul.f32 %v3677_v22, %v3871_v27  ;;  %v6518_v13 = vld [vmem:[#allocation60_spill] sm:$0xff] }
 0x145   : > { %v4338_v20 = vsel %vm216_vm0, %v6508_v31, %v1081_v29  ;;  %v1106_v21 = vrot.slane %v1100_v18, 4  ;;  %v4353_v31 = vmul.f32 %v6510_v48, %v4011_v40  ;;  %v6513_v38 = vrot.slane %v6512_v62, 4  ;;  %560 = vrot.lane.b32.xlu0 %v4095_v45, %s6443_s13  ;;  %v6514_v18 = vld [vmem:[#allocation61_spill] sm:$0xff] }
 0x146   : > { %6509 = vst [vmem:[#allocation44_spill] sm:$0xff] %v4338_v20  ;;  %v462_v29 = vmul.f32 %v3683_v26, %v3871_v27  ;;  %514 = vrot.lane.b32.xlu1 %v4071_v44, %s6443_s13  ;;  %v435_v22 = vsel %vm216_vm0, %v432_v47, %v434_v55  ;;  %v449_v6 = vrot.slane %v443_v4, 4  ;;  %v6516_v48 = vstv %s3574_s16  ;;  %v6521_v4 = vld [vmem:[#allocation67_spill] sm:$0xff]  ;;  %s2932_s16 = sld [smem:[#allocation4 + $0x4]] }
 0x147   : > { %v433_v20 = vsel %vm216_vm0, %v6513_v38, %v432_v47  ;;  %v4371_v62 = vmul.f32 %v6516_v48, %v3871_v27  ;;  %v4373_v38 = vadd.f32 %v435_v22, %v396_v43  ;;  %v6519_v26 = vrot.slane %v6518_v13, 4  ;;  %v6523_v43 = vld [vmem:[#allocation46_spill] sm:$0xff] }
 0x148   : > { %v4366_v0 = vadd.f32 %v433_v20, %v6514_v18  ;;  %v468_v45 = vrot.slane %v462_v29, 4  ;;  %v6520_v47 = vrot.slane %v4268_v56, 4  ;;  %v6522_v18 = vrot.slane %v6521_v4, 4  ;;  %v6533_v4 = vld [vmem:[#allocation65_spill] sm:$0xff] }
 0x149   : > { %6517 = vst [vmem:[#allocation45_spill] sm:$0xff] %v4373_v38  ;;  %v4378_v19 = vsel %vm216_vm0, %v6519_v26, %v1106_v21  ;;  %v1146_v22 = vmul.f32 %v6523_v43, %v3871_v27  ;;  %v6525_v26 = vld [vmem:[#allocation64_spill] sm:$0xff]  ;;  %v6527_v29 = vrot.slane %v4353_v31, 4  ;;  %587 = vrot.lane.b32.xlu0 %v584_v61, %s6443_s13  ;;  %v6537_v61 = vld [vmem:[#allocation47_spill] sm:$0xff] }
 0x14a   : > { %6515 = vst [vmem:[#allocation59_spill] sm:$0xff] %v4366_v0  ;;  %v452_v55 = vsel %vm216_vm0, %v449_v6, %v6520_v47  ;;  %v450_v48 = vsel %vm216_vm0, %v6522_v18, %v449_v6  ;;  %v6526_v0 = vrot.slane %v6525_v26, 4  ;;  %v6528_v47 = vld [vmem:[#allocation66_spill] sm:$0xff]  ;;  %535 = vrot.lane.b32.xlu1 %v4102_v5, %s6443_s13  ;;  %v6530_v6 = vld [vmem:[#allocation63_spill] sm:$0xff] }
 0x14b   : > { %v4390_v13 = vadd.f32 %v452_v55, %v402_v36  ;;  %v4398_v38 = vsel %vm216_vm0, %v1106_v21, %v6527_v29  ;;  %v4401_v20 = vadd.f32 %v450_v48, %v6528_v47  ;;  %v6532_v55 = vrot.slane %v4371_v62, 5  ;;  %v6535_v26 = vld [vmem:[#allocation42_spill] sm:$0xff] }
 0x14c   : > { %v469_v44 = vsel %vm216_vm0, %v6526_v0, %v468_v45  ;;  %v6534_v0 = vrot.slane %v6533_v4, 5  ;;  %v1152_v21 = vrot.slane %v1146_v22, 1  ;;  %v410_v48 = vmul.f32 %v6535_v26, %v3871_v27  ;;  %v6552_v26 = vld [vmem:[#allocation70_spill] sm:$0xff] }
 0x14d   : > { %6524 = vst [vmem:[#allocation62_spill] sm:$0xff] %v4390_v13  ;;  %6529 = vst [vmem:[#allocation61_spill] sm:$0xff] %v4401_v20  ;;  %v4407_v36 = vadd.f32 %v469_v44, %v6530_v6  ;;  %v6536_v29 = vrot.slane %v4272_v11, 4  ;;  %v1167_v47 = vmul.f32 %v6537_v61, %v3871_v27  ;;  %v1147_v44 = vmul.f32 %v6523_v43, %v4011_v40  ;;  %v6542_v13 = vld [vmem:[#allocation48_spill] sm:$0xff] }
 0x14e   : > { %v4414_v18 = vsel %vm484_vm8, %v6534_v0, %v6532_v55  ;;  %v4427_v6 = vmul.f32 %v6537_v61, %v4011_v40  ;;  %v6539_v55 = vld [vmem:[#allocation68_spill] sm:$0xff]  ;;  %v6544_v61 = vld [vmem:[#allocation49_spill] sm:$0xff]  ;;  %562 = vrot.lane.b32.xlu1 %v4283_v3, %s6443_s13  ;;  %610 = vrot.lane.b32.xlu0 %v4113_v35, %s6443_s13 }
 0x14f   : > { %6531 = vst [vmem:[#allocation60_spill] sm:$0xff] %v4407_v36  ;;  %v471_v5 = vsel %vm216_vm0, %v468_v45, %v6536_v29  ;;  %v6540_v0 = vrot.slane %v6539_v55, 1  ;;  %v1192_v45 = vmul.f32 %v6542_v13, %v3871_v27  ;;  %v4440_v29 = vmul.f32 %v6542_v13, %v4011_v40  ;;  %v6547_v55 = vld [vmem:[#allocation69_spill] sm:$0xff] }
 0x150   : > { %6538 = vst [vmem:[#allocation67_spill] sm:$0xff] %v4427_v6  ;;  %v4434_v20 = vadd.f32 %v471_v5, %v410_v48  ;;  %v1173_v36 = vrot.slane %v1167_v47, 1  ;;  %v1154_v43 = vrot.slane %v1147_v44, 1  ;;  %v1217_v56 = vmul.f32 %v6544_v61, %v3871_v27  ;;  %v6546_v47 = vld [vmem:[#allocation50_spill] sm:$0xff] }
 0x151   : > { %v4432_v22 = vsel %vm508_vm7, %v6540_v0, %v1152_v21  ;;  %6543 = vst [vmem:[#allocation64_spill] sm:$0xff] %v4440_v29  ;;  %v1198_v48 = vrot.slane %v1192_v45, 1  ;;  %v4452_v13 = vmul.f32 %v6544_v61, %v4011_v40  ;;  %v1242_v44 = vmul.f32 %v6546_v47, %v3871_v27 }
 0x152   : > { %6541 = vst [vmem:[#allocation46_spill] sm:$0xff] %v4434_v20  ;;  %v6548_v0 = vrot.slane %v6547_v55, 1  ;;  %v4462_v3 = vsel %vm508_vm7, %v1152_v21, %v1154_v43  ;;  %v6550_v35 = vrot.slane %v4427_v6, 1  ;;  %v1223_v5 = vrot.slane %v1217_v56, 1  ;;  %v6555_v43 = vld [vmem:[#allocation71_spill] sm:$0xff]  ;;  %585 = vrot.lane.b32.xlu1 %v4120_v63, %s6443_s13  ;;  %631 = vrot.lane.b32.xlu0 %v4133_v8, %s6443_s13 }
 0x153   : > { %6545 = vst [vmem:[#allocation66_spill] sm:$0xff] %v4452_v13  ;;  %v6551_v61 = vrot.slane %v4440_v29, 1  ;;  %v6553_v55 = vrot.slane %v6552_v26, 1  ;;  %v1243_v21 = vmul.f32 %v6546_v47, %v4011_v40  ;;  %v6556_v6 = vrot.slane %v6555_v43, 1 }
 0x154   : > { %v4459_v11 = vsel %vm508_vm7, %v6548_v0, %v1173_v36  ;;  %v4467_v45 = vsel %vm508_vm7, %v1173_v36, %v6550_v35  ;;  %v1248_v56 = vrot.slane %v1242_v44, 5  ;;  %v6558_v35 = vld [vmem:[#allocation51_spill] sm:$0xff]  ;;  %v6561_v47 = vstv %s6402_s20  ;;  %s2972_s20 = sld [smem:[#allocation4 + $0x56]] }
 0x155   : > { %6549 = vst [vmem:[#allocation63_spill] sm:$0xff] %v4459_v11  ;;  %v4472_v20 = vsel %vm508_vm7, %v1198_v48, %v6551_v61  ;;  %v4477_v0 = vsel %vm508_vm7, %v6553_v55, %v1198_v48  ;;  %v6334_v11 = vrot.slane %v4452_v13, 1  ;;  %v4485_v36 = vsel %vm508_vm7, %v6556_v6, %v1223_v5  ;;  %v6563_v55 = vld [vmem:[#allocation52_spill] sm:$0xff]  ;;  %v6567_v13 = vld [vmem:[#allocation53_spill] sm:$0xff] }
 0x156   : > { %6554 = vst [vmem:[#allocation65_spill] sm:$0xff] %v4477_v0  ;;  %6557 = vst [vmem:[#allocation47_spill] sm:$0xff] %v4485_v36  ;;  %v1263_v61 = vmul.f32 %v6558_v35, %v3871_v27  ;;  %v4491_v26 = vmul.f32 %v6558_v35, %v4011_v40  ;;  %v1250_v6 = vrot.slane %v1243_v21, 5  ;;  %v4505_v44 = vmul.f32 %v6561_v47, %v3871_v27  ;;  %v6564_v35 = vld [vmem:[#allocation72_spill] sm:$0xff] }
 0x157   : > { %v4500_v48 = vsel %vm508_vm7, %v1223_v5, %v6334_v11  ;;  %v1309_v43 = vmul.f32 %v6563_v55, %v3871_v27  ;;  %v6565_v29 = vrot.slane %v6564_v35, 5  ;;  %v1334_v5 = vmul.f32 %v6567_v13, %v3871_v27  ;;  %612 = vrot.lane.b32.xlu1 %v4298_v46, %s6443_s13  ;;  %655 = vrot.lane.b32.xlu0 %v4076_v52, %s6476_s15  ;;  %v6577_v46 = vld [vmem:[#allocation76_spill] sm:$0xff] }
 0x158   : > { %6559 = vst [vmem:[#allocation68_spill] sm:$0xff] %v4491_v26  ;;  %6560 = vst [vmem:[#allocation48_spill] sm:$0xff] %v4500_v48  ;;  %v1269_v36 = vrot.slane %v1263_v61, 5  ;;  %v6335_v8 = vrot.slane %v4491_v26, 5  ;;  %v4518_v21 = vsel %vm484_vm8, %v1248_v56, %v1250_v6  ;;  %v6338_v47 = vrot.slane %v4505_v44, 6  ;;  %v6568_v61 = vld [vmem:[#allocation73_spill] sm:$0xff] }
 0x159   : > { %6562 = vst [vmem:[#allocation49_spill] sm:$0xff] %v4505_v44  ;;  %v4512_v63 = vsel %vm484_vm8, %v6565_v29, %v1248_v56  ;;  %v1315_v11 = vrot.slane %v1309_v43, 6  ;;  %v1310_v48 = vmul.f32 %v6563_v55, %v4011_v40  ;;  %v6569_v35 = vrot.slane %v6568_v61, 5  ;;  %v6571_v56 = vld [vmem:[#allocation54_spill] sm:$0xff]  ;;  %v6574_v61 = vld [vmem:[#allocation75_spill] sm:$0xff] }
 0x15a   : > { %6566 = vst [vmem:[#allocation50_spill] sm:$0xff] %v4512_v63  ;;  %v4526_v29 = vsel %vm484_vm8, %v1269_v36, %v6335_v8  ;;  %v1340_v0 = vrot.slane %v1334_v5, 2  ;;  %v1355_v6 = vmul.f32 %v6571_v56, %v3871_v27  ;;  %v6572_v55 = vld [vmem:[#allocation74_spill] sm:$0xff]  ;;  %v1335_v26 = vmul.f32 %v6567_v13, %v4011_v40 }
 0x15b   : > { %v4531_v63 = vsel %vm484_vm8, %v6569_v35, %v1269_v36  ;;  %v6573_v43 = vrot.slane %v6572_v55, 6  ;;  %v6575_v36 = vrot.slane %v6574_v61, 6  ;;  %v1317_v35 = vrot.slane %v1310_v48, 6  ;;  %633 = vrot.lane.b32.xlu1 %v4290_v15, %s6443_s13  ;;  %682 = vrot.lane.b32.xlu0 %v4308_v42, %s6476_s15 }
 0x15c   : > { %6570 = vst [vmem:[#allocation69_spill] sm:$0xff] %v4531_v63  ;;  %v6578_v63 = vrot.slane %v6577_v46, 2  ;;  %v1361_v44 = vrot.slane %v1355_v6, 2  ;;  %v4560_v55 = vmul.f32 %v6571_v56, %v4011_v40  ;;  %v1342_v48 = vrot.slane %v1335_v26, 2  ;;  %v6582_v46 = vld [vmem:[#allocation56_spill] sm:$0xff] }
 0x15d   : > { %v4544_v8 = vsel %vm649_vm4, %v6573_v43, %v6338_v47  ;;  %v4549_v5 = vsel %vm649_vm4, %v6575_v36, %v1315_v11  ;;  %v6580_v43 = vld [vmem:[#allocation55_spill] sm:$0xff]  ;;  %v4565_v36 = vsel %vm649_vm4, %v1315_v11, %v1317_v35  ;;  %v4581_v11 = vmul.f32 %v6582_v46, %v4011_v40 }
 0x15e   : > { %6576 = vst [vmem:[#allocation70_spill] sm:$0xff] %v4549_v5  ;;  %v4556_v52 = vsel %vm698_vm5, %v6578_v63, %v1340_v0  ;;  %v1380_v47 = vmul.f32 %v6580_v43, %v3871_v27  ;;  %v4569_v13 = vmul.f32 %v6580_v43, %v4011_v40  ;;  %v1405_v63 = vmul.f32 %v6582_v46, %v3871_v27  ;;  %v6585_v43 = vld [vmem:[#allocation57_spill] sm:$0xff] }
 0x15f   : > { %6579 = vst [vmem:[#allocation71_spill] sm:$0xff] %v4556_v52  ;;  %v6583_v52 = vld [vmem:[#allocation77_spill] sm:$0xff]  ;;  %v6339_v56 = vrot.slane %v4560_v55, 2  ;;  %v4588_v26 = vsel %vm698_vm5, %v1340_v0, %v1342_v48  ;;  %v6587_v46 = vrot.slane %v3931_v53, 2  ;;  %v1431_v0 = vmul.f32 %v6585_v43, %v4011_v40  ;;  %v6590_v53 = vld [vmem:[#allocation78_spill] sm:$0xff]  ;;  %680 = vrot.lane.b32.xlu1 %v4009_v41, %s6476_s15 }
 0x160   : > { %6581 = vst [vmem:[#allocation51_spill] sm:$0xff] %v4569_v13  ;;  %v6584_v6 = vrot.slane %v6583_v52, 2  ;;  %v1386_v5 = vrot.slane %v1380_v47, 2  ;;  %v1388_v35 = vrot.slane %v4569_v13, 2  ;;  %v1411_v52 = vrot.slane %v1405_v63, 2 }
 0x161   : > { %v4596_v47 = vsel %vm698_vm5, %v1361_v44, %v6339_v56  ;;  %v6589_v63 = vrot.slane %v3935_v28, 2  ;;  %v6592_v42 = vrot.slane %v4124_v54, 2  ;;  %v6597_v41 = vrot.slane %v4106_v9, 2 }
 0x162   : > { %v4576_v61 = vsel %vm698_vm5, %v6584_v6, %v1361_v44  ;;  %v1430_v6 = vmul.f32 %v6585_v43, %v3871_v27  ;;  %6586 = vst [vmem:[#allocation52_spill] sm:$0xff] %v4596_v47  ;;  %v4601_v15 = vsel %vm698_vm5, %v6587_v46, %v1386_v5  ;;  %v4609_v48 = vsel %vm698_vm5, %v1386_v5, %v1388_v35 }
 0x163   : > { %6588 = vst [vmem:[#allocation72_spill] sm:$0xff] %v4601_v15  ;;  %v4614_v44 = vsel %vm698_vm5, %v6589_v63, %v1411_v52  ;;  %v1435_v47 = vrot.slane %v6590_v53, 6  ;;  %v6591_v46 = vrot.slane %v4233_v33, 2  ;;  %v6593_v43 = vrot.slane %v4581_v11, 2  ;;  %v6595_v53 = vld [vmem:[#allocation30_spill] sm:$0xff] }
 0x164   : > { %v1436_v56 = vrot.slane %v1430_v6, 6  ;;  %v1438_v5 = vrot.slane %v1431_v0, 6  ;;  %v6594_v6 = vld [vmem:[#allocation58_spill] sm:$0xff]  ;;  %v721_v63 = vrot.slane %v4137_v2, 2 }
 0x165   : > { %v703_v15 = vsel %vm698_vm5, %v6592_v42, %v6591_v46  ;;  %v4625_v13 = vsel %vm698_vm5, %v1411_v52, %v6593_v43  ;;  %v699_v33 = vrot.slane %v6594_v6, 2  ;;  %v714_v42 = vmul.f32 %v3633_v10, %v6595_v53  ;;  %v6598_v10 = vld [vmem:[#allocation81_spill] sm:$0xff]  ;;  %v6603_v6 = vld [vmem:[#allocation80_spill] sm:$0xff] }
 0x166   : > { %706 = vrot.lane.b32.xlu0 %v703_v15, %s6476_s15  ;;  %v4631_v28 = vsel %vm649_vm4, %v1435_v47, %v1436_v56  ;;  %v4638_v46 = vsel %vm649_vm4, %v1436_v56, %v1438_v5  ;;  %v6596_v52 = vrot.slane %v4124_v54, 2  ;;  %v724_v15 = vsel %vm698_vm5, %v721_v63, %v6597_v41  ;;  %v6600_v56 = vld [vmem:[#allocation79_spill] sm:$0xff] }
 0x167   : > { %v720_v47 = vrot.slane %v714_v42, 2  ;;  %v6599_v54 = vrot.slane %v4087_v51, 2  ;;  %v6601_v43 = vrot.slane %v6600_v56, 2  ;;  %v6602_v5 = vrot.slane %v4141_v50, 2  ;;  %v6606_v42 = vld [vmem:[#allocation83_spill] sm:$0xff]  ;;  %v6607_v51 = vld [vmem:[#allocation84_spill] sm:$0xff] }
 0x168   : > { %v701_v0 = vsel %vm698_vm5, %v699_v33, %v6596_v52  ;;  %v6604_v33 = vrot.slane %v6603_v6, 2  ;;  %v6608_v50 = vrot.slane %v4001_v32, 7  ;;  %v6612_v32 = vld [vmem:[#allocation38_spill] sm:$0xff] }
 0x169   : > { %704 = vrot.lane.b32.xlu1 %v701_v0, %s6476_s15  ;;  %v722_v2 = vsel %vm698_vm5, %v720_v47, %v721_v63  ;;  %v749_v9 = vsel %vm698_vm5, %v6601_v43, %v6599_v54  ;;  %v6605_v63 = vld [vmem:[#allocation82_spill] sm:$0xff]  ;;  %v6609_v0 = vld [vmem:[#allocation32_spill] sm:$0xff]  ;;  %v6611_v47 = vrot.slane %v3780_v24, 7  ;;  %v6613_v24 = vrot.slane %v4189_v34, 3 }
 0x16a   : > { %727 = vrot.lane.b32.xlu0 %v724_v15, %s6476_s15  ;;  %v774_v52 = vsel %vm698_vm5, %v6604_v33, %v6602_v5  ;;  %v6610_v41 = vrot.slane %v6609_v0, 7  ;;  %v1032_v54 = vstv %s2935_s21  ;;  %s5205_s21 = sld [smem:[#allocation4 + $0x15]] }
 0x16b   : > { %v1034_v0 = vmul.f32 %v1032_v54, %v3871_v27 }
 0x16c   : > { %v817_v15 = vsel %vm814_vm6, %v6610_v41, %v6608_v50 }
 0x16d   : > { %725 = vrot.lane.b32.xlu1 %v722_v2, %s6476_s15 }
 0x16e   : > { %750 = vrot.lane.b32.xlu0 %v6598_v10, %s6476_s15 }
 0x171   : > { %752 = vrot.lane.b32.xlu1 %v749_v9, %s6476_s15  ;;  %v4740_v9 = vld [vmem:[#allocation2] sm:$0xff] }
 0x172   : > { %777 = vrot.lane.b32.xlu0 %v774_v52, %s6476_s15  ;;  %v1033_v6 = vmul.f32 %v4740_v9, %v1032_v54 }
 0x175   : > { %775 = vrot.lane.b32.xlu1 %v6605_v63, %s6476_s15 }
 0x176   : > { %800 = vrot.lane.b32.xlu0 %v6606_v42, %s6476_s15  ;;  %v1035_v42 = vmul.f32 %v1032_v54, %v4011_v40 }
 0x179   : > { %802 = vrot.lane.b32.xlu1 %v4168_v16, %s6476_s15  ;;  %v4703_v16 = vpop.permute.xlu0 %488 }
 0x17a   : > { %845 = vrot.lane.b32.xlu0 %v6607_v51, %s6390_s11 }
 0x17d   : > { %820 = vrot.lane.b32.xlu1 %v817_v15, %s6390_s11 }
 0x17e   : > { %868 = vrot.lane.b32.xlu0 %v6611_v47, %s6390_s11 }
 0x181   : > { %847 = vrot.lane.b32.xlu1 %v4171_v37, %s6390_s11  ;;  %v6614_v37 = vrot.slane %v4200_v12, 3  ;;  %v4716_v12 = vpop.permute.xlu1 %653 }
 0x182   : > { %872 = vrot.lane.b32.xlu0 %v4180_v49, %s6390_s11  ;;  %v978_v49 = vstv %s2932_s16  ;;  %s5195_s16 = sld [smem:[#allocation4 + $0x38]] }
 0x185   : > { %870 = vrot.lane.b32.xlu1 %v4185_v39, %s6390_s11  ;;  %v979_v39 = vmul.f32 %v978_v49, %v6595_v53 }
 0x186   : > { %896 = vrot.lane.b32.xlu0 %v4203_v1, %s6390_s11  ;;  %v4710_v1 = vpop.permute.xlu0 %678 }
 0x187   : > { %6615 = vst [vmem:[#allocation53_spill] sm:$0xff] %v4710_v1 }
 0x189   : > { %894 = vrot.lane.b32.xlu1 %v4194_v25, %s6390_s11  ;;  %v992_v25 = vstv %s2933_s19  ;;  %s2976_s19 = sld [smem:[#allocation4 + $0x42]] }
 0x18a   : > { %917 = vrot.lane.b32.xlu0 %v4228_v60, %s6390_s11  ;;  %v993_v34 = vmul.f32 %v992_v25, %v6595_v53  ;;  %v980_v60 = vmul.f32 %v978_v49, %v3871_v27  ;;  %v4728_v53 = vpop.permute.xlu1 %843 }
 0x18d   : > { %915 = vrot.lane.b32.xlu1 %v6612_v32, %s6390_s11 }
 0x18e   : > { %940 = vrot.lane.b32.xlu0 %v4238_v17, %s6390_s11  ;;  %v6616_v17 = vrot.slane %v4210_v59, 3  ;;  %v994_v59 = vmul.f32 %v992_v25, %v3871_v27 }
 0x191   : > { %919 = vrot.lane.b32.xlu1 %v6613_v24, %s6390_s11  ;;  %v6622_v24 = vld [vmem:[#allocation43_spill] sm:$0xff] }
 0x192   : > { %944 = vrot.lane.b32.xlu0 %v6614_v37, %s6390_s11 }
 0x195   : > { %942 = vrot.lane.b32.xlu1 %v4243_v57, %s6390_s11  ;;  %v4722_v57 = vpop.permute.xlu0 %818 }
 0x196   : > { %967 = vrot.lane.b32.xlu0 %v4253_v14, %s6390_s11  ;;  %6617 = vst [vmem:[#allocation73_spill] sm:$0xff] %v4722_v57  ;;  %v995_v14 = vmul.f32 %v992_v25, %v4011_v40  ;;  %v6626_v25 = vrot.slane %v6533_v4, 5  ;;  %v6632_v4 = vld [vmem:[#allocation67_spill] sm:$0xff] }
 0x199   : > { %965 = vrot.lane.b32.xlu1 %v4258_v7, %s6390_s11  ;;  %v1012_v7 = vstv %s2934_s9  ;;  %v4730_v2 = vpop.permute.xlu0 %492  ;;  %s2955_s9 = sld [smem:[#allocation4 + $0x3f]] }
 0x19a   : > { %983 = vrot.lane.b32.xlu0 %v979_v39, %s3262_s24  ;;  %v1014_v10 = vmul.f32 %v1012_v7, %v3871_v27  ;;  %v1013_v5 = vmul.f32 %v4740_v9, %v1012_v7  ;;  %v1015_v63 = vmul.f32 %v1012_v7, %v4011_v40  ;;  %v6621_v27 = vld [vmem:[#allocation44_spill] sm:$0xff] }
 0x19c   : > { %v4736_v56 = vpop.permute.xlu1 %539 }
 0x19d   : > { %969 = vrot.lane.b32.xlu1 %v6616_v17, %s6390_s11  ;;  %v4738_v43 = vpop.permute.xlu0 %564 }
 0x19e   : > { %999 = vrot.lane.b32.xlu0 %v993_v34, %s3262_s24 }
 0x1a0   : > { %v4746_v33 = vpop.permute.xlu1 %589 }
 0x1a1   : > { %985 = vrot.lane.b32.xlu1 %v980_v60, %s3262_s24  ;;  %v4748_v52 = vpop.permute.xlu0 %635 }
 0x1a2   : > { %1003 = vrot.lane.b32.xlu0 %v995_v14, %s3262_s24 }
 0x1a4   : > { %v4754_v51 = vpop.permute.xlu1 %657 }
 0x1a5   : > { %1001 = vrot.lane.b32.xlu1 %v994_v59, %s3262_s24 }
 0x1a6   : > { %1021 = vrot.lane.b32.xlu0 %v1014_v10, %s3262_s24  ;;  %v4756_v50 = vpop.permute.xlu0 %754  ;;  %v6638_v10 = vld [vmem:[#allocation47_spill] sm:$0xff] }
 0x1a9   : > { %1019 = vrot.lane.b32.xlu1 %v1013_v5, %s3262_s24 }
 0x1aa   : > { %1039 = vrot.lane.b32.xlu0 %v1033_v6, %s3262_s24  ;;  %v4762_v41 = vpop.permute.xlu1 %729  ;;  %v4764_v15 = vpop.permute.xlu0 %822  ;;  %v6640_v6 = vld [vmem:[#allocation64_spill] sm:$0xff] }
 0x1ab   : > { %6618 = vst [vmem:[#allocation54_spill] sm:$0xff] %v4762_v41  ;;  %6619 = vst [vmem:[#allocation76_spill] sm:$0xff] %v4764_v15 }
 0x1ad   : > { %1023 = vrot.lane.b32.xlu1 %v1015_v63, %s3262_s24 }
 0x1ae   : > { %1043 = vrot.lane.b32.xlu0 %v1035_v42, %s3262_s24 }
 0x1af   : > { %v4772_v47 = vpop.permute.xlu0 %516 }
 0x1b0   : > { %v4770_v40 = vpop.permute.xlu1 %779  ;;  %6620 = vst [vmem:[#allocation55_spill] sm:$0xff] %v4772_v47 }
 0x1b1   : > { %1041 = vrot.lane.b32.xlu1 %v1034_v0, %s3262_s24 }
 0x1b2   : > { %1066 = vrot.lane.b32.xlu0 %v4330_v58, %s3262_s24 }
 0x1b3   : > { %v4780_v32 = vpop.permute.xlu0 %537 }
 0x1b4   : > { %v4778_v58 = vpop.permute.xlu1 %490 }
 0x1b5   : > { %1064 = vrot.lane.b32.xlu1 %v4324_v23, %s3262_s24  ;;  %v6623_v23 = vrot.slane %v6622_v24, 4 }
 0x1b6   : > { %1087 = vrot.lane.b32.xlu0 %v4345_v30, %s3262_s24  ;;  %v6624_v30 = vrot.slane %v4353_v31, 4 }
 0x1b7   : > { %v4790_v49 = vpop.permute.xlu0 %560 }
 0x1b8   : > { %v4788_v37 = vpop.permute.xlu1 %514 }
 0x1b9   : > { %1085 = vrot.lane.b32.xlu1 %v6621_v27, %s3262_s24  ;;  %6625 = vst [vmem:[#allocation56_spill] sm:$0xff] %v4788_v37  ;;  %v6646_v27 = vld [vmem:[#allocation48_spill] sm:$0xff]  ;;  %v1653_v37 = vstv %s2964_s28  ;;  %s5245_s28 = sld [smem:[#allocation4 + $0x5b]] }
 0x1ba   : > { %1110 = vrot.lane.b32.xlu0 %v4378_v19, %s3262_s24 }
 0x1bb   : > { %v4798_v39 = vpop.permute.xlu0 %587 }
 0x1bc   : > { %v4796_v19 = vpop.permute.xlu1 %535 }
 0x1bd   : > { %1089 = vrot.lane.b32.xlu1 %v6623_v23, %s3262_s24 }
 0x1be   : > { %1114 = vrot.lane.b32.xlu0 %v6624_v30, %s3262_s24  ;;  %v6648_v30 = vld [vmem:[#allocation50_spill] sm:$0xff] }
 0x1c0   : > { %v4805_v31 = vpop.permute.xlu1 %562  ;;  %v4807_v34 = vpop.permute.xlu0 %610 }
 0x1c1   : > { %1112 = vrot.lane.b32.xlu1 %v4398_v38, %s3262_s24  ;;  %6627 = vst [vmem:[#allocation77_spill] sm:$0xff] %v4805_v31  ;;  %6628 = vst [vmem:[#allocation57_spill] sm:$0xff] %v4807_v34  ;;  %v6629_v38 = vrot.slane %v4371_v62, 5 }
 0x1c2   : > { %1133 = vrot.lane.b32.xlu0 %v4414_v18, %s3263_s23  ;;  %v6630_v18 = vld [vmem:[#allocation63_spill] sm:$0xff] }
 0x1c4   : > { %v4814_v17 = vpop.permute.xlu1 %585  ;;  %v4816_v60 = vpop.permute.xlu0 %631 }
 0x1c5   : > { %1131 = vrot.lane.b32.xlu1 %v6626_v25, %s3263_s23  ;;  %6631 = vst [vmem:[#allocation78_spill] sm:$0xff] %v4816_v60  ;;  %v6746_v60 = vld [vmem:[#allocation39_spill] sm:$0xff] }
 0x1c6   : > { %1156 = vrot.lane.b32.xlu0 %v4432_v22, %s3263_s23  ;;  %v6633_v22 = vrot.slane %v6632_v4, 1 }
 0x1c9   : > { %1135 = vrot.lane.b32.xlu1 %v6629_v38, %s3263_s23  ;;  %v4823_v14 = vpop.permute.xlu1 %612  ;;  %v4825_v7 = vpop.permute.xlu0 %655 }
 0x1ca   : > { %1177 = vrot.lane.b32.xlu0 %v6630_v18, %s3263_s23  ;;  %6634 = vst [vmem:[#allocation58_spill] sm:$0xff] %v4823_v14  ;;  %6635 = vst [vmem:[#allocation30_spill] sm:$0xff] %v4825_v7  ;;  %v6650_v18 = vld [vmem:[#allocation69_spill] sm:$0xff] }
 0x1cd   : > { %1158 = vrot.lane.b32.xlu1 %v4462_v3, %s3263_s23  ;;  %v4831_v62 = vpop.permute.xlu1 %633  ;;  %v4833_v59 = vpop.permute.xlu0 %682  ;;  %v6637_v3 = vld [vmem:[#allocation65_spill] sm:$0xff] }
 0x1ce   : > { %1181 = vrot.lane.b32.xlu0 %v6633_v22, %s3263_s23  ;;  %6636 = vst [vmem:[#allocation81_spill] sm:$0xff] %v4831_v62 }
 0x1d1   : > { %1179 = vrot.lane.b32.xlu1 %v4467_v45, %s3263_s23  ;;  %v4839_v54 = vpop.permute.xlu1 %680  ;;  %v6641_v45 = vrot.slane %v6640_v6, 1 }
 0x1d2   : > { %1204 = vrot.lane.b32.xlu0 %v4472_v20, %s3263_s23  ;;  %v6642_v20 = vld [vmem:[#allocation66_spill] sm:$0xff] }
 0x1d3   : > { %v6643_v63 = vrot.slane %v6642_v20, 1 }
 0x1d5   : > { %1202 = vrot.lane.b32.xlu1 %v6637_v3, %s3263_s23 }
 0x1d6   : > { %1227 = vrot.lane.b32.xlu0 %v6638_v10, %s3263_s23  ;;  %v6655_v10 = vld [vmem:[#allocation68_spill] sm:$0xff] }
 0x1d7   : > { %v6656_v6 = vrot.slane %v6655_v10, 5  ;;  %v6666_v10 = vld [vmem:[#allocation71_spill] sm:$0xff] }
 0x1d8   : > { %v4841_v5 = vpop.permute.xlu0 %706 }
 0x1d9   : > { %6639 = vst [vmem:[#allocation79_spill] sm:$0xff] %v4841_v5  ;;  %1206 = vrot.lane.b32.xlu1 %v6641_v45, %s3263_s23 }
 0x1da   : > { %1231 = vrot.lane.b32.xlu0 %v6643_v63, %s3263_s23 }
 0x1db   : > { %v4849_v42 = vpop.permute.xlu1 %704 }
 0x1dc   : > { %6644 = vst [vmem:[#allocation80_spill] sm:$0xff] %v4849_v42  ;;  %v4851_v0 = vpop.permute.xlu0 %727 }
 0x1dd   : > { %6645 = vst [vmem:[#allocation82_spill] sm:$0xff] %v4851_v0  ;;  %1229 = vrot.lane.b32.xlu1 %v6646_v27, %s3263_s23  ;;  %v6661_v27 = vld [vmem:[#allocation70_spill] sm:$0xff] }
 0x1de   : > { %1254 = vrot.lane.b32.xlu0 %v4518_v21, %s3263_s23  ;;  %v6651_v21 = vld [vmem:[#allocation74_spill] sm:$0xff] }
 0x1df   : > { %v4857_v24 = vpop.permute.xlu1 %725  ;;  %v6652_v4 = vrot.slane %v6651_v21, 6  ;;  %v6664_v21 = vld [vmem:[#allocation75_spill] sm:$0xff] }
 0x1e0   : > { %6647 = vst [vmem:[#allocation83_spill] sm:$0xff] %v4857_v24  ;;  %v4859_v23 = vpop.permute.xlu0 %750 }
 0x1e1   : > { %1252 = vrot.lane.b32.xlu1 %v6648_v30, %s3263_s23 }
 0x1e2   : > { %1275 = vrot.lane.b32.xlu0 %v4526_v29, %s3263_s23  ;;  %v6657_v29 = vld [vmem:[#allocation49_spill] sm:$0xff] }
 0x1e3   : > { %v4865_v25 = vpop.permute.xlu1 %752  ;;  %v6658_v45 = vrot.slane %v6657_v29, 6 }
 0x1e4   : > { %6649 = vst [vmem:[#allocation84_spill] sm:$0xff] %v4865_v25  ;;  %v4867_v38 = vpop.permute.xlu0 %777 }
 0x1e5   : > { %1273 = vrot.lane.b32.xlu1 %v6650_v18, %s3263_s23 }
 0x1e6   : > { %1294 = vrot.lane.b32.xlu0 %v6652_v4, %s3264_s5  ;;  %v6665_v4 = vrot.slane %v6664_v21, 6 }
 0x1e7   : > { %v4874_v22 = vpop.permute.xlu1 %775 }
 0x1e8   : > { %6653 = vst [vmem:[#allocation32_spill] sm:$0xff] %v4874_v22  ;;  %v4876_v3 = vpop.permute.xlu0 %800 }
 0x1e9   : > { %6654 = vst [vmem:[#allocation38_spill] sm:$0xff] %v4876_v3  ;;  %1277 = vrot.lane.b32.xlu1 %v6656_v6, %s3263_s23 }
 0x1ea   : > { %1298 = vrot.lane.b32.xlu0 %v6658_v45, %s3264_s5 }
 0x1eb   : > { %v4884_v20 = vpop.permute.xlu1 %802 }
 0x1ec   : > { %6659 = vst [vmem:[#allocation44_spill] sm:$0xff] %v4884_v20  ;;  %v4886_v63 = vpop.permute.xlu0 %845 }
 0x1ed   : > { %6660 = vst [vmem:[#allocation43_spill] sm:$0xff] %v4886_v63  ;;  %1296 = vrot.lane.b32.xlu1 %v4544_v8, %s3264_s5 }
 0x1ee   : > { %1321 = vrot.lane.b32.xlu0 %v6661_v27, %s3264_s5  ;;  %v6670_v27 = vrot.slane %v4560_v55, 2 }
 0x1ef   : > { %v4892_v30 = vpop.permute.xlu1 %820 }
 0x1f0   : > { %6662 = vst [vmem:[#allocation63_spill] sm:$0xff] %v4892_v30  ;;  %v4894_v18 = vpop.permute.xlu0 %868 }
 0x1f1   : > { %6663 = vst [vmem:[#allocation67_spill] sm:$0xff] %v4894_v18  ;;  %1319 = vrot.lane.b32.xlu1 %v6665_v4, %s3264_s5  ;;  %v1724_v18 = vstv %s5009_s10  ;;  %s5399_s10 = sld [smem:[#allocation4 + $0x4b]] }
 0x1f2   : > { %1344 = vrot.lane.b32.xlu0 %v6666_v10, %s3264_s5 }
 0x1f3   : > { %v4901_v6 = vpop.permute.xlu1 %847 }
 0x1f4   : > { %6667 = vst [vmem:[#allocation65_spill] sm:$0xff] %v4901_v6  ;;  %v4903_v29 = vpop.permute.xlu0 %872 }
 0x1f5   : > { %6668 = vst [vmem:[#allocation47_spill] sm:$0xff] %v4903_v29  ;;  %1323 = vrot.lane.b32.xlu1 %v4565_v36, %s3264_s5  ;;  %v6673_v36 = vld [vmem:[#allocation52_spill] sm:$0xff]  ;;  %v6745_v29 = vld [vmem:[#allocation42_spill] sm:$0xff] }
 0x1f6   : > { %1365 = vrot.lane.b32.xlu0 %v4576_v61, %s3264_s5 }
 0x1f7   : > { %v4909_v8 = vpop.permute.xlu1 %870 }
 0x1f8   : > { %v4911_v45 = vpop.permute.xlu0 %896 }
 0x1f9   : > { %6669 = vst [vmem:[#allocation64_spill] sm:$0xff] %v4911_v45  ;;  %1346 = vrot.lane.b32.xlu1 %v4588_v26, %s3264_s5  ;;  %v6676_v26 = vld [vmem:[#allocation72_spill] sm:$0xff] }
 0x1fa   : > { %1369 = vrot.lane.b32.xlu0 %v6670_v27, %s3264_s5 }
 0x1fb   : > { %v4918_v21 = vpop.permute.xlu1 %894 }
 0x1fc   : > { %6671 = vst [vmem:[#allocation66_spill] sm:$0xff] %v4918_v21  ;;  %v4920_v4 = vpop.permute.xlu0 %917 }
 0x1fd   : > { %6672 = vst [vmem:[#allocation48_spill] sm:$0xff] %v4920_v4  ;;  %1367 = vrot.lane.b32.xlu1 %v6673_v36, %s3264_s5  ;;  %v1579_v36 = vstv %s2960_s6  ;;  %s2987_s6 = sld [smem:[#allocation4 + $0x5f]] }
 0x1fe   : > { %1392 = vrot.lane.b32.xlu0 %v4609_v48, %s3264_s5  ;;  %v6680_v48 = vrot.slane %v4581_v11, 2 }
 0x1ff   : > { %v4926_v61 = vpop.permute.xlu1 %915 }
 0x200   : > { %6674 = vst [vmem:[#allocation50_spill] sm:$0xff] %v4926_v61  ;;  %v4928_v10 = vpop.permute.xlu0 %940 }
 0x201   : > { %6675 = vst [vmem:[#allocation69_spill] sm:$0xff] %v4928_v10  ;;  %1390 = vrot.lane.b32.xlu1 %v6676_v26, %s3264_s5 }
 0x202   : > { %1415 = vrot.lane.b32.xlu0 %v4614_v44, %s3264_s5  ;;  %v4952_v44 = vld [vmem:[#allocation2 + $0x20] sm:$0xff] }
 0x203   : > { %v4934_v55 = vpop.permute.xlu1 %919  ;;  %v1581_v11 = vmul.f32 %v1579_v36, %v4952_v44  ;;  %v1655_v47 = vmul.f32 %v1653_v37, %v4952_v44 }
 0x204   : > { %6677 = vst [vmem:[#allocation74_spill] sm:$0xff] %v4934_v55  ;;  %v4936_v27 = vpop.permute.xlu0 %944 }
 0x205   : > { %6678 = vst [vmem:[#allocation68_spill] sm:$0xff] %v4936_v27  ;;  %1394 = vrot.lane.b32.xlu1 %v1388_v35, %s3264_s5  ;;  %v1661_v61 = vrot.slane %v1655_v47, 4 }
 0x206   : > { %1419 = vrot.lane.b32.xlu0 %v6680_v48, %s3264_s5  ;;  %v4959_v48 = vld [vmem:[#allocation2 + $0x18] sm:$0xff] }
 0x207   : > { %v4944_v21 = vpop.permute.xlu1 %942  ;;  %v1580_v42 = vmul.f32 %v1579_v36, %v4959_v48  ;;  %v4980_v36 = vld [vmem:[#allocation2 + $0x28] sm:$0x3f] }
 0x208   : > { %6681 = vst [vmem:[#allocation49_spill] sm:$0xff] %v4944_v21  ;;  %v4946_v26 = vpop.permute.xlu0 %967  ;;  %v1656_v47 = vmul.f32 %v1653_v37, %v4980_v36 }
 0x209   : > { %1417 = vrot.lane.b32.xlu1 %v4625_v13, %s3264_s5  ;;  %v1593_v13 = vstv %s2961_s26  ;;  %s5215_s26 = sld [smem:[#allocation4 + $0x4d]] }
 0x20a   : > { %1442 = vrot.lane.b32.xlu0 %v4638_v46, %s3264_s5  ;;  %v1595_v20 = vmul.f32 %v1593_v13, %v4952_v44 }
 0x20b   : > { %v4954_v35 = vpop.permute.xlu1 %965 }
 0x20c   : > { %6682 = vst [vmem:[#allocation70_spill] sm:$0xff] %v4954_v35  ;;  %v4956_v3 = vpop.permute.xlu0 %983 }
 0x20d   : > { %6683 = vst [vmem:[#allocation75_spill] sm:$0xff] %v4956_v3  ;;  %1440 = vrot.lane.b32.xlu1 %v4631_v28, %s3264_s5  ;;  %v1613_v3 = vstv %s2962_s27  ;;  %s5226_s27 = sld [smem:[#allocation4 + $0x3c]] }
 0x20e   : > { %1586 = vrot.lane.b32.xlu0 %v1581_v11, %s6443_s13  ;;  %v1594_v11 = vmul.f32 %v1593_v13, %v4959_v48  ;;  %v1614_v34 = vmul.f32 %v1613_v3, %v4959_v48  ;;  %v1615_v55 = vmul.f32 %v1613_v3, %v4952_v44 }
 0x20f   : > { %v4964_v45 = vpop.permute.xlu1 %969 }
 0x210   : > { %6684 = vst [vmem:[#allocation71_spill] sm:$0xff] %v4964_v45  ;;  %v4966_v46 = vpop.permute.xlu0 %999 }
 0x211   : > { %6685 = vst [vmem:[#allocation52_spill] sm:$0xff] %v4966_v46  ;;  %1584 = vrot.lane.b32.xlu1 %v1580_v42, %s6443_s13 }
 0x212   : > { %1602 = vrot.lane.b32.xlu0 %v1595_v20, %s6443_s13  ;;  %v1596_v20 = vmul.f32 %v1593_v13, %v4980_v36 }
 0x213   : > { %v4972_v5 = vpop.permute.xlu1 %985 }
 0x214   : > { %6686 = vst [vmem:[#allocation72_spill] sm:$0xff] %v4972_v5  ;;  %v4974_v28 = vpop.permute.xlu0 %1003  ;;  %v1616_v5 = vmul.f32 %v1613_v3, %v4980_v36 }
 0x215   : > { %6687 = vst [vmem:[#allocation51_spill] sm:$0xff] %v4974_v28  ;;  %1600 = vrot.lane.b32.xlu1 %v1594_v11, %s6443_s13  ;;  %v1633_v11 = vstv %s2963_s29  ;;  %s5276_s29 = sld [smem:[#allocation4 + $0x51]] }
 0x216   : > { %1620 = vrot.lane.b32.xlu0 %v1614_v34, %s6443_s13  ;;  %v1654_v34 = vmul.f32 %v1653_v37, %v4959_v48  ;;  %v1635_v13 = vmul.f32 %v1633_v11, %v4952_v44  ;;  %v1634_v3 = vmul.f32 %v1633_v11, %v4959_v48  ;;  %v1663_v37 = vrot.slane %v1656_v47, 4 }
 0x217   : > { %v4982_v14 = vpop.permute.xlu1 %1001 }
 0x218   : > { %6688 = vst [vmem:[#allocation85_spill] sm:$0xff] %v4982_v14  ;;  %v4984_v42 = vpop.permute.xlu0 %1021 }
 0x219   : > { %6689 = vst [vmem:[#allocation86_spill] sm:$0xff] %v4984_v42  ;;  %1604 = vrot.lane.b32.xlu1 %v1596_v20, %s6443_s13  ;;  %v1674_v42 = vstv %s2965_s30  ;;  %s5285_s30 = sld [smem:[#allocation4 + $0x5e]] }
 0x21a   : > { %1624 = vrot.lane.b32.xlu0 %v1616_v5, %s6443_s13  ;;  %v1676_v14 = vmul.f32 %v1674_v42, %v4952_v44  ;;  %v1660_v5 = vrot.slane %v1654_v34, 4  ;;  %v1675_v20 = vmul.f32 %v1674_v42, %v4959_v48  ;;  %v1677_v15 = vmul.f32 %v1674_v42, %v4980_v36 }
 0x21b   : > { %v4992_v28 = vpop.permute.xlu1 %1019  ;;  %v1664_v42 = vsel %vm216_vm0, %v1661_v61, %v1663_v37 }
 0x21c   : > { %6690 = vst [vmem:[#allocation87_spill] sm:$0xff] %v4992_v28  ;;  %v4994_v46 = vpop.permute.xlu0 %1039  ;;  %v1682_v57 = vrot.slane %v1676_v14, 4 }
 0x21d   : > { %6691 = vst [vmem:[#allocation88_spill] sm:$0xff] %v4994_v46  ;;  %1622 = vrot.lane.b32.xlu1 %v1615_v55, %s6443_s13  ;;  %v1662_v46 = vsel %vm216_vm0, %v1660_v5, %v1661_v61  ;;  %v1681_v55 = vrot.slane %v1675_v20, 4  ;;  %v1699_v5 = vstv %s2966_s4  ;;  %s5382_s4 = sld [smem:[#allocation4 + $0x58]] }
 0x21e   : > { %1642 = vrot.lane.b32.xlu0 %v1635_v13, %s6443_s13  ;;  %v1702_v4 = vmul.f32 %v1699_v5, %v4980_v36 }
 0x21f   : > { %v5002_v35 = vpop.permute.xlu1 %1023  ;;  %v1683_v14 = vsel %vm216_vm0, %v1681_v55, %v1682_v57 }
 0x220   : > { %6692 = vst [vmem:[#allocation89_spill] sm:$0xff] %v5002_v35  ;;  %v5004_v21 = vpop.permute.xlu0 %1043  ;;  %v1636_v35 = vmul.f32 %v1633_v11, %v4980_v36  ;;  %v1709_v11 = vrot.slane %v1702_v4, 4 }
 0x221   : > { %6693 = vst [vmem:[#allocation90_spill] sm:$0xff] %v5004_v21  ;;  %1640 = vrot.lane.b32.xlu1 %v1634_v3, %s6443_s13 }
 0x222   : > { %1665 = vrot.lane.b32.xlu0 %v1662_v46, %s6443_s13  ;;  %v1701_v46 = vmul.f32 %v1699_v5, %v4952_v44 }
 0x223   : > { %v5013_v34 = vpop.permute.xlu1 %1041 }
 0x224   : > { %v5015_v13 = vpop.permute.xlu0 %1066  ;;  %v1707_v47 = vrot.slane %v1701_v46, 4 }
 0x225   : > { %6694 = vst [vmem:[#allocation91_spill] sm:$0xff] %v5015_v13  ;;  %1644 = vrot.lane.b32.xlu1 %v1636_v35, %s6443_s13  ;;  %v1684_v13 = vrot.slane %v1677_v15, 4  ;;  %v1700_v35 = vmul.f32 %v1699_v5, %v4959_v48 }
 0x226   : > { %1686 = vrot.lane.b32.xlu0 %v1683_v14, %s6443_s13  ;;  %v1710_v61 = vsel %vm216_vm0, %v1707_v47, %v1709_v11 }
 0x227   : > { %v5024_v20 = vpop.permute.xlu1 %1064  ;;  %v1685_v15 = vsel %vm216_vm0, %v1682_v57, %v1684_v13  ;;  %v1706_v4 = vrot.slane %v1700_v35, 4 }
 0x228   : > { %6695 = vst [vmem:[#allocation92_spill] sm:$0xff] %v5024_v20  ;;  %v5026_v3 = vpop.permute.xlu0 %1087  ;;  %v1725_v20 = vmul.f32 %v1724_v18, %v4959_v48 }
 0x229   : > { %6696 = vst [vmem:[#allocation93_spill] sm:$0xff] %v5026_v3  ;;  %1667 = vrot.lane.b32.xlu1 %v1664_v42, %s6443_s13  ;;  %v1726_v42 = vmul.f32 %v1724_v18, %v4952_v44  ;;  %v1708_v3 = vsel %vm216_vm0, %v1706_v4, %v1707_v47 }
 0x22a   : > { %1690 = vrot.lane.b32.xlu0 %v1684_v13, %s6443_s13  ;;  %v1729_v5 = vrot.slane %v1725_v20, 5  ;;  %v1766_v20 = vstv %s2969_s17  ;;  %s5420_s17 = sld [smem:[#allocation4 + $0x3d]] }
 0x22b   : > { %v5033_v55 = vpop.permute.xlu1 %1085  ;;  %v1769_v18 = vmul.f32 %v1766_v20, %v4980_v36  ;;  %v1768_v4 = vmul.f32 %v1766_v20, %v4952_v44  ;;  %v1767_v21 = vmul.f32 %v1766_v20, %v4959_v48 }
 0x22c   : > { %6697 = vst [vmem:[#allocation94_spill] sm:$0xff] %v5033_v55  ;;  %v5035_v14 = vpop.permute.xlu0 %1110  ;;  %v1745_v55 = vstv %s2968_s8  ;;  %s5408_s8 = sld [smem:[#allocation4 + $0x4a]] }
 0x22d   : > { %6698 = vst [vmem:[#allocation95_spill] sm:$0xff] %v5035_v14  ;;  %1688 = vrot.lane.b32.xlu1 %v1685_v15, %s6443_s13  ;;  %v1748_v57 = vmul.f32 %v1745_v55, %v4980_v36  ;;  %v1747_v13 = vmul.f32 %v1745_v55, %v4952_v44  ;;  %v1776_v14 = vrot.slane %v1769_v18, 1  ;;  %v1773_v18 = vrot.slane %v1767_v21, 1 }
 0x22e   : > { %1713 = vrot.lane.b32.xlu0 %v1710_v61, %s6443_s13  ;;  %v1730_v61 = vrot.slane %v1726_v42, 5 }
 0x22f   : > { %v5042_v37 = vpop.permute.xlu1 %1089  ;;  %v1753_v47 = vrot.slane %v1747_v13, 1  ;;  %v1774_v13 = vrot.slane %v1768_v4, 1 }
 0x230   : > { %6699 = vst [vmem:[#allocation96_spill] sm:$0xff] %v5042_v37  ;;  %v5044_v46 = vpop.permute.xlu0 %1114  ;;  %v1755_v37 = vrot.slane %v1748_v57, 1  ;;  %v1731_v42 = vsel %vm484_vm8, %v1729_v5, %v1730_v61 }
 0x231   : > { %6700 = vst [vmem:[#allocation97_spill] sm:$0xff] %v5044_v46  ;;  %1711 = vrot.lane.b32.xlu1 %v1708_v3, %s6443_s13  ;;  %v1746_v3 = vmul.f32 %v1745_v55, %v4959_v48 }
 0x232   : > { %1732 = vrot.lane.b32.xlu0 %v1729_v5, %s6476_s15  ;;  %v1756_v57 = vsel %vm508_vm7, %v1753_v47, %v1755_v37  ;;  %v1777_v5 = vsel %vm508_vm7, %v1774_v13, %v1776_v14 }
 0x233   : > { %v5052_v35 = vpop.permute.xlu1 %1112  ;;  %v1752_v55 = vrot.slane %v1746_v3, 1 }
 0x234   : > { %6701 = vst [vmem:[#allocation98_spill] sm:$0xff] %v5052_v35  ;;  %v5054_v15 = vpop.permute.xlu0 %1133  ;;  %v1816_v35 = vstv %s2971_s22  ;;  %s5437_s22 = sld [smem:[#allocation4 + $0x37]] }
 0x235   : > { %1715 = vrot.lane.b32.xlu1 %v1709_v11, %s6443_s13  ;;  %v1819_v11 = vmul.f32 %v1816_v35, %v4980_v36  ;;  %v1754_v37 = vsel %vm508_vm7, %v1752_v55, %v1753_v47  ;;  %v1817_v20 = vmul.f32 %v1816_v35, %v4959_v48  ;;  %s5186_s13 = sld [smem:[#allocation4 + $0x35]] }
 0x236   : > { %1736 = vrot.lane.b32.xlu0 %v1730_v61, %s6476_s15 }
 0x237   : > { %v5061_v46 = vpop.permute.xlu1 %1131  ;;  %v1826_v61 = vrot.slane %v1819_v11, 1  ;;  %v1823_v11 = vrot.slane %v1817_v20, 1 }
 0x238   : > { %6702 = vst [vmem:[#allocation99_spill] sm:$0xff] %v5061_v46  ;;  %v5063_v63 = vpop.permute.xlu0 %1156  ;;  %v1818_v46 = vmul.f32 %v1816_v35, %v4952_v44 }
 0x239   : > { %6703 = vst [vmem:[#allocation100_spill] sm:$0xff] %v5063_v63  ;;  %1734 = vrot.lane.b32.xlu1 %v1731_v42, %s6476_s15 }
 0x23a   : > { %1759 = vrot.lane.b32.xlu0 %v1756_v57, %s6476_s15  ;;  %v1824_v3 = vrot.slane %v1818_v46, 1  ;;  %v1908_v57 = vstv %s2975_s18  ;;  %s5445_s18 = sld [smem:[#allocation4 + $0x44]] }
 0x23b   : > { %v5072_v63 = vpop.permute.xlu1 %1135  ;;  %v1910_v55 = vmul.f32 %v1908_v57, %v4952_v44  ;;  %v1909_v21 = vmul.f32 %v1908_v57, %v4959_v48 }
 0x23c   : > { %6704 = vst [vmem:[#allocation101_spill] sm:$0xff] %v5072_v63  ;;  %v5074_v27 = vpop.permute.xlu0 %1177  ;;  %v1827_v47 = vsel %vm508_vm7, %v1824_v3, %v1826_v61  ;;  %v1887_v63 = vstv %s2974_s2  ;;  %s5713_s2 = sld [smem:[#allocation4 + $0x46]] }
 0x23d   : > { %6705 = vst [vmem:[#allocation102_spill] sm:$0xff] %v5074_v27  ;;  %1757 = vrot.lane.b32.xlu1 %v1754_v37, %s6476_s15  ;;  %v1775_v27 = vsel %vm508_vm7, %v1773_v18, %v1774_v13  ;;  %v1791_v37 = vstv %s2970_s25  ;;  %v1916_v13 = vrot.slane %v1910_v55, 6  ;;  %s5451_s25 = sld [smem:[#allocation4 + $0x59]] }
 0x23e   : > { %1780 = vrot.lane.b32.xlu0 %v1777_v5, %s6476_s15  ;;  %v1825_v5 = vsel %vm508_vm7, %v1823_v11, %v1824_v3  ;;  %v1793_v18 = vmul.f32 %v1791_v37, %v4952_v44  ;;  %v1792_v20 = vmul.f32 %v1791_v37, %v4959_v48  ;;  %v1911_v3 = vmul.f32 %v1908_v57, %v4980_v36 }
 0x23f   : > { %v5081_v4 = vpop.permute.xlu1 %1158 }
 0x240   : > { %6706 = vst [vmem:[#allocation103_spill] sm:$0xff] %v5081_v4  ;;  %v5083_v42 = vpop.permute.xlu0 %1181  ;;  %v1798_v55 = vrot.slane %v1792_v20, 1  ;;  %v2004_v20 = vstv %s2979_s1  ;;  %s5508_s1 = sld [smem:[#allocation4 + $0x53]] }
 0x241   : > { %6707 = vst [vmem:[#allocation104_spill] sm:$0xff] %v5083_v42  ;;  %1778 = vrot.lane.b32.xlu1 %v1775_v27, %s6476_s15  ;;  %v1915_v27 = vrot.slane %v1909_v21, 6  ;;  %v1794_v21 = vmul.f32 %v1791_v37, %v4980_v36 }
 0x242   : > { %1830 = vrot.lane.b32.xlu0 %v1827_v47, %s6476_s15 }
 0x243   : > { %v5091_v46 = vpop.permute.xlu1 %1179  ;;  %v1917_v42 = vsel %vm649_vm4, %v1915_v27, %v1916_v13 }
 0x244   : > { %6708 = vst [vmem:[#allocation105_spill] sm:$0xff] %v5091_v46  ;;  %v5093_v35 = vpop.permute.xlu0 %1204  ;;  %v1918_v46 = vrot.slane %v1911_v3, 6  ;;  %v2006_v3 = vmul.f32 %v2004_v20, %v4952_v44 }
 0x245   : > { %6709 = vst [vmem:[#allocation106_spill] sm:$0xff] %v5093_v35  ;;  %1828 = vrot.lane.b32.xlu1 %v1825_v5, %s6476_s15  ;;  %v1799_v35 = vrot.slane %v1793_v18, 1  ;;  %v1862_v5 = vstv %s2973_s0  ;;  %v1801_v18 = vrot.slane %v1794_v21, 1  ;;  %s5486_s0 = sld [smem:[#allocation4 + $0x36]] }
 0x246   : > { %1782 = vrot.lane.b32.xlu0 %v1776_v14, %s6476_s15  ;;  %v1919_v37 = vsel %vm649_vm4, %v1916_v13, %v1918_v46  ;;  %v2012_v13 = vrot.slane %v2006_v3, 2  ;;  %v1888_v3 = vmul.f32 %v1887_v63, %v4959_v48 }
 0x247   : > { %v5100_v47 = vpop.permute.xlu1 %1202  ;;  %v1802_v21 = vsel %vm508_vm7, %v1799_v35, %v1801_v18 }
 0x248   : > { %6710 = vst [vmem:[#allocation107_spill] sm:$0xff] %v5100_v47  ;;  %v5102_v4 = vpop.permute.xlu0 %1227  ;;  %v1865_v47 = vmul.f32 %v1862_v5, %v4980_v36 }
 0x249   : > { %6711 = vst [vmem:[#allocation108_spill] sm:$0xff] %v5102_v4  ;;  %1832 = vrot.lane.b32.xlu1 %v1826_v61, %s6476_s15  ;;  %v1800_v4 = vsel %vm508_vm7, %v1798_v55, %v1799_v35  ;;  %v1864_v61 = vmul.f32 %v1862_v5, %v4952_v44  ;;  %v2005_v55 = vmul.f32 %v2004_v20, %v4959_v48 }
 0x24a   : > { %1922 = vrot.lane.b32.xlu0 %v1917_v42, %s6390_s11 }
 0x24b   : > { %v5108_v11 = vpop.permute.xlu1 %1206 }
 0x24c   : > { %6712 = vst [vmem:[#allocation109_spill] sm:$0xff] %v5108_v11  ;;  %v5110_v14 = vpop.permute.xlu0 %1231  ;;  %v1872_v11 = vrot.slane %v1865_v47, 5 }
 0x24d   : > { %6713 = vst [vmem:[#allocation110_spill] sm:$0xff] %v5110_v14  ;;  %1920 = vrot.lane.b32.xlu1 %v1915_v27, %s6390_s11  ;;  %v1870_v27 = vrot.slane %v1864_v61, 5  ;;  %v2011_v61 = vrot.slane %v2005_v55, 2 }
 0x24e   : > { %1803 = vrot.lane.b32.xlu0 %v1800_v4, %s6476_s15  ;;  %v1863_v4 = vmul.f32 %v1862_v5, %v4959_v48 }
 0x24f   : > { %v5118_v42 = vpop.permute.xlu1 %1229  ;;  %v1873_v46 = vsel %vm484_vm8, %v1870_v27, %v1872_v11  ;;  %v2013_v35 = vsel %vm698_vm5, %v2011_v61, %v2012_v13 }
 0x250   : > { %6714 = vst [vmem:[#allocation111_spill] sm:$0xff] %v5118_v42  ;;  %v5120_v57 = vpop.permute.xlu0 %1254  ;;  %v1869_v47 = vrot.slane %v1863_v4, 5  ;;  %v3113_v42 = vld [vmem:[#allocation2 + $0x10] sm:$0x3f] }
 0x251   : > { %6715 = vst [vmem:[#allocation112_spill] sm:$0xff] %v5120_v57  ;;  %1924 = vrot.lane.b32.xlu1 %v1919_v37, %s6390_s11 }
 0x252   : > { %1807 = vrot.lane.b32.xlu0 %v1801_v18, %s6476_s15  ;;  %v1889_v18 = vmul.f32 %v1887_v63, %v4952_v44 }
 0x253   : > { %v5128_v14 = vpop.permute.xlu1 %1252 }
 0x254   : > { %6716 = vst [vmem:[#allocation113_spill] sm:$0xff] %v5128_v14  ;;  %v5130_v57 = vpop.permute.xlu0 %1275  ;;  %v2007_v14 = vmul.f32 %v2004_v20, %v4980_v36  ;;  %v1893_v20 = vrot.slane %v1889_v18, 6 }
 0x255   : > { %6717 = vst [vmem:[#allocation114_spill] sm:$0xff] %v5130_v57  ;;  %1805 = vrot.lane.b32.xlu1 %v1802_v21, %s6476_s15  ;;  %v1871_v57 = vsel %vm484_vm8, %v1869_v47, %v1870_v27  ;;  %v1892_v47 = vrot.slane %v1888_v3, 6 }
 0x256   : > { %1876 = vrot.lane.b32.xlu0 %v1873_v46, %s6476_s15  ;;  %v2014_v21 = vrot.slane %v2007_v14, 2  ;;  %v1954_v46 = vstv %s2977_s7  ;;  %s5859_s7 = sld [smem:[#allocation4 + $0x52]] }
 0x257   : > { %v5136_v37 = vpop.permute.xlu1 %1273  ;;  %v1956_v27 = vmul.f32 %v1954_v46, %v4952_v44  ;;  %v1894_v14 = vsel %vm649_vm4, %v1892_v47, %v1893_v20 }
 0x258   : > { %6718 = vst [vmem:[#allocation115_spill] sm:$0xff] %v5136_v37  ;;  %v5138_v5 = vpop.permute.xlu0 %1294  ;;  %v1957_v37 = vmul.f32 %v1954_v46, %v4980_v36 }
 0x259   : > { %6719 = vst [vmem:[#allocation116_spill] sm:$0xff] %v5138_v5  ;;  %1874 = vrot.lane.b32.xlu1 %v1871_v57, %s6476_s15  ;;  %v1955_v57 = vmul.f32 %v1954_v46, %v4959_v48 }
 0x25a   : > { %2016 = vrot.lane.b32.xlu0 %v2013_v35, %s6390_s11  ;;  %v2015_v35 = vsel %vm698_vm5, %v2012_v13, %v2014_v21 }
 0x25b   : > { %v5147_v4 = vpop.permute.xlu1 %1277 }
 0x25c   : > { %6720 = vst [vmem:[#allocation117_spill] sm:$0xff] %v5147_v4  ;;  %v5149_v55 = vpop.permute.xlu0 %1298  ;;  %v1962_v4 = vrot.slane %v1956_v27, 2 }
 0x25d   : > { %6721 = vst [vmem:[#allocation118_spill] sm:$0xff] %v5149_v55  ;;  %1878 = vrot.lane.b32.xlu1 %v1872_v11, %s6476_s15  ;;  %v1961_v11 = vrot.slane %v1955_v57, 2 }
 0x25e   : > { %2020 = vrot.lane.b32.xlu0 %v2014_v21, %s6390_s11 }
 0x25f   : > { %v5155_v61 = vpop.permute.xlu1 %1296  ;;  %v1963_v55 = vsel %vm698_vm5, %v1961_v11, %v1962_v4 }
 0x260   : > { %6722 = vst [vmem:[#allocation119_spill] sm:$0xff] %v5155_v61  ;;  %v5157_v63 = vpop.permute.xlu0 %1321  ;;  %v1841_v61 = vstv %s2972_s20  ;;  %s5878_s20 = sld [smem:[#allocation4 + $0x4c]] }
 0x261   : > { %6723 = vst [vmem:[#allocation120_spill] sm:$0xff] %v5157_v63  ;;  %2018 = vrot.lane.b32.xlu1 %v2015_v35, %s6390_s11  ;;  %v1844_v13 = vmul.f32 %v1841_v61, %v4980_v36  ;;  %v1843_v21 = vmul.f32 %v1841_v61, %v4952_v44  ;;  %v1964_v35 = vrot.slane %v1957_v37, 2 }
 0x262   : > { %1897 = vrot.lane.b32.xlu0 %v1894_v14, %s6390_s11  ;;  %v2096_v14 = vstv %s2983_s3  ;;  %s5928_s3 = sld [smem:[#allocation4 + $0x61]] }
 0x263   : > { %v5163_v18 = vpop.permute.xlu1 %1319  ;;  %v2098_v46 = vmul.f32 %v2096_v14, %v4952_v44  ;;  %v1849_v11 = vrot.slane %v1843_v21, 5  ;;  %v1965_v37 = vsel %vm698_vm5, %v1962_v4, %v1964_v35 }
 0x264   : > { %6724 = vst [vmem:[#allocation121_spill] sm:$0xff] %v5163_v18  ;;  %v5165_v3 = vpop.permute.xlu0 %1344 }
 0x265   : > { %6725 = vst [vmem:[#allocation122_spill] sm:$0xff] %v5165_v3  ;;  %1895 = vrot.lane.b32.xlu1 %v1892_v47, %s6390_s11  ;;  %v1851_v3 = vrot.slane %v1844_v13, 5  ;;  %v1842_v47 = vmul.f32 %v1841_v61, %v4959_v48 }
 0x266   : > { %1966 = vrot.lane.b32.xlu0 %v1963_v55, %s6390_s11  ;;  %v2097_v55 = vmul.f32 %v2096_v14, %v4959_v48 }
 0x267   : > { %v5173_v27 = vpop.permute.xlu1 %1323  ;;  %v1852_v13 = vsel %vm484_vm8, %v1849_v11, %v1851_v3  ;;  %v1848_v61 = vrot.slane %v1842_v47, 5 }
 0x268   : > { %6726 = vst [vmem:[#allocation123_spill] sm:$0xff] %v5173_v27  ;;  %v5175_v57 = vpop.permute.xlu0 %1365  ;;  %v1979_v27 = vstv %s2978_s12  ;;  %v2103_v21 = vrot.slane %v2097_v55, 7  ;;  %s5951_s12 = sld [smem:[#allocation4 + $0x3e]] }
 0x269   : > { %6727 = vst [vmem:[#allocation124_spill] sm:$0xff] %v5175_v57  ;;  %1899 = vrot.lane.b32.xlu1 %v1893_v20, %s6390_s11  ;;  %v2104_v57 = vrot.slane %v2098_v46, 7  ;;  %v1981_v20 = vmul.f32 %v1979_v27, %v4952_v44  ;;  %v1850_v3 = vsel %vm484_vm8, %v1848_v61, %v1849_v11  ;;  %v1982_v11 = vmul.f32 %v1979_v27, %v4980_v36 }
 0x26a   : > { %1970 = vrot.lane.b32.xlu0 %v1964_v35, %s6390_s11  ;;  %v2050_v61 = vstv %s5186_s13  ;;  %s3000_s13 = sld [smem:[#allocation4 + $0x5a]] }
 0x26b   : > { %v5182_v18 = vpop.permute.xlu1 %1346  ;;  %v2105_v35 = vsel %vm814_vm6, %v2103_v21, %v2104_v57  ;;  %v1987_v46 = vrot.slane %v1981_v20, 2 }
 0x26c   : > { %6728 = vst [vmem:[#allocation125_spill] sm:$0xff] %v5182_v18  ;;  %v5184_v5 = vpop.permute.xlu0 %1369  ;;  %v1980_v18 = vmul.f32 %v1979_v27, %v4959_v48  ;;  %v1452_v27 = vstv %s5191_s14  ;;  %s3003_s14 = sld [smem:[#allocation9 + $0x2]] }
 0x26d   : > { %6729 = vst [vmem:[#allocation126_spill] sm:$0xff] %v5184_v5  ;;  %1968 = vrot.lane.b32.xlu1 %v1965_v37, %s6390_s11  ;;  %v2099_v37 = vmul.f32 %v2096_v14, %v4980_v36  ;;  %v5248_v30 = vmul.f32 %v1452_v27, %v4959_v48 }
 0x26e   : > { %1855 = vrot.lane.b32.xlu0 %v1852_v13, %s6476_s15  ;;  %v1986_v47 = vrot.slane %v1980_v18, 2  ;;  %v2051_v18 = vmul.f32 %v2050_v61, %v4959_v48 }
 0x26f   : > { %v5198_v5 = vpop.permute.xlu1 %1367  ;;  %v2106_v20 = vrot.slane %v2099_v37, 7  ;;  %v1989_v37 = vrot.slane %v1982_v11, 2  ;;  %v2192_v11 = vstv %s2987_s6  ;;  %6736 = vst [vmem:[#allocation133_spill] sm:$0xff] %v5248_v30  ;;  %s3270_s6 = smov 80  }
 0x270   : > { %6730 = vst [vmem:[#allocation127_spill] sm:$0xff] %v5198_v5  ;;  %v5200_v4 = vpop.permute.xlu0 %1392  ;;  %v1988_v14 = vsel %vm698_vm5, %v1986_v47, %v1987_v46  ;;  %v5234_v5 = vstv %s2955_s9  ;;  %v5268_v28 = vmul.f32 %v2192_v11, %v4952_v44  ;;  %s3268_s9 = smov 48  }
 0x271   : > { %6731 = vst [vmem:[#allocation128_spill] sm:$0xff] %v5200_v4  ;;  %1853 = vrot.lane.b32.xlu1 %v1850_v3, %s6476_s15  ;;  %v5219_v3 = vmul.f32 %v2050_v61, %v4952_v44  ;;  %s5223_s15 = sld [smem:[#allocation4 + $0x54]]  ;;  %v1933_v4 = vstv %s2976_s19  ;;  %v416_v61 = vstv %s5205_s21  ;;  %v1990_v22 = vsel %vm698_vm5, %v1987_v46, %v1989_v37  ;;  %s3267_s19 = smov 32  }
 0x272   : > { %2110 = vrot.lane.b32.xlu0 %v2105_v35, %s3262_s24  ;;  %v1467_v35 = vstv %s5195_s16  ;;  %v417_v46 = vmul.f32 %v4740_v9, %v416_v61  ;;  %v2200_v7 = vrot.slane %v5268_v28, 3  ;;  %s3266_s16 = smov 16   ;;  %s3269_s21 = smov 64  }
 0x273   : > { %v5209_v55 = vpop.permute.xlu1 %1390  ;;  %v6740_v25 = vrot.slane %v5219_v3, 7  ;;  %v1470_v6 = vmul.f32 %v1467_v35, %v4980_v36 }
 0x274   : > { %6732 = vst [vmem:[#allocation129_spill] sm:$0xff] %v5209_v55  ;;  %v5211_v13 = vpop.permute.xlu0 %1415  ;;  %v5239_v55 = vmul.f32 %v1933_v4, %v4952_v44 }
 0x275   : > { %6733 = vst [vmem:[#allocation130_spill] sm:$0xff] %v5211_v13  ;;  %2108 = vrot.lane.b32.xlu1 %v2103_v21, %s3262_s24  ;;  %v2107_v21 = vsel %vm814_vm6, %v2104_v57, %v2106_v20  ;;  %v5251_v57 = vmul.f32 %v1467_v35, %v4959_v48  ;;  %v5255_v20 = vmul.f32 %v5234_v5, %v4959_v48 }
 0x276   : > { %1991 = vrot.lane.b32.xlu0 %v1988_v14, %s6390_s11  ;;  %v1522_v14 = vstv %s5215_s26  ;;  %v1941_v63 = vrot.slane %v5239_v55, 2  ;;  %v5283_v55 = vstv %s5226_s27  ;;  %s3271_s26 = smov 96   ;;  %s6944_s27 = sld [smem:[#allocation20_spill]] }
 0x277   : > { %v5230_v13 = vpop.permute.xlu1 %1394  ;;  %6737 = vst [vmem:[#allocation134_spill] sm:$0xff] %v5255_v20  ;;  %v5274_v45 = vstv %s5223_s15  ;;  %s3272_s15 = smov 112  }
 0x278   : > { %6734 = vst [vmem:[#allocation131_spill] sm:$0xff] %v5230_v13  ;;  %v5232_v47 = vpop.permute.xlu0 %1419  ;;  %v2055_v13 = vrot.slane %v2051_v18, 7  ;;  %v5311_v28 = vmul.f32 %v5274_v45, %v4959_v48 }
 0x279   : > { %6735 = vst [vmem:[#allocation132_spill] sm:$0xff] %v5232_v47  ;;  %2112 = vrot.lane.b32.xlu1 %v2107_v21, %s3262_s24  ;;  %v1934_v47 = vmul.f32 %v1933_v4, %v4959_v48 }
 0x27a   : > { %1995 = vrot.lane.b32.xlu0 %v1989_v37, %s6390_s11  ;;  %v2057_v24 = vsel %vm814_vm6, %v2055_v13, %v6740_v25  ;;  %v5280_v25 = vmul.f32 %v1522_v14, %v4959_v48 }
 0x27b   : > { %v5257_v21 = vpop.permute.xlu1 %1417  ;;  %v1940_v37 = vrot.slane %v1934_v47, 2  ;;  %v1469_v47 = vmul.f32 %v1467_v35, %v4952_v44 }
 0x27c   : > { %6738 = vst [vmem:[#allocation135_spill] sm:$0xff] %v5257_v21  ;;  %v5259_v18 = vpop.permute.xlu0 %1442  ;;  %v2193_v21 = vmul.f32 %v2192_v11, %v4959_v48 }
 0x27d   : > { %6739 = vst [vmem:[#allocation136_spill] sm:$0xff] %v5259_v18  ;;  %1993 = vrot.lane.b32.xlu1 %v1990_v22, %s6390_s11  ;;  %v1942_v0 = vsel %vm698_vm5, %v1940_v37, %v1941_v63  ;;  %v1936_v22 = vmul.f32 %v1933_v4, %v4980_v36  ;;  %v411_v18 = vmul.f32 %v3113_v42, %v6745_v29  ;;  %v1560_v4 = vstv %s5245_s28  ;;  %v6748_v29 = vld [vmem:[#allocation40_spill] sm:$0xff]  ;;  %s6945_s28 = sld [smem:[#allocation25_spill]] }
 0x27e   : > { %2060 = vrot.lane.b32.xlu0 %v2057_v24, %s3262_s24  ;;  %v5289_v24 = vmul.f32 %v1452_v27, %v4952_v44  ;;  %v6744_v27 = vld [vmem:[#allocation41_spill] sm:$0xff]  ;;  %v6749_v35 = vrot.slane %v6748_v29, 4  ;;  %v1475_v37 = vrot.slane %v1469_v47, 7  ;;  %v1477_v29 = vrot.slane %v1470_v6, 7 }
 0x27f   : > { %v5293_v1 = vpop.permute.xlu1 %1440  ;;  %v403_v10 = vmul.f32 %v3113_v42, %v6744_v27  ;;  %v6747_v27 = vrot.slane %v6746_v60, 4  ;;  %v1943_v60 = vrot.slane %v1936_v22, 2  ;;  %v5344_v22 = vadd.f32 %v4703_v16, %v417_v46 }
 0x280   : > { %6741 = vst [vmem:[#allocation137_spill] sm:$0xff] %v5289_v24  ;;  %6742 = vst [vmem:[#allocation138_spill] sm:$0xff] %v5293_v1  ;;  %v5295_v9 = vpop.permute.xlu0 %1586  ;;  %v5306_v1 = vmul.f32 %v3113_v42, %v416_v61  ;;  %v5320_v31 = vadd.f32 %v6749_v35, %v411_v18  ;;  %v3114_v18 = vld [vmem:[#allocation2 + $0x8] sm:$0xff]  ;;  %v1488_v35 = vmul.f32 %v5234_v5, %v4952_v44  ;;  %v2029_v6 = vstv %s5285_s30  ;;  %s6947_s30 = sld [smem:[#allocation24_spill]] }
 0x281   : > { %6743 = vst [vmem:[#allocation139_spill] sm:$0xff] %v5295_v9  ;;  %2058 = vrot.lane.b32.xlu1 %v2055_v13, %s3262_s24  ;;  %v2199_v9 = vrot.slane %v2193_v21, 3  ;;  %v5316_v62 = vadd.f32 %v6747_v27, %v403_v10  ;;  %v2195_v21 = vmul.f32 %v2192_v11, %v4980_v36  ;;  %v5331_v10 = vmul.f32 %v5283_v55, %v4952_v44 }
 0x282   : > { %1945 = vrot.lane.b32.xlu0 %v1942_v0, %s6390_s11  ;;  %v5333_v27 = vmul.f32 %v3114_v18, %v416_v61  ;;  %v1489_v0 = vmul.f32 %v5234_v5, %v4980_v36  ;;  %v6752_v11 = vrot.slane %v5219_v3, 7  ;;  %v2072_v61 = vmul.f32 %v5283_v55, %v4959_v48 }
 0x283   : > { %v5323_v13 = vpop.permute.xlu1 %1584  ;;  %v2201_v41 = vsel %vm888_vm9, %v2199_v9, %v2200_v7  ;;  %v2142_v9 = vstv %s5276_s29  ;;  %v6753_v47 = vrot.slane %v5289_v24, 7  ;;  %v6754_v18 = vrot.slane %v5248_v30, 7  ;;  %s6946_s29 = sld [smem:[#allocation26_spill]] }
 0x284   : > { %6750 = vst [vmem:[#allocation41_spill] sm:$0xff] %v5323_v13  ;;  %v5325_v42 = vpop.permute.xlu0 %1602  ;;  %v1524_v3 = vmul.f32 %v1522_v14, %v4952_v44  ;;  %v2202_v46 = vrot.slane %v2195_v21, 3  ;;  %v6759_v13 = vrot.slane %v5251_v57, 7  ;;  %v1944_v24 = vsel %vm698_vm5, %v1941_v63, %v1943_v60 }
 0x285   : > { %6751 = vst [vmem:[#allocation42_spill] sm:$0xff] %v5325_v42  ;;  %2062 = vrot.lane.b32.xlu1 %v6752_v11, %s3262_s24  ;;  %v5355_v5 = vsel %vm814_vm6, %v6754_v18, %v6753_v47  ;;  %v5359_v11 = vmul.f32 %v1522_v14, %v4980_v36  ;;  %v5373_v18 = vmul.f32 %v2142_v9, %v4952_v44  ;;  %v1494_v30 = vrot.slane %v1488_v35, 7 }
 0x286   : > { %2204 = vrot.lane.b32.xlu0 %v2201_v41, %s3262_s24  ;;  %6755 = vst [vmem:[#allocation39_spill] sm:$0xff] %v5355_v5  ;;  %v5368_v42 = vsel %vm814_vm6, %v6759_v13, %v1475_v37  ;;  %v5376_v14 = vsel %vm814_vm6, %v1475_v37, %v1477_v29  ;;  %v1543_v21 = vmul.f32 %v5274_v45, %v4952_v44  ;;  %v2078_v13 = vrot.slane %v2072_v61, 7  ;;  %p6950_p3 = scmp.ne.s32.totalorder %s6947_s30, 0 }
 0x287   : > { %6756 = vst [vmem:[#allocation40_spill] sm:$0xff] %v5359_v11  ;;  %v5361_v41 = vpop.permute.xlu1 %1600  ;;  %6760 = vst [vmem:[#allocation142_spill] sm:$0xff] %v5368_v42  ;;  %v5386_v63 = vmul.f32 %v5274_v45, %v4980_v36  ;;  %v5389_v60 = vmul.f32 %v1560_v4, %v4980_v36  ;;  %v2143_v37 = vmul.f32 %v2142_v9, %v4959_v48  ;;  %v6765_v45 = vrot.slane %v5331_v10, 7 }
 0x288   : > { %6757 = vst [vmem:[#allocation140_spill] sm:$0xff] %v5361_v41  ;;  %v5363_v16 = vpop.permute.xlu0 %1620  ;;  %v1496_v41 = vrot.slane %v1489_v0, 7  ;;  %v1530_v0 = vrot.slane %v1524_v3, 3  ;;  %v2203_v47 = vsel %vm888_vm9, %v2200_v7, %v2202_v46  ;;  %v1562_v42 = vmul.f32 %v1560_v4, %v4952_v44 }
 0x289   : > { %6758 = vst [vmem:[#allocation141_spill] sm:$0xff] %v5363_v16  ;;  %1947 = vrot.lane.b32.xlu1 %v1944_v24, %s6390_s11  ;;  %6761 = vst [vmem:[#allocation143_spill] sm:$0xff] %v5386_v63  ;;  %v2080_v61 = vsel %vm814_vm6, %v2078_v13, %v6765_v45  ;;  %v2150_v16 = vrot.slane %v5373_v18, 3  ;;  %v2074_v3 = vmul.f32 %v5283_v55, %v4980_v36  ;;  %v1549_v55 = vrot.slane %v1543_v21, 3 }
 0x28a   : > { %2208 = vrot.lane.b32.xlu0 %v2202_v46, %s3262_s24  ;;  %6762 = vst [vmem:[#allocation144_spill] sm:$0xff] %v5389_v60  ;;  %v2145_v29 = vmul.f32 %v2142_v9, %v4980_v36  ;;  %v1548_v46 = vrot.slane %v5311_v28, 3  ;;  %v1561_v18 = vmul.f32 %v1560_v4, %v4959_v48  ;;  %v2032_v45 = vmul.f32 %v2029_v6, %v4980_v36 }
 0x28b   : > { %v5393_v35 = vpop.permute.xlu1 %1604  ;;  %v6767_v28 = vrot.slane %v5280_v25, 3  ;;  %v2031_v21 = vmul.f32 %v2029_v6, %v4952_v44  ;;  %v2030_v9 = vmul.f32 %v2029_v6, %v4959_v48 }
 0x28c   : > { %6763 = vst [vmem:[#allocation145_spill] sm:$0xff] %v5393_v35  ;;  %v5395_v24 = vpop.permute.xlu0 %1624  ;;  %v6766_v35 = vrot.slane %v5255_v20, 7  ;;  %v2149_v20 = vrot.slane %v2143_v37, 3  ;;  %v6770_v37 = vrot.slane %v5359_v11, 3  ;;  %v2167_v11 = vstv %s5382_s4  ;;  %s3012_s4 = sshll.u32 %s6944_s27, 7 }
 0x28d   : > { %6764 = vst [vmem:[#allocation146_spill] sm:$0xff] %v5395_v24  ;;  %2206 = vrot.lane.b32.xlu1 %v2203_v47, %s3262_s24  ;;  %v5430_v47 = vsel %vm888_vm9, %v6767_v28, %v1530_v0  ;;  %v2152_v28 = vrot.slane %v2145_v29, 3  ;;  %v2039_v24 = vrot.slane %v2032_v45, 6 }
 0x28e   : > { %v5413_v7 = vsel %vm814_vm6, %v6766_v35, %v1494_v30  ;;  %2085 = vrot.lane.b32.xlu0 %v2080_v61, %s3262_s24  ;;  %v5425_v35 = vsel %vm814_vm6, %v1494_v30, %v1496_v41  ;;  %6768 = vst [vmem:[#allocation147_spill] sm:$0xff] %v5430_v47  ;;  %v1568_v61 = vrot.slane %v1562_v42, 3  ;;  %v5442_v30 = vsel %vm888_vm9, %v1530_v0, %v6770_v37 }
 0x28f   : > { %v5432_v4 = vpop.permute.xlu1 %1622  ;;  %6771 = vst [vmem:[#allocation149_spill] sm:$0xff] %v5442_v30  ;;  %v2151_v25 = vsel %vm888_vm9, %v2149_v20, %v2150_v16  ;;  %v2081_v41 = vrot.slane %v2074_v3, 7  ;;  %v1567_v42 = vrot.slane %v1561_v18, 3  ;;  %v5454_v0 = vsel %vm888_vm9, %v1548_v46, %v1549_v55 }
 0x290   : > { %6769 = vst [vmem:[#allocation148_spill] sm:$0xff] %v5432_v4  ;;  %v5434_v5 = vpop.permute.xlu0 %1642  ;;  %6772 = vst [vmem:[#allocation150_spill] sm:$0xff] %v5454_v0  ;;  %v6773_v20 = vrot.slane %v5386_v63, 3  ;;  %v2169_v18 = vmul.f32 %v2167_v11, %v4952_v44  ;;  %v2037_v37 = vrot.slane %v2031_v21, 6  ;;  %v2153_v4 = vsel %vm888_vm9, %v2150_v16, %v2152_v28 }
 0x291   : > { %2083 = vrot.lane.b32.xlu1 %v2078_v13, %s3262_s24  ;;  %v6775_v13 = vrot.slane %v5389_v60, 3  ;;  %v5468_v6 = vsel %vm888_vm9, %v1567_v42, %v1568_v61  ;;  %v2168_v47 = vmul.f32 %v2167_v11, %v4959_v48  ;;  %v2036_v42 = vrot.slane %v2030_v9, 6 }
 0x292   : > { %2154 = vrot.lane.b32.xlu0 %v2151_v25, %s3262_s24  ;;  %v5459_v29 = vsel %vm888_vm9, %v1549_v55, %v6773_v20  ;;  %6776 = vst [vmem:[#allocation152_spill] sm:$0xff] %v5468_v6  ;;  %v5475_v25 = vstv %s5399_s10  ;;  %v5478_v55 = vmul.f32 %v2167_v11, %v4980_v36  ;;  %v6779_v20 = vrot.slane %v5331_v10, 7  ;;  %s6948_s10 = sshll.u32 %s6945_s28, 3 }
 0x293   : > { %6774 = vst [vmem:[#allocation151_spill] sm:$0xff] %v5459_v29  ;;  %v5464_v3 = vsel %vm888_vm9, %v1568_v61, %v6775_v13  ;;  %v5470_v45 = vpop.permute.xlu1 %1640  ;;  %v2121_v61 = vstv %s5408_s8  ;;  %v2040_v21 = vsel %vm649_vm4, %v2037_v37, %v2039_v24  ;;  %v2273_v16 = vmul.f32 %v5475_v25, %v4952_v44  ;;  %s211_s8 = scalar_lea.vmem [#allocation11], %s6948_s10 }
 0x294   : > { %6777 = vst [vmem:[#allocation153_spill] sm:$0xff] %v5470_v45  ;;  %v5472_v46 = vpop.permute.xlu0 %1665  ;;  %v2082_v13 = vsel %vm814_vm6, %v6779_v20, %v2081_v41  ;;  %v2123_v10 = vmul.f32 %v2121_v61, %v4952_v44  ;;  %v2272_v11 = vmul.f32 %v5475_v25, %v4959_v48  ;;  %v2175_v41 = vrot.slane %v2169_v18, 3 }
 0x295   : > { %6778 = vst [vmem:[#allocation154_spill] sm:$0xff] %v5472_v46  ;;  %2087 = vrot.lane.b32.xlu1 %v2082_v13, %s3262_s24  ;;  %v5492_v46 = vstv %s5420_s17  ;;  %v2124_v20 = vmul.f32 %v2121_v61, %v4980_v36  ;;  %v2038_v24 = vsel %vm649_vm4, %v2036_v42, %v2037_v37  ;;  %v2122_v45 = vmul.f32 %v2121_v61, %v4959_v48  ;;  %s2798_s17 = sshll.u32 %s211_s8, 4  ;;  %s2799_s17 = int_to_ptr.vmem [resolvable:$true] %s2798_s17 }
 0x296   : > { %2158 = vrot.lane.b32.xlu0 %v2152_v28, %s3262_s24  ;;  %v2362_v6 = vstv %s5437_s22  ;;  %v498_v18 = vadd.f32 %v4778_v58, %v5333_v27  ;;  %v2174_v29 = vrot.slane %v2168_v47, 3  ;;  %v5514_v30 = vmul.f32 %v5492_v46, %v4952_v44 }
 0x297   : > { %v5500_v13 = vpop.permute.xlu1 %1644  ;;  %v2129_v37 = vrot.slane %v2123_v10, 3  ;;  %v5523_v61 = vmul.f32 %v2362_v6, %v4952_v44  ;;  %v5526_v42 = vstv %s5445_s18  ;;  %v2312_v58 = vstv %s5451_s25  ;;  %s6949_s25 = sld [smem:[#allocation162_spill]] }
 0x298   : > { %6780 = vst [vmem:[#allocation155_spill] sm:$0xff] %v5500_v13  ;;  %v5502_v28 = vpop.permute.xlu0 %1686  ;;  %v595_v27 = vadd.f32 %v4798_v39, %v498_v18  ;;  %v2176_v47 = vsel %vm888_vm9, %v2174_v29, %v2175_v41  ;;  %v5532_v9 = vmul.f32 %v2362_v6, %v4959_v48  ;;  %v2131_v13 = vrot.slane %v2124_v20, 3  ;;  %v6785_v29 = vld [vmem:[#allocation60_spill] sm:$0xff] }
 0x299   : > { %6781 = vst [vmem:[#allocation156_spill] sm:$0xff] %v5502_v28  ;;  %v5518_v28 = vmul.f32 %v5492_v46, %v4959_v48  ;;  %2156 = vrot.lane.b32.xlu1 %v2153_v4, %s3262_s24  ;;  %v2128_v60 = vrot.slane %v2122_v45, 3  ;;  %v5545_v0 = vmul.f32 %v5526_v42, %v4952_v44  ;;  %v2314_v39 = vmul.f32 %v2312_v58, %v4952_v44 }
 0x29a   : > { %2043 = vrot.lane.b32.xlu0 %v2040_v21, %s6390_s11  ;;  %v6784_v21 = vrot.slane %v5478_v55, 3  ;;  %v569_v6 = vadd.f32 %v4790_v49, %v6785_v29  ;;  %v688_v20 = vadd.f32 %v4839_v54, %v595_v27  ;;  %v5552_v18 = vmul.f32 %v2312_v58, %v4980_v36 }
 0x29b   : > { %v5534_v63 = vpop.permute.xlu1 %1667  ;;  %v5558_v45 = vsel %vm888_vm9, %v2128_v60, %v2129_v37  ;;  %v2313_v49 = vmul.f32 %v2312_v58, %v4959_v48  ;;  %v499_v54 = vadd.f32 %v4730_v2, %v5306_v1 }
 0x29c   : > { %6782 = vst [vmem:[#allocation157_spill] sm:$0xff] %v5534_v63  ;;  %v5536_v4 = vpop.permute.xlu0 %1690  ;;  %v5541_v10 = vsel %vm888_vm9, %v2175_v41, %v6784_v21  ;;  %v2217_v63 = vstv %s5486_s0  ;;  %v5563_v21 = vmul.f32 %v5526_v42, %v4959_v48  ;;  %v785_v27 = vadd.f32 %v4867_v38, %v688_v20 }
 0x29d   : > { %6783 = vst [vmem:[#allocation158_spill] sm:$0xff] %v5536_v4  ;;  %2041 = vrot.lane.b32.xlu1 %v2038_v24, %s6390_s11  ;;  %v2367_v24 = vrot.slane %v5532_v9, 5  ;;  %v2320_v41 = vrot.slane %v2314_v39, 4  ;;  %v5578_v4 = vmul.f32 %v2217_v63, %v4952_v44  ;;  %v5581_v58 = vmul.f32 %v2217_v63, %v4959_v48  ;;  %s5669_s11 = sld [smem:[#allocation4 + $0x60]]  ;;  %s2796_s0 = scalar_lea.hbm %s6949_s25, %s3012_s4 }
 0x29e   : > { %2280 = vrot.lane.b32.xlu0 %v2273_v16, %s3263_s23  ;;  %6786 = vst [vmem:[#allocation60_spill] sm:$0xff] %v5563_v21  ;;  %v5571_v16 = vsel %vm888_vm9, %v2129_v37, %v2131_v13  ;;  %v2454_v21 = vstv %s5508_s1  ;;  %v596_v1 = vadd.f32 %v4746_v33, %v499_v54  ;;  %v662_v2 = vadd.f32 %v4716_v12, %v569_v6  ;;  %v5599_v12 = vld [vmem:[#allocation2 + $0x20] sm:$0xff]  ;;  %v5619_v54 = vld [vmem:[#allocation2 + $0x18] sm:$0xff]  ;;  %s2784_s1 = scalar_lea.sflag [#allocation6], %s6945_s28 }
 0x29f   : > { %v5573_v60 = vpop.permute.xlu1 %1688  ;;  %v878_v38 = vadd.f32 %v4909_v8, %v785_v27  ;;  %v2322_v13 = vrot.slane %v5552_v18, 4  ;;  %v571_v37 = vadd.f32 %v4738_v43, %v5320_v31  ;;  %v6787_v44 = vrot.slane %v5523_v61, 5 }
 0x2a0   : > { %v5575_v29 = vpop.permute.xlu0 %1713  ;;  %v2319_v33 = vrot.slane %v2313_v49, 4  ;;  %v5602_v8 = vmul.f32 %v5599_v12, %v2454_v21  ;;  %v546_v43 = vadd.f32 %v4736_v56, %v5316_v62  ;;  %v689_v31 = vadd.f32 %v4833_v59, %v596_v1 }
 0x2a1   : > { %2278 = vrot.lane.b32.xlu1 %v2272_v11, %s3263_s23  ;;  %v5597_v48 = vsel %vm484_vm8, %v2367_v24, %v6787_v44  ;;  %v759_v63 = vadd.f32 %v4859_v23, %v662_v2  ;;  %v975_v11 = vadd.f32 %v4946_v26, %v878_v38  ;;  %v2274_v20 = vmul.f32 %v5475_v25, %v4980_v36  ;;  %v6788_v26 = vld [vmem:[#allocation62_spill] sm:$0xff]  ;;  %v6793_v44 = vld [vmem:[#allocation77_spill] sm:$0xff] }
 0x2a2   : > { %2179 = vrot.lane.b32.xlu0 %v2176_v47, %s3262_s24  ;;  %v664_v47 = vadd.f32 %v4754_v51, %v571_v37  ;;  %v5617_v49 = vmul.f32 %v2454_v21, %v4980_v36  ;;  %v5622_v56 = vmul.f32 %v5619_v54, %v2454_v21  ;;  %v642_v62 = vadd.f32 %v4748_v52, %v546_v43  ;;  %v6790_v21 = vld [vmem:[#allocation61_spill] sm:$0xff]  ;;  %v6792_v37 = vld [vmem:[#allocation46_spill] sm:$0xff] }
 0x2a3   : > { %v5610_v39 = vpop.permute.xlu1 %1711  ;;  %v1049_v59 = vadd.f32 %v5013_v34, %v975_v11  ;;  %v5627_v51 = vsel %vm216_vm0, %v2319_v33, %v2320_v41  ;;  %v5632_v23 = vsel %vm216_vm0, %v2320_v41, %v2322_v13  ;;  %v545_v25 = vadd.f32 %v4780_v32, %v6788_v26  ;;  %v6794_v33 = vld [vmem:[#allocation81_spill] sm:$0xff] }
 0x2a4   : > { %v5612_v6 = vpop.permute.xlu0 %1732  ;;  %v594_v27 = vadd.f32 %v4814_v17, %v5344_v22  ;;  %v6789_v52 = vrot.slane %v5478_v55, 3  ;;  %v2234_v34 = vmul.f32 %v5492_v46, %v4980_v36  ;;  %v544_v1 = vadd.f32 %v4796_v19, %v6790_v21  ;;  %v6791_v22 = vld [vmem:[#allocation54_spill] sm:$0xff]  ;;  %v6801_v26 = vld [vmem:[#allocation53_spill] sm:$0xff] }
 0x2a5   : > { %2282 = vrot.lane.b32.xlu1 %v2274_v20, %s3263_s23  ;;  %v786_v41 = vadd.f32 %v4770_v40, %v689_v31  ;;  %v852_v2 = vadd.f32 %v4728_v53, %v759_v63  ;;  %v1141_v32 = vadd.f32 %v5054_v15, %v1049_v59  ;;  %v761_v17 = vadd.f32 %v4756_v50, %v664_v47  ;;  %v6795_v19 = vld [vmem:[#allocation78_spill] sm:$0xff]  ;;  %v6796_v40 = vld [vmem:[#allocation47_spill] sm:$0xff]  ;;  %v6797_v53 = vld [vmem:[#allocation69_spill] sm:$0xff] }
 0x2a6   : > { %2183 = vrot.lane.b32.xlu0 %v6789_v52, %s3262_s24  ;;  %v736_v38 = vadd.f32 %v6791_v22, %v642_v62  ;;  %v570_v55 = vadd.f32 %v6793_v44, %v6792_v37  ;;  %v641_v43 = vadd.f32 %v6794_v33, %v545_v25  ;;  %v640_v46 = vadd.f32 %v6795_v19, %v544_v1  ;;  %v6798_v15 = vld [vmem:[#allocation111_spill] sm:$0xff]  ;;  %v6799_v50 = vld [vmem:[#allocation30_spill] sm:$0xff]  ;;  %v6800_v62 = vld [vmem:[#allocation82_spill] sm:$0xff] }
 0x2a7   : > { %v5654_v11 = vpop.permute.xlu1 %1715  ;;  %v879_v31 = vadd.f32 %v6796_v40, %v786_v41  ;;  %v949_v63 = vadd.f32 %v6797_v53, %v852_v2  ;;  %v1237_v20 = vadd.f32 %v6798_v15, %v1141_v32  ;;  %v687_v52 = vadd.f32 %v6801_v26, %v594_v27  ;;  %v6802_v25 = vld [vmem:[#allocation65_spill] sm:$0xff]  ;;  %v6803_v1 = vld [vmem:[#allocation71_spill] sm:$0xff]  ;;  %v6805_v22 = vld [vmem:[#allocation120_spill] sm:$0xff] }
 0x2a8   : > { %v5656_v36 = vpop.permute.xlu0 %1736  ;;  %v663_v47 = vadd.f32 %v6799_v50, %v570_v55  ;;  %v735_v59 = vadd.f32 %v6800_v62, %v641_v43  ;;  %v854_v21 = vadd.f32 %v6802_v25, %v761_v17  ;;  %v6804_v2 = vld [vmem:[#allocation87_spill] sm:$0xff]  ;;  %v6807_v33 = vld [vmem:[#allocation84_spill] sm:$0xff]  ;;  %v6808_v43 = vld [vmem:[#allocation32_spill] sm:$0xff] }
 0x2a9   : > { %2181 = vrot.lane.b32.xlu1 %v5541_v10, %s3262_s24  ;;  %v976_v41 = vadd.f32 %v6803_v1, %v879_v31  ;;  %v1028_v32 = vadd.f32 %v6804_v2, %v949_v63  ;;  %v1329_v37 = vadd.f32 %v6805_v22, %v1237_v20  ;;  %v6806_v44 = vld [vmem:[#allocation83_spill] sm:$0xff]  ;;  %v784_v19 = vadd.f32 %v6808_v43, %v687_v52  ;;  %v6810_v15 = vld [vmem:[#allocation68_spill] sm:$0xff]  ;;  %v6811_v50 = vld [vmem:[#allocation90_spill] sm:$0xff] }
 0x2aa   : > { %2240 = vrot.lane.b32.xlu0 %v5514_v30, %s3263_s23  ;;  %v734_v55 = vadd.f32 %v6806_v44, %v640_v46  ;;  %v760_v27 = vadd.f32 %v6807_v33, %v663_v47  ;;  %v6809_v10 = vld [vmem:[#allocation63_spill] sm:$0xff]  ;;  %v951_v17 = vadd.f32 %v6810_v15, %v854_v21  ;;  %v6816_v2 = vld [vmem:[#allocation48_spill] sm:$0xff]  ;;  %v6818_v22 = vld [vmem:[#allocation89_spill] sm:$0xff] }
 0x2ab   : > { %v828_v40 = vadd.f32 %v6809_v10, %v735_v59  ;;  %v5679_v53 = vpop.permute.xlu1 %1734  ;;  %v1050_v31 = vadd.f32 %v6811_v50, %v976_v41  ;;  %v6812_v62 = vld [vmem:[#allocation95_spill] sm:$0xff]  ;;  %v6817_v59 = vld [vmem:[#allocation76_spill] sm:$0xff]  ;;  %v6819_v44 = vld [vmem:[#allocation101_spill] sm:$0xff] }
 0x2ac   : > { %v5681_v30 = vpop.permute.xlu0 %1759  ;;  %v1119_v63 = vadd.f32 %v6812_v62, %v1028_v32  ;;  %v6813_v26 = vld [vmem:[#allocation135_spill] sm:$0xff]  ;;  %v829_v21 = vadd.f32 %v6817_v59, %v736_v38  ;;  %v1030_v41 = vadd.f32 %v6818_v22, %v951_v17  ;;  %v6821_v43 = vld [vmem:[#allocation73_spill] sm:$0xff]  ;;  %v6826_v17 = vld [vmem:[#allocation110_spill] sm:$0xff] }
 0x2ad   : > { %v1425_v20 = vadd.f32 %v6813_v26, %v1329_v37  ;;  %v6814_v25 = vld [vmem:[#allocation43_spill] sm:$0xff]  ;;  %v925_v52 = vadd.f32 %v6816_v2, %v828_v40  ;;  %2238 = vrot.lane.b32.xlu1 %v5518_v28, %s3263_s23  ;;  %v1142_v32 = vadd.f32 %v6819_v44, %v1050_v31  ;;  %v6822_v10 = vld [vmem:[#allocation49_spill] sm:$0xff]  ;;  %v6823_v40 = vld [vmem:[#allocation70_spill] sm:$0xff] }
 0x2ae   : > { %v853_v46 = vadd.f32 %v6814_v25, %v760_v27  ;;  %v6815_v1 = vld [vmem:[#allocation67_spill] sm:$0xff]  ;;  %2133 = vrot.lane.b32.xlu0 %v5558_v45, %s3262_s24  ;;  %v827_v27 = vadd.f32 %v6821_v43, %v734_v55  ;;  %v6824_v50 = vld [vmem:[#allocation85_spill] sm:$0xff]  ;;  %v6827_v31 = vld [vmem:[#allocation116_spill] sm:$0xff] }
 0x2af   : > { %v877_v47 = vadd.f32 %v6815_v1, %v784_v19  ;;  %v6820_v33 = vld [vmem:[#allocation107_spill] sm:$0xff]  ;;  %v1009_v28 = vadd.f32 %v6824_v50, %v925_v52  ;;  %v5702_v62 = vpop.permute.xlu1 %1757  ;;  %v6825_v38 = vld [vmem:[#allocation97_spill] sm:$0xff]  ;;  %v1238_v25 = vadd.f32 %v6826_v17, %v1142_v32  ;;  %v6828_v55 = vld [vmem:[#allocation50_spill] sm:$0xff]  ;;  %v5720_v52 = vstv %s5669_s11  ;;  %s3173_s11 = scalar_lea.vmem %s2799_s17, 128 }
 0x2b0   : > { %v1211_v37 = vadd.f32 %v6820_v33, %v1119_v63  ;;  %v950_v19 = vadd.f32 %v6822_v10, %v853_v46  ;;  %v5704_v45 = vpop.permute.xlu0 %1780  ;;  %v1121_v26 = vadd.f32 %v6825_v38, %v1030_v41  ;;  %v1502_v63 = vadd.f32 %v5413_v7, %v1425_v20  ;;  %v6829_v59 = vld [vmem:[#allocation86_spill] sm:$0xff]  ;;  %v6830_v22 = vld [vmem:[#allocation88_spill] sm:$0xff]  ;;  %v6831_v41 = vld [vmem:[#allocation93_spill] sm:$0xff]  ;;  %p3174_p8 = scmp.ne.s32.totalorder %s2799_s17, %s3173_s11 }
 0x2b1   : > { %v974_v15 = vadd.f32 %v6823_v40, %v877_v47  ;;  %v924_v2 = vadd.f32 %v6828_v55, %v827_v27  ;;  %2242 = vrot.lane.b32.xlu1 %v2234_v34, %s3263_s23  ;;  %v1095_v44 = vadd.f32 %v6831_v41, %v1009_v28  ;;  %v6832_v32 = vld [vmem:[#allocation109_spill] sm:$0xff]  ;;  %v6833_v20 = vld [vmem:[#allocation123_spill] sm:$0xff]  ;;  %v6835_v27 = vld [vmem:[#allocation74_spill] sm:$0xff] }
 0x2b2   : > { %v1303_v1 = vadd.f32 %v6827_v31, %v1211_v37  ;;  %v1029_v46 = vadd.f32 %v6829_v59, %v950_v19  ;;  %2370 = vrot.lane.b32.xlu0 %v2367_v24, %s3264_s5  ;;  %v1213_v7 = vadd.f32 %v6832_v32, %v1121_v26  ;;  %v1330_v33 = vadd.f32 %v6833_v20, %v1238_v25  ;;  %v6834_v37 = vld [vmem:[#allocation129_spill] sm:$0xff]  ;;  %v6836_v19 = vld [vmem:[#allocation52_spill] sm:$0xff]  ;;  %v6838_v50 = vld [vmem:[#allocation99_spill] sm:$0xff]  ;;  %p3175_p11 = pnand %p3174_p8, %p6950_p3 }
 0x2b3   : > { %v1048_v47 = vadd.f32 %v6830_v22, %v974_v15  ;;  %v926_v10 = vadd.f32 %v6835_v27, %v829_v21  ;;  %v1008_v40 = vadd.f32 %v6836_v19, %v924_v2  ;;  %v6837_v15 = vld [vmem:[#allocation98_spill] sm:$0xff]  ;;  %v5730_v9 = vpop.permute.xlu1 %1778  ;;  %v6839_v17 = vld [vmem:[#allocation105_spill] sm:$0xff]  ;;  %v6841_v26 = vld [vmem:[#allocation132_spill] sm:$0xff]  ;;  %v1576_v25 = vadd.f32 %v5464_v3, %v1502_v63 }
 0x2b4   : > { %v1399_v43 = vadd.f32 %v6834_v37, %v1303_v1  ;;  %v1120_v34 = vadd.f32 %v6837_v15, %v1029_v46  ;;  %v1831_v24 = vpop.permute.xlu0 %1830  ;;  %v1187_v31 = vadd.f32 %v6839_v17, %v1095_v44  ;;  %v6840_v28 = vld [vmem:[#allocation118_spill] sm:$0xff]  ;;  %v1426_v59 = vadd.f32 %v6841_v26, %v1330_v33  ;;  %v6844_v2 = vld [vmem:[#allocation108_spill] sm:$0xff]  ;;  %v6848_v33 = vld [vmem:[#allocation131_spill] sm:$0xff]  ;;  %p3176_p0 = pneg %p3175_p11 }
 0x2b5   : > { %v1140_v38 = vadd.f32 %v6838_v50, %v1048_v47  ;;  %v1305_v55 = vadd.f32 %v6840_v28, %v1213_v7  ;;  %v6842_v1 = vld [vmem:[#allocation94_spill] sm:$0xff]  ;;  %2135 = vrot.lane.b32.xlu1 %v5571_v16, %s3262_s24  ;;  %v6845_v46 = vrot.slane %v5523_v61, 5  ;;  %v6847_v7 = vrot.slane %v5251_v57, 7  ;;  %v6849_v37 = vld [vmem:[#allocation51_spill] sm:$0xff]  ;;  %v6852_v57 = vld [vmem:[#allocation121_spill] sm:$0xff]  ;;  %s5802_s24 = sld [smem:[#allocation4 + $0x45]] }
 0x2b6   : > { %v1094_v22 = vadd.f32 %v6842_v1, %v1008_v40  ;;  %v6843_v21 = vld [vmem:[#allocation106_spill] sm:$0xff]  ;;  %v1650_v63 = vadd.f32 %v5434_v5, %v1576_v25  ;;  %v1010_v27 = vadd.f32 %v6849_v37, %v926_v10  ;;  %v6851_v15 = vld [vmem:[#allocation119_spill] sm:$0xff]  ;;  %v5758_v50 = vmul.f32 %v5619_v54, %v5720_v52  ;;  %v6856_v25 = vld [vmem:[#allocation128_spill] sm:$0xff] }
 0x2b7   : > { %v1212_v41 = vadd.f32 %v6843_v21, %v1120_v34  ;;  %v1236_v32 = vadd.f32 %v6844_v2, %v1140_v38  ;;  %2374 = vrot.lane.b32.xlu0 %v6845_v46, %s3264_s5  ;;  %v6846_v47 = vld [vmem:[#allocation114_spill] sm:$0xff]  ;;  %v1482_v20 = vadd.f32 %v6847_v7, %v1399_v43  ;;  %v1401_v3 = vadd.f32 %v6848_v33, %v1305_v55  ;;  %v5752_v34 = vpop.permute.xlu1 %1828  ;;  %v6853_v38 = vld [vmem:[#allocation127_spill] sm:$0xff] }
 0x2b8   : > { %v1283_v44 = vadd.f32 %v6846_v47, %v1187_v31  ;;  %v6850_v19 = vld [vmem:[#allocation102_spill] sm:$0xff]  ;;  %v5754_v61 = vpop.permute.xlu0 %1782  ;;  %v1503_v5 = vadd.f32 %v5425_v35, %v1426_v59  ;;  %v1742_v10 = vadd.f32 %v5679_v53, %v1650_v63  ;;  %v6854_v31 = vld [vmem:[#allocation96_spill] sm:$0xff]  ;;  %v6855_v55 = vld [vmem:[#allocation115_spill] sm:$0xff] }
 0x2b9   : > { %v1186_v40 = vadd.f32 %v6850_v19, %v1094_v22  ;;  %v1304_v16 = vadd.f32 %v6851_v15, %v1212_v41  ;;  %v1328_v43 = vadd.f32 %v6852_v57, %v1236_v32  ;;  %v1096_v28 = vadd.f32 %v6854_v31, %v1010_v27  ;;  %2372 = vrot.lane.b32.xlu1 %v5597_v48, %s3264_s5  ;;  %v6857_v21 = vld [vmem:[#allocation130_spill] sm:$0xff]  ;;  %v6859_v32 = vld [vmem:[#allocation104_spill] sm:$0xff]  ;;  %v6861_v37 = vld [vmem:[#allocation39_spill] sm:$0xff] }
 0x2ba   : > { %v1375_v17 = vadd.f32 %v6853_v38, %v1283_v44  ;;  %v5768_v22 = vstv %s5713_s2  ;;  %v1484_v35 = vadd.f32 %v5376_v14, %v1401_v3  ;;  %v6858_v59 = vld [vmem:[#allocation150_spill] sm:$0xff]  ;;  %v1838_v2 = vadd.f32 %v1831_v24, %v1742_v10  ;;  %v6860_v47 = vld [vmem:[#allocation124_spill] sm:$0xff]  ;;  %v6862_v3 = vld [vmem:[#allocation141_spill] sm:$0xff]  ;;  %s3273_s2 = smov [#allocation11]  }
 0x2bb   : > { %v1282_v26 = vadd.f32 %v6855_v55, %v1186_v40  ;;  %v1400_v1 = vadd.f32 %v6856_v25, %v1304_v16  ;;  %2260 = vrot.lane.b32.xlu0 %v5545_v0, %s3263_s23  ;;  %v1424_v41 = vadd.f32 %v6857_v21, %v1328_v43  ;;  %v1556_v53 = vadd.f32 %v6858_v59, %v1482_v20  ;;  %v1833_v7 = vpop.permute.xlu1 %1832  ;;  %v5779_v63 = vld [vmem:[#allocation2 + $0x28] sm:$0x3f]  ;;  %v6863_v24 = vld [vmem:[#allocation144_spill] sm:$0xff]  ;;  %v6865_v15 = vld [vmem:[#allocation45_spill] sm:$0xff] }
 0x2bc   : > { %v1188_v46 = vadd.f32 %v6859_v32, %v1096_v28  ;;  %v1923_v33 = vpop.permute.xlu0 %1922  ;;  %v2254_v48 = vmul.f32 %v5779_v63, %v5526_v42  ;;  %v5785_v0 = vmul.f32 %v5599_v12, %v5720_v52  ;;  %v1464_v14 = vadd.f32 %v6861_v37, %v1375_v17  ;;  %v6866_v16 = vld [vmem:[#allocation55_spill] sm:$0xff]  ;;  %v6867_v43 = vld [vmem:[#allocation117_spill] sm:$0xff]  ;;  %v6868_v10 = vld [vmem:[#allocation142_spill] sm:$0xff] }
 0x2bd   : > { %v1374_v44 = vadd.f32 %v6860_v47, %v1282_v26  ;;  %v1629_v20 = vadd.f32 %v6862_v3, %v1556_v53  ;;  %v6864_v27 = vrot.slane %v6863_v24, 3  ;;  %v5791_v40 = vadd.f32 %v1923_v33, %v1838_v2  ;;  %v6869_v31 = vld [vmem:[#allocation60_spill] sm:$0xff]  ;;  %v6872_v26 = vld [vmem:[#allocation143_spill] sm:$0xff]  ;;  %v6877_v47 = vld [vmem:[#allocation58_spill] sm:$0xff] }
 0x2be   : > { %v521_v57 = vadd.f32 %v6866_v16, %v6865_v15  ;;  %v1284_v38 = vadd.f32 %v6867_v43, %v1188_v46  ;;  %v1483_v42 = vadd.f32 %v6868_v10, %v1400_v1  ;;  %2258 = vrot.lane.b32.xlu1 %v6869_v31, %s3263_s23  ;;  %v2462_v17 = vrot.slane %v5602_v8, 1  ;;  %v6874_v59 = vld [vmem:[#allocation155_spill] sm:$0xff]  ;;  %v6876_v32 = vld [vmem:[#allocation56_spill] sm:$0xff]  ;;  %v6880_v24 = vld [vmem:[#allocation126_spill] sm:$0xff] }
 0x2bf   : > { %v1577_v19 = vadd.f32 %v6864_v27, %v1503_v5  ;;  %2324 = vrot.lane.b32.xlu0 %v5627_v51, %s3263_s23  ;;  %v6870_v5 = vld [vmem:[#allocation134_spill] sm:$0xff]  ;;  %v6873_v25 = vrot.slane %v6872_v26, 3  ;;  %v1720_v1 = vadd.f32 %v5610_v39, %v1629_v20  ;;  %v6875_v2 = vld [vmem:[#allocation59_spill] sm:$0xff]  ;;  %v6878_v51 = vld [vmem:[#allocation133_spill] sm:$0xff]  ;;  %v1921_v15 = vpop.permute.xlu1 %1920 }
 0x2c0   : > { %v6871_v28 = vrot.slane %v6870_v5, 7  ;;  %v520_v46 = vadd.f32 %v6876_v32, %v6875_v2  ;;  %v617_v33 = vadd.f32 %v6877_v47, %v521_v57  ;;  %v6879_v37 = vrot.slane %v6878_v51, 7  ;;  %v1804_v16 = vpop.permute.xlu0 %1803  ;;  %v6882_v10 = vld [vmem:[#allocation146_spill] sm:$0xff]  ;;  %v6883_v39 = vld [vmem:[#allocation57_spill] sm:$0xff]  ;;  %v6884_v5 = vld [vmem:[#allocation79_spill] sm:$0xff] }
 0x2c1   : > { %v1558_v21 = vadd.f32 %v6873_v25, %v1484_v35  ;;  %v1651_v53 = vadd.f32 %v6874_v59, %v1577_v19  ;;  %v1376_v27 = vadd.f32 %v6880_v24, %v1284_v38  ;;  %v5819_v31 = vadd.f32 %v1804_v16, %v1720_v1  ;;  %v6885_v57 = vld [vmem:[#allocation151_spill] sm:$0xff]  ;;  %v6887_v25 = vld [vmem:[#allocation152_spill] sm:$0xff]  ;;  %v6889_v2 = vld [vmem:[#allocation137_spill] sm:$0xff] }
 0x2c2   : > { %v1501_v55 = vadd.f32 %v6871_v28, %v1424_v41  ;;  %v1463_v3 = vadd.f32 %v6879_v37, %v1374_v44  ;;  %v6881_v41 = vld [vmem:[#allocation149_spill] sm:$0xff]  ;;  %v616_v20 = vadd.f32 %v6883_v39, %v520_v46  ;;  %v711_v28 = vadd.f32 %v6884_v5, %v617_v33  ;;  %2262 = vrot.lane.b32.xlu1 %v2254_v48, %s3263_s23  ;;  %v6891_v48 = vld [vmem:[#allocation147_spill] sm:$0xff]  ;;  %v6892_v47 = vld [vmem:[#allocation148_spill] sm:$0xff] }
 0x2c3   : > { %v1538_v43 = vadd.f32 %v6881_v41, %v1464_v14  ;;  %v1631_v35 = vadd.f32 %v6882_v10, %v1558_v21  ;;  %v1743_v19 = vadd.f32 %v5656_v36, %v1651_v53  ;;  %v1557_v26 = vadd.f32 %v6885_v57, %v1483_v42  ;;  %2328 = vrot.lane.b32.xlu0 %v2322_v13, %s3263_s23  ;;  %v6886_v14 = vld [vmem:[#allocation42_spill] sm:$0xff]  ;;  %v6888_v53 = vld [vmem:[#allocation44_spill] sm:$0xff]  ;;  %v1925_v13 = vpop.permute.xlu1 %1924  ;;  %v6893_v51 = vld [vmem:[#allocation153_spill] sm:$0xff] }
 0x2c4   : > { %v2464_v44 = vrot.slane %v5617_v49, 1  ;;  %v1575_v36 = vadd.f32 %v6887_v25, %v1501_v55  ;;  %v807_v1 = vadd.f32 %v6888_v53, %v711_v28  ;;  %v6890_v42 = vrot.slane %v6889_v2, 7  ;;  %v1808_v33 = vpop.permute.xlu0 %1807  ;;  %v6895_v41 = vld [vmem:[#allocation64_spill] sm:$0xff] }
 0x2c5   : > { %v1610_v38 = vadd.f32 %v6886_v14, %v1538_v43  ;;  %v1722_v21 = vadd.f32 %v5654_v11, %v1631_v35  ;;  %v1839_v59 = vadd.f32 %v1833_v7, %v1743_v19  ;;  %v1537_v46 = vadd.f32 %v6891_v48, %v1463_v3  ;;  %v6894_v11 = vld [vmem:[#allocation80_spill] sm:$0xff] }
 0x2c6   : > { %v1465_v32 = vadd.f32 %v6890_v42, %v1376_v27  ;;  %v1630_v18 = vadd.f32 %v6892_v47, %v1557_v26  ;;  %v1649_v37 = vadd.f32 %v6893_v51, %v1575_v36  ;;  %v710_v7 = vadd.f32 %v6894_v11, %v616_v20  ;;  %2326 = vrot.lane.b32.xlu1 %v5632_v23, %s3263_s23  ;;  %v6896_v27 = vld [vmem:[#allocation140_spill] sm:$0xff]  ;;  %v6897_v23 = vld [vmem:[#allocation38_spill] sm:$0xff]  ;;  %v6906_v51 = vld [vmem:[#allocation103_spill] sm:$0xff] }
 0x2c7   : > { %v1696_v24 = vadd.f32 %v5573_v60, %v1610_v38  ;;  %v1931_v55 = vadd.f32 %v1925_v13, %v1839_v59  ;;  %v5839_v16 = vadd.f32 %v1808_v33, %v1722_v21  ;;  %v901_v43 = vadd.f32 %v6895_v41, %v807_v1  ;;  %2224 = vrot.lane.b32.xlu0 %v5578_v4, %s3263_s23  ;;  %v6898_v20 = vld [vmem:[#allocation72_spill] sm:$0xff]  ;;  %v1806_v14 = vpop.permute.xlu1 %1805 }
 0x2c8   : > { %v2465_v3 = vsel %vm508_vm7, %v2462_v17, %v2464_v44  ;;  %v5853_v60 = vstv %s5802_s24  ;;  %v1609_v10 = vadd.f32 %v6896_v27, %v1537_v46  ;;  %v1721_v35 = vadd.f32 %v5575_v29, %v1630_v18  ;;  %v6899_v28 = vld [vmem:[#allocation40_spill] sm:$0xff]  ;;  %v1877_v38 = vpop.permute.xlu0 %1876  ;;  %v6905_v18 = vld [vmem:[#allocation75_spill] sm:$0xff]  ;;  %s3177_s24 = sshll.u32 %s3273_s2, 4  ;;  %s3178_s24 = int_to_ptr.vmem [resolvable:$false] %s3177_s24 }
 0x2c9   : > { %v1741_v19 = vadd.f32 %v5612_v6, %v1649_v37  ;;  %v1788_v39 = vadd.f32 %v5704_v45, %v1696_v24  ;;  %v806_v4 = vadd.f32 %v6897_v23, %v710_v7  ;;  %v990_v5 = vadd.f32 %v6898_v20, %v901_v43  ;;  %v6901_v36 = vld [vmem:[#allocation156_spill] sm:$0xff]  ;;  %v6902_v45 = vld [vmem:[#allocation66_spill] sm:$0xff]  ;;  %p3180_p9 = scmp.lt.s32.totalorder %s2799_s17, %s3178_s24 }
 0x2ca   : > { %v6900_v57 = vrot.slane %v6899_v28, 3  ;;  %v2345_v25 = vrot.slane %v5785_v0, 4  ;;  %v1695_v21 = vadd.f32 %v6901_v36, %v1609_v10  ;;  %v1813_v6 = vadd.f32 %v1806_v14, %v1721_v35  ;;  %2222 = vrot.lane.b32.xlu1 %v5581_v58, %s3263_s23  ;;  %v6907_v24 = vld [vmem:[#allocation158_spill] sm:$0xff]  ;;  %v6909_v43 = vld [vmem:[#allocation112_spill] sm:$0xff] }
 0x2cb   : > { %v1837_v29 = vadd.f32 %v5752_v34, %v1741_v19  ;;  %v5868_v59 = vadd.f32 %v1877_v38, %v1788_v39  ;;  %v900_v53 = vadd.f32 %v6902_v45, %v806_v4  ;;  %2468 = vrot.lane.b32.xlu0 %v2465_v3, %s3264_s5  ;;  %v2461_v1 = vrot.slane %v5622_v56, 1  ;;  %v6903_v34 = vld [vmem:[#allocation91_spill] sm:$0xff]  ;;  %v1875_v13 = vpop.permute.xlu1 %1874  ;;  %v6912_v45 = vld [vmem:[#allocation113_spill] sm:$0xff] }
 0x2cc   : > { %v1539_v26 = vadd.f32 %v6900_v57, %v1465_v32  ;;  %v2344_v2 = vrot.slane %v5758_v50, 4  ;;  %v2340_v0 = vmul.f32 %v5779_v63, %v5720_v52  ;;  %v1071_v42 = vadd.f32 %v6903_v34, %v990_v5  ;;  %v6904_v32 = vld [vmem:[#allocation145_spill] sm:$0xff]  ;;  %v2017_v33 = vpop.permute.xlu0 %2016  ;;  %v6910_v5 = vld [vmem:[#allocation100_spill] sm:$0xff] }
 0x2cd   : > { %v1787_v46 = vadd.f32 %v5730_v9, %v1695_v21  ;;  %v1929_v47 = vadd.f32 %v1921_v15, %v1837_v29  ;;  %v989_v58 = vadd.f32 %v6905_v18, %v900_v53  ;;  %v2463_v56 = vsel %vm508_vm7, %v2461_v1, %v2462_v17  ;;  %v6908_v17 = vld [vmem:[#allocation92_spill] sm:$0xff]  ;;  %v6911_v57 = vld [vmem:[#allocation125_spill] sm:$0xff] }
 0x2ce   : > { %v1611_v48 = vadd.f32 %v6904_v32, %v1539_v26  ;;  %v2346_v52 = vsel %vm216_vm0, %v2344_v2, %v2345_v25  ;;  %v5890_v50 = vmul.f32 %v5779_v63, %v5853_v60  ;;  %v1163_v37 = vadd.f32 %v6906_v51, %v1071_v42  ;;  %2466 = vrot.lane.b32.xlu1 %v2463_v56, %s3264_s5  ;;  %v6913_v1 = vld [vmem:[#allocation136_spill] sm:$0xff] }
 0x2cf   : > { %v1883_v15 = vadd.f32 %v1875_v13, %v1787_v46  ;;  %v5894_v11 = vadd.f32 %v2017_v33, %v1929_v47  ;;  %v1508_v7 = vmul.f32 %v5779_v63, %v5768_v22  ;;  %2349 = vrot.lane.b32.xlu0 %v2346_v52, %s3263_s23  ;;  %v2406_v8 = vmul.f32 %v5599_v12, %v5853_v60  ;;  %v1879_v19 = vpop.permute.xlu1 %1878  ;;  %v6915_v13 = vld [vmem:[#allocation138_spill] sm:$0xff] }
 0x2d0   : > { %v1697_v9 = vadd.f32 %v6907_v24, %v1611_v48  ;;  %v1070_v41 = vadd.f32 %v6908_v17, %v989_v58  ;;  %v1259_v3 = vadd.f32 %v6909_v43, %v1163_v37  ;;  %v2291_v10 = vstv %s5859_s7  ;;  %v2021_v39 = vpop.permute.xlu0 %2020  ;;  %v6914_v48 = vld [vmem:[#allocation122_spill] sm:$0xff]  ;;  %s3179_s7 = scalar_lea.vmem %s3178_s24, 256 }
 0x2d1   : > { %v1507_v35 = vmul.f32 %v5599_v12, %v5768_v22  ;;  %v2347_v23 = vrot.slane %v2340_v0, 4  ;;  %v2414_v4 = vrot.slane %v5890_v50, 1  ;;  %v5910_v20 = vmul.f32 %v5599_v12, %v2291_v10  ;;  %p3181_p1 = scmp.lt.s32.totalorder %s3179_s7, %s3173_s11 }
 0x2d2   : > { %v1789_v27 = vadd.f32 %v5754_v61, %v1697_v9  ;;  %v1162_v28 = vadd.f32 %v6910_v5, %v1070_v41  ;;  %v1351_v26 = vadd.f32 %v6911_v57, %v1259_v3  ;;  %v5914_v38 = vadd.f32 %v2021_v39, %v1931_v55  ;;  %2470 = vrot.lane.b32.xlu1 %v2464_v44, %s3264_s5  ;;  %v6916_v3 = vld [vmem:[#allocation139_spill] sm:$0xff]  ;;  %v6917_v5 = vld [vmem:[#allocation157_spill] sm:$0xff] }
 0x2d3   : > { %v1515_v61 = vrot.slane %v1508_v7, 3  ;;  %v1506_v36 = vmul.f32 %v5619_v54, %v5768_v22  ;;  %2353 = vrot.lane.b32.xlu0 %v2347_v23, %s3263_s23  ;;  %v2412_v21 = vrot.slane %v2406_v8, 1  ;;  %v2429_v29 = vstv %s5878_s20  ;;  %v2019_v34 = vpop.permute.xlu1 %2018  ;;  %p3182_p2 = por %p3181_p1, %p3180_p9 }
 0x2d4   : > { %v1885_v14 = vadd.f32 %v1879_v19, %v1789_v27  ;;  %v1258_v53 = vadd.f32 %v6912_v45, %v1162_v28  ;;  %v1447_v2 = vadd.f32 %v6913_v1, %v1351_v26  ;;  %v2405_v55 = vmul.f32 %v5619_v54, %v5853_v60  ;;  %v1898_v42 = vpop.permute.xlu0 %1897 }
 0x2d5   : > { %v2292_v0 = vmul.f32 %v5619_v54, %v2291_v10  ;;  %v1513_v22 = vrot.slane %v1507_v35, 3  ;;  %v2348_v49 = vsel %vm216_vm0, %v2345_v25, %v2347_v23  ;;  %v2415_v44 = vsel %vm508_vm7, %v2412_v21, %v2414_v4  ;;  %p3183_p5 = pnand %p3182_p2, %p3176_p0 }
 0x2d6   : > { %v5935_v32 = vmul.f32 %v5599_v12, %v2429_v29  ;;  %v1350_v46 = vadd.f32 %v6914_v48, %v1258_v53  ;;  %v5939_v60 = vadd.f32 %v2019_v34, %v5791_v40  ;;  %v5941_v47 = vadd.f32 %v1898_v42, %v1813_v6  ;;  %2351 = vrot.lane.b32.xlu1 %v2348_v49, %s3263_s23 }
 0x2d7   : > { %v2299_v18 = vrot.slane %v5910_v20, 4  ;;  %v1516_v58 = vsel %vm888_vm9, %v1513_v22, %v1515_v61  ;;  %2418 = vrot.lane.b32.xlu0 %v2415_v44, %s3264_s5  ;;  %v2430_v25 = vmul.f32 %v5619_v54, %v2429_v29  ;;  %v2411_v52 = vrot.slane %v2405_v55, 1  ;;  %v1896_v40 = vpop.permute.xlu1 %1895 }
 0x2d8   : > { %v1446_v33 = vadd.f32 %v6915_v13, %v1350_v46  ;;  %v1520_v56 = vadd.f32 %v1516_v58, %v1447_v2  ;;  %v2298_v51 = vrot.slane %v2292_v0, 4  ;;  %v1512_v37 = vrot.slane %v1506_v36, 3  ;;  %v1967_v6 = vpop.permute.xlu0 %1966  ;;  %v6919_v0 = vld [vmem:[#allocation154_spill] sm:$0xff] }
 0x2d9   : > { %v2437_v24 = vrot.slane %v5935_v32, 1  ;;  %v2294_v9 = vmul.f32 %v5779_v63, %v2291_v10  ;;  %v1904_v7 = vadd.f32 %v1896_v40, %v5819_v31  ;;  %v5954_v8 = vadd.f32 %v1967_v6, %v1883_v15 }
 0x2da   : > { %v2413_v17 = vsel %vm508_vm7, %v2411_v52, %v2412_v21  ;;  %v2300_v41 = vsel %vm216_vm0, %v2298_v51, %v2299_v18  ;;  %v1514_v43 = vsel %vm888_vm9, %v1512_v37, %v1513_v22  ;;  %v1591_v27 = vadd.f32 %v6916_v3, %v1520_v56  ;;  %v6918_v21 = vld [vmem:[#allocation41_spill] sm:$0xff] }
 0x2db   : > { %2416 = vrot.lane.b32.xlu1 %v2413_v17, %s3264_s5  ;;  %2303 = vrot.lane.b32.xlu0 %v2300_v41, %s3263_s23  ;;  %v1519_v35 = vadd.f32 %v1514_v43, %v1446_v33  ;;  %v2436_v10 = vrot.slane %v2430_v25, 1  ;;  %v2500_v19 = vstv %s5928_s3  ;;  %v1900_v39 = vpop.permute.xlu1 %1899  ;;  %v2301_v31 = vrot.slane %v2294_v9, 4 }
 0x2dc   : > { %v1971_v23 = vpop.permute.xlu0 %1970  ;;  %v2432_v15 = vmul.f32 %v5779_v63, %v2429_v29  ;;  %v2503_v20 = vmul.f32 %v5779_v63, %v2500_v19  ;;  %v1672_v28 = vadd.f32 %v6917_v5, %v1591_v27  ;;  %v1906_v57 = vadd.f32 %v1900_v39, %v5839_v16 }
 0x2dd   : > { %v5967_v26 = vadd.f32 %v1971_v23, %v1885_v14  ;;  %v2438_v61 = vsel %vm508_vm7, %v2436_v10, %v2437_v24  ;;  %v2502_v36 = vmul.f32 %v5599_v12, %v2500_v19  ;;  %v1590_v29 = vadd.f32 %v6918_v21, %v1519_v35 }
 0x2de   : > { %v1764_v45 = vadd.f32 %v5681_v30, %v1672_v28  ;;  %v2302_v16 = vsel %vm216_vm0, %v2299_v18, %v2301_v31  ;;  %v2439_v14 = vrot.slane %v2432_v15, 1  ;;  %v2510_v2 = vrot.slane %v2503_v20, 5 }
 0x2df   : > { %2420 = vrot.lane.b32.xlu1 %v2414_v4, %s3264_s5  ;;  %2441 = vrot.lane.b32.xlu0 %v2438_v61, %s3264_s5  ;;  %v1969_v53 = vpop.permute.xlu1 %1968  ;;  %v2383_v55 = vstv %s5951_s12  ;;  %v1671_v22 = vadd.f32 %v6919_v0, %v1590_v29  ;;  %v2508_v42 = vrot.slane %v2502_v36, 5  ;;  %v2501_v30 = vmul.f32 %v5619_v54, %v2500_v19 }
 0x2e0   : > { %v1856_v1 = vpop.permute.xlu0 %1855  ;;  %v1976_v50 = vadd.f32 %v1969_v53, %v5868_v59  ;;  %v2385_v34 = vmul.f32 %v5599_v12, %v2383_v55  ;;  %v2384_v44 = vmul.f32 %v5619_v54, %v2383_v55  ;;  %v2440_v46 = vsel %vm508_vm7, %v2437_v24, %v2439_v14 }
 0x2e1   : > { %v1860_v4 = vadd.f32 %v1856_v1, %v1764_v45  ;;  %v1763_v49 = vadd.f32 %v5702_v62, %v1671_v22  ;;  %v2511_v59 = vsel %vm484_vm8, %v2508_v42, %v2510_v2  ;;  %v2479_v18 = vstv %s3000_s13 }
 0x2e2   : > { %v2391_v13 = vrot.slane %v2385_v34, 1  ;;  %v2481_v33 = vmul.f32 %v5599_v12, %v2479_v18  ;;  %v2507_v62 = vrot.slane %v2501_v30, 5  ;;  %v2390_v56 = vrot.slane %v2384_v44, 1 }
 0x2e3   : > { %2305 = vrot.lane.b32.xlu1 %v2302_v16, %s3263_s23  ;;  %2445 = vrot.lane.b32.xlu0 %v2439_v14, %s3264_s5  ;;  %v1854_v32 = vpop.permute.xlu1 %1853  ;;  %v2480_v52 = vmul.f32 %v5619_v54, %v2479_v18  ;;  %v2386_v6 = vmul.f32 %v5779_v63, %v2383_v55  ;;  %v2482_v54 = vmul.f32 %v5779_v63, %v2479_v18  ;;  %s6032_s23 = sld [smem:[#allocation9]] }
 0x2e4   : > { %v2111_v48 = vpop.permute.xlu0 %2110  ;;  %v1859_v58 = vadd.f32 %v1854_v32, %v1763_v49  ;;  %v2509_v40 = vsel %vm484_vm8, %v2507_v62, %v2508_v42  ;;  %v2392_v9 = vsel %vm508_vm7, %v2390_v56, %v2391_v13  ;;  %v2487_v12 = vrot.slane %v2481_v33, 5 }
 0x2e5   : > { %v2118_v25 = vadd.f32 %v2111_v48, %v5939_v60  ;;  %v2486_v17 = vrot.slane %v2480_v52, 5  ;;  %v2393_v10 = vrot.slane %v2386_v6, 1  ;;  %v2489_v31 = vrot.slane %v2482_v54, 5 }
 0x2e7   : > { %2443 = vrot.lane.b32.xlu1 %v2440_v46, %s3264_s5  ;;  %2514 = vrot.lane.b32.xlu0 %v2511_v59, %s3264_s5  ;;  %v2109_v51 = vpop.permute.xlu1 %2108  ;;  %v2488_v35 = vsel %vm484_vm8, %v2486_v17, %v2487_v12  ;;  %v2394_v23 = vsel %vm508_vm7, %v2391_v13, %v2393_v10  ;;  %v2490_v5 = vsel %vm484_vm8, %v2487_v12, %v2489_v31 }
 0x2e8   : > { %v1992_v37 = vpop.permute.xlu0 %1991  ;;  %v2117_v24 = vadd.f32 %v2109_v51, %v5894_v11 }
 0x2e9   : > { %v2000_v60 = vadd.f32 %v1992_v37, %v1904_v7 }
 0x2eb   : > { %2512 = vrot.lane.b32.xlu1 %v2509_v40, %s3264_s5  ;;  %2395 = vrot.lane.b32.xlu0 %v2392_v9, %s3264_s5  ;;  %v2113_v41 = vpop.permute.xlu1 %2112 }
 0x2ec   : > { %v1996_v43 = vpop.permute.xlu0 %1995  ;;  %v2119_v3 = vadd.f32 %v2113_v41, %v5914_v38 }
 0x2ed   : > { %v2002_v27 = vadd.f32 %v1996_v43, %v1906_v57 }
 0x2ef   : > { %2516 = vrot.lane.b32.xlu1 %v2510_v2, %s3264_s5  ;;  %2491 = vrot.lane.b32.xlu0 %v2488_v35, %s3264_s5  ;;  %v1994_v11 = vpop.permute.xlu1 %1993 }
 0x2f0   : > { %v2061_v7 = vpop.permute.xlu0 %2060  ;;  %v2001_v19 = vadd.f32 %v1994_v11, %v5941_v47 }
 0x2f1   : > { %v2068_v39 = vadd.f32 %v2061_v7, %v1976_v50 }
 0x2f3   : > { %2397 = vrot.lane.b32.xlu1 %v2394_v23, %s3264_s5  ;;  %v2059_v63 = vpop.permute.xlu1 %2058 }
 0x2f4   : > { %v1946_v38 = vpop.permute.xlu0 %1945  ;;  %v2067_v15 = vadd.f32 %v2059_v63, %v5954_v8 }
 0x2f5   : > { %v1951_v20 = vadd.f32 %v1946_v38, %v1859_v58 }
 0x2f7   : > { %2493 = vrot.lane.b32.xlu1 %v2490_v5, %s3264_s5  ;;  %v2063_v28 = vpop.permute.xlu1 %2062  ;;  %s6034_s5 = sld [smem:[#allocation9 + $0x1]] }
 0x2f8   : > { %v2205_v57 = vpop.permute.xlu0 %2204  ;;  %v2069_v61 = vadd.f32 %v2063_v28, %v5967_v26 }
 0x2f9   : > { %v2213_v47 = vadd.f32 %v2205_v57, %v2117_v24 }
 0x2fb   : > { %v1948_v36 = vpop.permute.xlu1 %1947 }
 0x2fc   : > { %v2209_v21 = vpop.permute.xlu0 %2208  ;;  %v1952_v29 = vadd.f32 %v1948_v36, %v1860_v4 }
 0x2fd   : > { %v2215_v45 = vadd.f32 %v2209_v21, %v2119_v3 }
 0x2ff   : > { %v2207_v53 = vpop.permute.xlu1 %2206 }
 0x300   : > { %v2086_v1 = vpop.permute.xlu0 %2085  ;;  %v2214_v16 = vadd.f32 %v2207_v53, %v2118_v25 }
 0x301   : > { %v6012_v14 = vadd.f32 %v2086_v1, %v2001_v19 }
 0x303   : > { %v2084_v8 = vpop.permute.xlu1 %2083 }
 0x304   : > { %v2155_v2 = vpop.permute.xlu0 %2154  ;;  %v2092_v55 = vadd.f32 %v2084_v8, %v2000_v60 }
 0x305   : > { %v6014_v0 = vadd.f32 %v2155_v2, %v2067_v15 }
 0x307   : > { %v2088_v22 = vpop.permute.xlu1 %2087 }
 0x308   : > { %v2159_v50 = vpop.permute.xlu0 %2158  ;;  %v2094_v34 = vadd.f32 %v2088_v22, %v2002_v27 }
 0x309   : > { %v6016_v42 = vadd.f32 %v2159_v50, %v2069_v61 }
 0x30b   : > { %v2157_v26 = vpop.permute.xlu1 %2156 }
 0x30c   : > { %v2044_v30 = vpop.permute.xlu0 %2043  ;;  %v2164_v49 = vadd.f32 %v2157_v26, %v2068_v39 }
 0x30d   : > { %v6018_v4 = vadd.f32 %v2044_v30, %v1952_v29 }
 0x30f   : > { %v2042_v44 = vpop.permute.xlu1 %2041 }
 0x310   : > { %v2281_v32 = vpop.permute.xlu0 %2280  ;;  %v6020_v48 = vadd.f32 %v2042_v44, %v1951_v20 }
 0x311   : > { %v2288_v46 = vadd.f32 %v2281_v32, %v2214_v16 }
 0x313   : > { %v2279_v59 = vpop.permute.xlu1 %2278 }
 0x314   : > { %v2180_v18 = vpop.permute.xlu0 %2179  ;;  %v2287_v58 = vadd.f32 %v2279_v59, %v2213_v47 }
 0x315   : > { %v2188_v25 = vadd.f32 %v2180_v18, %v2092_v55 }
 0x317   : > { %v2283_v13 = vpop.permute.xlu1 %2282 }
 0x318   : > { %v2184_v33 = vpop.permute.xlu0 %2183  ;;  %v2289_v31 = vadd.f32 %v2283_v13, %v2215_v45 }
 0x319   : > { %v2190_v62 = vadd.f32 %v2184_v33, %v2094_v34 }
 0x31b   : > { %v2182_v56 = vpop.permute.xlu1 %2181 }
 0x31c   : > { %v2241_v52 = vpop.permute.xlu0 %2240  ;;  %v2189_v50 = vadd.f32 %v2182_v56, %v6012_v14 }
 0x31d   : > { %v2248_v30 = vadd.f32 %v2241_v52, %v2164_v49 }
 0x31f   : > { %v2239_v51 = vpop.permute.xlu1 %2238 }
 0x320   : > { %v2134_v37 = vpop.permute.xlu0 %2133 }
 0x323   : > { %v2243_v40 = vpop.permute.xlu1 %2242 }
 0x324   : > { %v2371_v6 = vpop.permute.xlu0 %2370  ;;  %v2249_v14 = vadd.f32 %v2243_v40, %v6016_v42 }
 0x325   : > { %v2379_v7 = vadd.f32 %v2371_v6, %v2287_v58  ;;  %v2247_v58 = vadd.f32 %v2239_v51, %v6014_v0 }
 0x327   : > { %v6022_v24 = vpop.permute.xlu1 %2135 }
 0x329   : > { %v2375_v60 = vpop.permute.xlu0 %2374 }
 0x32a   : > { %v2381_v38 = vadd.f32 %v2375_v60, %v2289_v31 }
 0x32b   : > { %v2373_v9 = vpop.permute.xlu1 %2372 }
 0x32c   : > { %v2380_v11 = vadd.f32 %v2373_v9, %v2288_v46 }
 0x32d   : > { %v2261_v12 = vpop.permute.xlu0 %2260 }
 0x32e   : > { %v2268_v46 = vadd.f32 %v2261_v12, %v2189_v50 }
 0x330   : > { %v2259_v17 = vpop.permute.xlu1 %2258 }
 0x331   : > { %v2325_v41 = vpop.permute.xlu0 %2324  ;;  %v2267_v16 = vadd.f32 %v2259_v17, %v2188_v25  ;;  %v2139_v25 = vadd.f32 %v2134_v37, %v6020_v48 }
 0x332   : > { %v2333_v9 = vadd.f32 %v2325_v41, %v2247_v58 }
 0x334   : > { %v2263_v43 = vpop.permute.xlu1 %2262 }
 0x335   : > { %v2329_v54 = vpop.permute.xlu0 %2328  ;;  %v2269_v55 = vadd.f32 %v2263_v43, %v2190_v62 }
 0x336   : > { %v2335_v12 = vadd.f32 %v2329_v54, %v2249_v14 }
 0x338   : > { %v2327_v3 = vpop.permute.xlu1 %2326 }
 0x339   : > { %v6024_v27 = vpop.permute.xlu0 %2224  ;;  %v2334_v18 = vadd.f32 %v2327_v3, %v2248_v30 }
 0x33c   : > { %v2223_v35 = vpop.permute.xlu1 %2222 }
 0x33d   : > { %v2469_v10 = vpop.permute.xlu0 %2468  ;;  %v2228_v56 = vadd.f32 %v2223_v35, %v2139_v25 }
 0x33e   : > { %v2476_v19 = vadd.f32 %v2469_v10, %v2380_v11 }
 0x340   : > { %v2467_v39 = vpop.permute.xlu1 %2466  ;;  %v2540_v15 = vrot.slane %v2476_v19, 1 }
 0x341   : > { %v2350_v23 = vpop.permute.xlu0 %2349  ;;  %v2475_v63 = vadd.f32 %v2467_v39, %v2379_v7 }
 0x342   : > { %v2358_v8 = vadd.f32 %v2350_v23, %v2267_v16  ;;  %v2140_v23 = vadd.f32 %v6022_v24, %v6018_v4 }
 0x343   : > { %v2539_v20 = vrot.slane %v2475_v63, 1 }
 0x344   : > { %v2471_v5 = vpop.permute.xlu1 %2470 }
 0x345   : > { %v2354_v28 = vpop.permute.xlu0 %2353  ;;  %v2477_v57 = vadd.f32 %v2471_v5, %v2381_v38  ;;  %v2541_v61 = vsel %vm508_vm7, %v2539_v20, %v2540_v15 }
 0x346   : > { %v2360_v34 = vadd.f32 %v2354_v28, %v2269_v55  ;;  %v2565_v28 = vstv %s6032_s23 }
 0x347   : > { %v2542_v47 = vrot.slane %v2477_v57, 1 }
 0x348   : > { %v2352_v36 = vpop.permute.xlu1 %2351 }
 0x349   : > { %v2419_v21 = vpop.permute.xlu0 %2418  ;;  %v2543_v29 = vsel %vm508_vm7, %v2540_v15, %v2542_v47  ;;  %v2359_v13 = vadd.f32 %v2352_v36, %v2268_v46  ;;  %v2229_v15 = vadd.f32 %v6024_v27, %v2140_v23 }
 0x34a   : > { %v2426_v6 = vadd.f32 %v2419_v21, %v2334_v18  ;;  %v2568_v21 = vstv %s6034_s5 }
 0x34d   : > { %v2417_v53 = vpop.permute.xlu1 %2416  ;;  %v2304_v1 = vpop.permute.xlu0 %2303 }
 0x34e   : > { %v2425_v52 = vadd.f32 %v2417_v53, %v2333_v9  ;;  %v2309_v10 = vadd.f32 %v2304_v1, %v2228_v56  ;;  %v2571_v1 = vstv %s3003_s14 }
 0x351   : > { %v2421_v2 = vpop.permute.xlu1 %2420  ;;  %v2442_v45 = vpop.permute.xlu0 %2441 }
 0x352   : > { %v2450_v22 = vadd.f32 %v2442_v45, %v2358_v8  ;;  %v2427_v7 = vadd.f32 %v2421_v2, %v2335_v12 }
 0x354   : > { %v2547_v26 = vadd.f32 %v2541_v61, %v2450_v22 }
 0x355   : > { %v2306_v44 = vpop.permute.xlu1 %2305  ;;  %v2446_v32 = vpop.permute.xlu0 %2445 }
 0x356   : > { %v2452_v59 = vadd.f32 %v2446_v32, %v2360_v34  ;;  %v2553_v0 = vrot.slane %v2547_v26, 2  ;;  %v2310_v61 = vadd.f32 %v2306_v44, %v2229_v15  ;;  %v2586_v44 = vlaneseq }
 0x357   : > { %v3265_v32 = vmov 1966171168  }
 0x358   : > { %v2549_v33 = vadd.f32 %v2542_v47, %v2452_v59  ;;  %v2593_v46 = vunpack.c.l.s4 %v3265_v32  ;;  %vm2588_vm10 = vcmp.lt.s32.totalorder %v2586_v44, 16  ;;  %vm6051_vm11 = vcmp.ge.s32.totalorder %v2586_v44, 16 }
 0x359   : > { %v2444_v60 = vpop.permute.xlu1 %2443  ;;  %v2515_v62 = vpop.permute.xlu0 %2514  ;;  %vm6056_vm12 = vcmp.lt.s32.totalorder %v2586_v44, 32  ;;  %vm6065_vm14 = vcmp.ge.s32.totalorder %v2586_v44, 32  ;;  %vm6070_vm15 = vcmp.lt.s32.totalorder %v2586_v44, 48  ;;  %vm6079_vm1 = vcmp.ge.s32.totalorder %v2586_v44, 48 }
 0x35a   : > { %v2451_v17 = vadd.f32 %v2444_v60, %v2359_v13  ;;  %v2522_v49 = vadd.f32 %v2515_v62, %v2426_v6  ;;  %v2556_v51 = vrot.slane %v2549_v33, 2  ;;  %v2594_v58 = vunpack.c.0.s8 %v2593_v46  ;;  %vm2619_vm13 = vmand %vm6051_vm11, %vm6056_vm12 }
 0x35b   : > { %v6046_v13 = vshrl.u32 %v2586_v44, 7  ;;  %vm2627_vm0 = vmand %vm6065_vm14, %vm6070_vm15  ;;  %vm6084_vm2 = vcmp.lt.s32.totalorder %v2586_v44, 64  ;;  %vm6098_vm4 = vcmp.ge.s32.totalorder %v2586_v44, 64  ;;  %vm6122_vm8 = vcmp.lt.s32.totalorder %v2586_v44, 96 }
 0x35c   : > { %v2548_v43 = vadd.f32 %v2543_v29, %v2451_v17  ;;  %v2528_v19 = vrot.slane %v2522_v49, 1  ;;  %vm2635_vm3 = vmand %vm6079_vm1, %vm6084_vm2  ;;  %vm6146_vm11 = vcmp.lt.s32.totalorder %v2586_v44, 112  ;;  %vm2687_vm14 = vcmp.lt.s32.totalorder %v2586_v44, 128 }
 0x35d   : > { %v2513_v3 = vpop.permute.xlu1 %2512  ;;  %v2396_v11 = vpop.permute.xlu0 %2395  ;;  %v2597_v33 = vsub.s32 %v2594_v58, %v6046_v13 }
 0x35e   : > { %v2554_v48 = vrot.slane %v2548_v43, 2  ;;  %v2521_v37 = vadd.f32 %v2513_v3, %v2425_v52  ;;  %v2401_v40 = vadd.f32 %v2396_v11, %v2309_v10 }
 0x360   : > { %v2527_v42 = vrot.slane %v2521_v37, 1  ;;  %v2555_v41 = vsel %vm698_vm5, %v2553_v0, %v2554_v48  ;;  %v2557_v54 = vsel %vm698_vm5, %v2554_v48, %v2556_v51  ;;  %vm6103_vm5 = vcmp.lt.s32.totalorder %v2586_v44, 80 }
 0x361   : > { %v2517_v35 = vpop.permute.xlu1 %2516  ;;  %v2492_v39 = vpop.permute.xlu0 %2491  ;;  %vm2657_vm6 = vmand %vm6098_vm4, %vm6103_vm5 }
 0x362   : > { %v2523_v31 = vadd.f32 %v2517_v35, %v2427_v7  ;;  %v2529_v63 = vsel %vm508_vm7, %v2527_v42, %v2528_v19  ;;  %v2497_v38 = vadd.f32 %v2492_v39, %v2401_v40 }
 0x364   : > { %v2530_v20 = vrot.slane %v2523_v31, 1  ;;  %v2534_v5 = vadd.f32 %v2529_v63, %v2497_v38 }
 0x365   : > { %v2398_v57 = vpop.permute.xlu1 %2397 }
 0x366   : > { %v2560_v47 = vadd.f32 %v2555_v41, %v2534_v5  ;;  %v2531_v36 = vsel %vm508_vm7, %v2528_v19, %v2530_v20  ;;  %v2402_v53 = vadd.f32 %v2398_v57, %v2310_v61  ;;  %vm6117_vm7 = vcmp.ge.s32.totalorder %v2586_v44, 80 }
 0x367   : > { %vm2672_vm9 = vmand %vm6117_vm7, %vm6122_vm8 }
 0x368   : > { %v2566_v29 = vadd.f32 %v2565_v28, %v2560_v47 }
 0x369   : > { %v2494_v16 = vpop.permute.xlu1 %2493 }
 0x36a   : > { %v2569_v4 = vmul.f32 %v2568_v21, %v2566_v29  ;;  %v2498_v24 = vadd.f32 %v2494_v16, %v2402_v53 }
 0x36c   : > { %v2572_v8 = vadd.f32 %v2571_v1, %v2569_v4  ;;  %v2535_v2 = vadd.f32 %v2531_v36, %v2498_v24 }
 0x36e   : > { %v3004_v45 = vmul.f32 -1.442695, %v2572_v8  ;;  %v2561_v55 = vadd.f32 %v2557_v54, %v2535_v2 }
 0x370   : > { %3104 = vpow2.f32 %v3004_v45  ;;  %v2567_v27 = vadd.f32 %v2565_v28, %v2561_v55 }
 0x372   : > { %v2570_v22 = vmul.f32 %v2568_v21, %v2567_v27 }
 0x374   : > { %v2573_v50 = vadd.f32 %v2571_v1, %v2570_v22 }
 0x376   : > { %v3005_v34 = vmul.f32 -1.442695, %v2573_v50 }
 0x378   : > { %3106 = vpow2.f32 %v3005_v34 }
 0x37d   : > { %v3105_v26 = vpop.eup %3104 }
 0x37e   : > { %v2580_v30 = vadd.f32 1.0, %v3105_v26  ;;  %v2773_v26 = vsub.s32 0, %v6046_v13 }
 0x380   : > { %3108 = vrcp.f32 %v2580_v30  ;;  %v2777_v30 = vsub.s32 1, %v6046_v13 }
 0x385   : > { %v3107_v59 = vpop.eup %3106 }
 0x386   : > { %v2581_v18 = vadd.f32 1.0, %v3107_v59 }
 0x388   : > { %3110 = vrcp.f32 %v2581_v18  ;;  %v3118_v18 = vld [vmem:[%s6946_s29] sm:$0xff] }
 0x38d   : > { %v3109_v25 = vpop.eup %3108 }
 0x38e   : > { %v2598_v6 = vrot.slane %v3109_v25, %v2597_v33  ;;  %2590 = vst.msk [vmem:[#allocation3] sm:$0x1] %vm2588_vm10, %v3109_v25  ;;  %v2637_v49 = vcombine.high %v3109_v25, %v3109_v25 }
 0x390   : > { %v2599_v60 = vcombine.high %v2598_v6, %v2598_v6  ;;  %v2606_v9 = vrot.slane %v2598_v6, %v2597_v33  ;;  %v2644_v3 = vrot.slane %v2637_v49, %v2597_v33 }
 0x392   : > { %v2613_v62 = vrot.slane %v2599_v60, %v2597_v33  ;;  %v2621_v14 = vcombine.high %v2606_v9, %v2606_v9  ;;  %v2651_v0 = vrot.slane %v2644_v3, %v2597_v33  ;;  %v2659_v51 = vcombine.high %v2644_v3, %v2644_v3 }
 0x394   : > { %2614 = vrot.lane.b32.xlu0 %v2613_v62, %s3266_s16  ;;  %v2629_v12 = vcombine.high %v2613_v62, %v2613_v62  ;;  %v2666_v7 = vrot.slane %v2659_v51, %v2597_v33  ;;  %v2674_v40 = vcombine.high %v2651_v0, %v2651_v0 }
 0x395   : > { %v3111_v17 = vpop.eup %3110 }
 0x396   : > { %v2698_v56 = vrot.slane %v3111_v17, %v2597_v33  ;;  %2690 = vst.msk [vmem:[#allocation3 + $0x1] sm:$0x1] %vm2588_vm10, %v3111_v17  ;;  %v2728_v48 = vcombine.high %v3111_v17, %v3111_v17  ;;  %v2682_v35 = vcombine.high %v2666_v7, %v2666_v7  ;;  %vm6141_vm10 = vcmp.ge.s32.totalorder %v2586_v44, 96 }
 0x397   : > { %vm2680_vm12 = vmand %vm6141_vm10, %vm6146_vm11 }
 0x398   : > { %2622 = vrot.lane.b32.xlu0 %v2621_v14, %s3267_s19  ;;  %v2699_v52 = vcombine.high %v2698_v56, %v2698_v56  ;;  %v2706_v10 = vrot.slane %v2698_v56, %v2597_v33  ;;  %v2735_v19 = vrot.slane %v2728_v48, %v2597_v33 }
 0x39a   : > { %v2713_v43 = vrot.slane %v2699_v52, %v2597_v33  ;;  %v2718_v11 = vcombine.high %v2706_v10, %v2706_v10  ;;  %v2742_v42 = vrot.slane %v2735_v19, %v2597_v33  ;;  %v2747_v41 = vcombine.high %v2735_v19, %v2735_v19 }
 0x39c   : > { %2714 = vrot.lane.b32.xlu1 %v2713_v43, %s3266_s16  ;;  %2630 = vrot.lane.b32.xlu0 %v2629_v12, %s3268_s9  ;;  %v2723_v37 = vcombine.high %v2713_v43, %v2713_v43  ;;  %v2754_v54 = vrot.slane %v2747_v41, %v2597_v33  ;;  %v2759_v39 = vcombine.high %v2742_v42, %v2742_v42 }
 0x39e   : > { %v2764_v23 = vcombine.high %v2754_v54, %v2754_v54 }
 0x3a0   : > { %2719 = vrot.lane.b32.xlu1 %v2718_v11, %s3267_s19  ;;  %2652 = vrot.lane.b32.xlu0 %v2651_v0, %s3269_s21 }
 0x3a4   : > { %2724 = vrot.lane.b32.xlu1 %v2723_v37, %s3268_s9  ;;  %2667 = vrot.lane.b32.xlu0 %v2666_v7, %s3270_s6 }
 0x3a8   : > { %2743 = vrot.lane.b32.xlu1 %v2742_v42, %s3269_s21  ;;  %2675 = vrot.lane.b32.xlu0 %v2674_v40, %s3271_s26 }
 0x3ac   : > { %2755 = vrot.lane.b32.xlu1 %v2754_v54, %s3270_s6  ;;  %2683 = vrot.lane.b32.xlu0 %v2682_v35, %s3272_s15 }
 0x3b0   : > { %2760 = vrot.lane.b32.xlu1 %v2759_v39, %s3271_s26 }
 0x3b4   : > { %2765 = vrot.lane.b32.xlu1 %v2764_v23, %s3272_s15 }
 0x406   : > { %v2615_v20 = vpop.permute.xlu0 %2614 }
 0x407   : > { %2620 = vst.msk [vmem:[#allocation3] sm:$0x1] %vm2619_vm13, %v2615_v20 }
 0x40a   : > { %v2623_v57 = vpop.permute.xlu0 %2622 }
 0x40b   : > { %2628 = vst.msk [vmem:[#allocation3] sm:$0x1] %vm2627_vm0, %v2623_v57 }
 0x40e   : > { %v2715_v36 = vpop.permute.xlu1 %2714  ;;  %v2631_v21 = vpop.permute.xlu0 %2630 }
 0x40f   : > { %2717 = vst.msk [vmem:[#allocation3 + $0x1] sm:$0x1] %vm2619_vm13, %v2715_v36  ;;  %vm2686_vm13 = vcmp.ge.s32.totalorder %v2586_v44, 112 }
 0x410   : > { %2636 = vst.msk [vmem:[#allocation3] sm:$0x1] %vm2635_vm3, %v2631_v21  ;;  %vm2688_vm15 = vmand %vm2686_vm13, %vm2687_vm14 }
 0x412   : > { %v2720_v1 = vpop.permute.xlu1 %2719  ;;  %v2653_v16 = vpop.permute.xlu0 %2652 }
 0x413   : > { %2722 = vst.msk [vmem:[#allocation3 + $0x1] sm:$0x1] %vm2627_vm0, %v2720_v1 }
 0x414   : > { %2658 = vst.msk [vmem:[#allocation3] sm:$0x1] %vm2657_vm6, %v2653_v16 }
 0x416   : > { %v2725_v8 = vpop.permute.xlu1 %2724  ;;  %v2668_v2 = vpop.permute.xlu0 %2667 }
 0x417   : > { %2727 = vst.msk [vmem:[#allocation3 + $0x1] sm:$0x1] %vm2635_vm3, %v2725_v8 }
 0x418   : > { %2673 = vst.msk [vmem:[#allocation3] sm:$0x1] %vm2672_vm9, %v2668_v2 }
 0x41a   : > { %v2744_v45 = vpop.permute.xlu1 %2743  ;;  %v2676_v55 = vpop.permute.xlu0 %2675 }
 0x41b   : > { %2746 = vst.msk [vmem:[#allocation3 + $0x1] sm:$0x1] %vm2657_vm6, %v2744_v45 }
 0x41c   : > { %2681 = vst.msk [vmem:[#allocation3] sm:$0x1] %vm2680_vm12, %v2676_v55 }
 0x41e   : > { %v2756_v27 = vpop.permute.xlu1 %2755  ;;  %v2684_v22 = vpop.permute.xlu0 %2683 }
 0x41f   : > { %2758 = vst.msk [vmem:[#allocation3 + $0x1] sm:$0x1] %vm2672_vm9, %v2756_v27 }
 0x420   : > { %2689 = vst.msk [vmem:[#allocation3] sm:$0x1] %vm2688_vm15, %v2684_v22 }
 0x422   : > { %v2761_v50 = vpop.permute.xlu1 %2760 }
 0x423   : > { %2763 = vst.msk [vmem:[#allocation3 + $0x1] sm:$0x1] %vm2680_vm12, %v2761_v50 }
 0x426   : > { %v2766_v34 = vpop.permute.xlu1 %2765 }
 0x427   : > { %2768 = vst.msk [vmem:[#allocation3 + $0x1] sm:$0x1] %vm2688_vm15, %v2766_v34 }
 0x42e   : > { %v2769_v44 = vld [vmem:[#allocation3] sm:$0x3] }
 0x42f   : > { %v2774_v32 = vrot.slane %v2769_v44, %v2773_v26  ;;  %v2778_v46 = vrot.slane %v2769_v44, %v2777_v30 }
 0x431   : > { %v2779_v59 = vcombine.low %v2774_v32, %v2778_v46 }
 0x433   : > { %v2781_v58 = vmul.f32 %v3118_v18, %v2779_v59 }
 0x435   : > { %2782 = vst [vmem:[%s211_s8] sm:$0xff] %v2781_v58 }
 0x436   : > { %3186 = shalt.err (!%p3183_p5)
}
 0x437   : > { %s3187_s20 = scalar_lea.hbm %s2796_s0, 128  ;;  %s3191_s13 = scalar_lea.hbm %s6949_s25, 256 }
 0x438   : > { %p3188_p7 = scmp.ne.s32.totalorder %s2796_s0, %s3187_s20  ;;  %p3192_p12 = scmp.lt.s32.totalorder %s2796_s0, %s6949_s25 }
 0x439   : > { %p3193_p13 = scmp.lt.s32.totalorder %s3191_s13, %s3187_s20 }
 0x43a   : > { %p3189_p10 = pnand %p3188_p7, %p6950_p3 }
 0x43b   : > { %p3194_p4 = por %p3193_p13, %p3192_p12 }
 0x43c   : > { %p3190_p6 = pneg %p3189_p10 }
 0x43e   : > { %p3195_p8 = pnand %p3194_p4, %p3190_p6 }
 0x440   : > { %3198 = shalt.err (!%p3195_p8)
}
 0x441   : > { %3023 = dma.vmem_to_hbm [thread:$0]  (%p6950_p3), %s2799_s17, 128, %s2796_s0, %s2784_s1  }
 0x442 PF: > { %s6951_s14 = sld [smem:[#allocation16_spill]] }
 0x443   : > { %s6952_s16 = sld [smem:[#allocation21_spill]] }
 0x444   : > { %s6953_s19 = sld [smem:[#allocation19_spill]] }
 0x448   : > { %s2810_s9 = sand.u32 1, %s6951_s14  }
 0x449   : > { %p6954_p11 = scmp.ne.s32.totalorder %s6952_s16, 0  ;;  %s2811_s21 = scalar_lea.sflag [#allocation6], %s2810_s9 }
 0x44a   : > { %p6955_p0 = scmp.ge.s32.totalorder %s6953_s19, 2 }
 0x44c   : > { %p3037_p9 = pnand %p6955_p0, %p6954_p11 }
 0x44e   : > { %p3038_p1 = pneg %p3037_p9 }
 0x450   : > { %3228 = dma.done.wait (%p3038_p1), %s2811_s21, 128  }
 0x451   : > { %3230 = vsyncadd (%p3038_p1), %s2811_s21, 4294967168  ;;  %s6956_s15 = sld [smem:[#allocation22_spill]] }
 0x452   : > { %s6957_s12 = sld [smem:[#allocation17_spill]] }
 0x453   : > { %s6958_s13 = sld [smem:[#allocation18_spill]] }
 0x454   : > { %s6959_s14 = sld [smem:[#allocation23_spill]] }
 0x457   : > { %p18_p2 = scmp.ge.s32.totalorder %s6956_s15, 4  }
 0x459   :  { %20 = sbr.rel (!%p18_p2) target bundleno = 12 (0xc), region = 88 }
 0x45e   :  { %2816 = vsyncpa [#allocation5], 1 }
 0x45f   :  { %2818 = vsyncpa [#allocation5 + $0x1], 1 }
 0x460   :  { %2819 = vsyncpa [#allocation6], 1 }
 0x461   :  { %2821 = vsyncpa [#allocation6 + $0x1], 1 }
 0x462   :  { %2822 = vsyncpa [#allocation7], 1 }
 0x463   :  { %2824 = vsyncpa [#allocation7 + $0x1], 1 }
 0x464   :  { %2825 = vsyncpa [#allocation8], 1 }
 0x465   :  { %2827 = vsyncpa [#allocation8 + $0x1], 1 }

</bundles_post_ra>
